<compile_context>
chip_gen: v6e
topology: v6e:2x2x1
jax: 0.10.0
libtpu: 0.0.40
codegen_flags: <defaults>
</compile_context>

<pallas_src>
import jax
import jax.numpy as jnp
from jax.experimental import pallas as pl
from jax.experimental.pallas import tpu as pltpu


NUM_CLASS = 2
LANE = 128
HIDDEN = 768


def _round_up(n, m):
    return -(-n // m) * m


def _make_kernel(S_code, S_text, S_tile_c, S_tile_t, Kc, Kt, K):
    """Build the fused kernel with the true sequence lengths baked in via closure."""
    inv_c = 1.0 / float(S_code)
    inv_t = 1.0 / float(S_text)

    def kernel(code_ref, text_ref, w0t_ref, w0c_ref, b0_ref, w1_ref, b1_ref,
               w2_ref, b2_ref, out_ref, acc_c, acc_t):
        f32 = jnp.float32
        k = pl.program_id(1)

        @pl.when(k == 0)
        def _init():
            acc_c[...] = jnp.zeros_like(acc_c)
            acc_t[...] = jnp.zeros_like(acc_t)

        def accumulate(ref, acc, s_true, s_tile, k_valid):
            def body():
                x = ref[...]                                   # (TB, s_tile, H)
                if s_true % s_tile != 0:
                    # Mask the ragged tail of the last (or only) seq chunk.
                    tok = jax.lax.broadcasted_iota(jnp.int32, (1, s_tile, 1), 1)
                    x = jnp.where(k * s_tile + tok < s_true, x,
                                  jnp.zeros((), x.dtype))
                # dtype-accumulating sum: no f32 copy of the whole input tile.
                acc[...] += jnp.sum(x, axis=1, dtype=f32)      # (TB, H)
            if k_valid == K:
                body()                     # every seq step contributes
            else:
                pl.when(k < k_valid)(body)  # skip clamped (re-fetched) chunks

        accumulate(code_ref, acc_c, S_code, S_tile_c, Kc)
        accumulate(text_ref, acc_t, S_text, S_tile_t, Kt)

        @pl.when(k == K - 1)
        def _finalize():
            pool_code = acc_c[...] * f32(inv_c)                # (TB, H) mean over tokens
            pool_text = acc_t[...] * f32(inv_t)

            # fc on concat([text, code]) == text @ W0[:H] + code @ W0[H:]; weights are
            # used in their stored dtype (bf16 goes straight to the MXU, f32 stays f32).
            x = jnp.dot(pool_text.astype(w0t_ref.dtype), w0t_ref[...],
                        preferred_element_type=f32)
            x = x + jnp.dot(pool_code.astype(w0c_ref.dtype), w0c_ref[...],
                            preferred_element_type=f32)
            x = x + b0_ref[...]                                # (TB, H)

            x = jnp.dot(x.astype(w1_ref.dtype), w1_ref[...],
                        preferred_element_type=f32) + b1_ref[...]   # (TB, H//2)

            logits = jnp.dot(x.astype(w2_ref.dtype), w2_ref[...],
                             preferred_element_type=f32) + b2_ref[...]  # (TB, 128)
            out_ref[...] = logits.astype(out_ref.dtype)

    return kernel


def relation_classify_header2(code_hidden, text_hidden, params, *,
                              block_b=16, seq_tile=128, out_dtype=jnp.float32):
    """Pallas forward of RelationClassifyHeader_2.

    code_hidden: (B, S_code, H), text_hidden: (B, S_text, H)  [f32 or bf16]
    params = (w0 (2H,H), b0 (H,), w1 (H,H/2), b1 (H/2,), w2 (H/2,2), b2 (2,))
    returns logits (B, 2) in out_dtype.
    """
    w0, b0, w1, b1, w2, b2 = params
    B, S_code, H = code_hidden.shape
    Bt, S_text, Ht = text_hidden.shape
    assert Bt == B and Ht == H
    # AdaptiveAvgPool2d((1,768)) is a plain token mean only when the feature dim is 768.
    assert H == HIDDEN, "RelationClassifyHeader_2 fixes hidden_size = 768"
    assert w0.shape == (2 * H, H) and w1.shape == (H, H // 2)
    assert w2.shape == (H // 2, NUM_CLASS)
    assert block_b % 8 == 0 and seq_tile % 8 == 0

    # Split W0 so concat([text, code]) @ W0 becomes two aligned half-matmuls.
    w0_text = w0[:H]
    w0_code = w0[H:]

    # Pad the tiny class dim out to a full 128-lane slab -> unmasked stores.
    w2p = jnp.zeros((H // 2, LANE), w2.dtype).at[:, :NUM_CLASS].set(w2)
    b2p = jnp.zeros((LANE,), b2.dtype).at[:NUM_CLASS].set(b2)

    # Batch tiling: NO padding of the big tensors; the last block may be ragged.
    block_b = B if B <= block_b else block_b
    nb = pl.cdiv(B, block_b)

    # Sequence tiling (per-input tile so a block never exceeds its array's seq dim).
    S_tile_c = S_code if S_code <= seq_tile else seq_tile
    S_tile_t = S_text if S_text <= seq_tile else seq_tile
    Kc = pl.cdiv(S_code, S_tile_c)
    Kt = pl.cdiv(S_text, S_tile_t)
    K = max(Kc, Kt)

    def code_map(i, k):
        return (i, k if Kc == K else jnp.minimum(k, Kc - 1), 0)

    def text_map(i, k):
        return (i, k if Kt == K else jnp.minimum(k, Kt - 1), 0)

    def fixed(i, k):
        return (0, 0)

    kernel = _make_kernel(S_code, S_text, S_tile_c, S_tile_t, Kc, Kt, K)

    # VMEM budget: double-buffered input blocks + (double-buffered) resident weights
    # + output + scratch, plus headroom.  Stays well under v7x's 64 MiB with defaults.
    in_bytes = block_b * H * (S_tile_c * code_hidden.dtype.itemsize
                              + S_tile_t * text_hidden.dtype.itemsize)
    w_bytes = sum(int(a.size) * a.dtype.itemsize
                  for a in (w0_text, w0_code, b0, w1, b1, w2p, b2p))
    out_bytes = block_b * LANE * jnp.dtype(out_dtype).itemsize
    scratch_bytes = 2 * block_b * H * 4
    vmem_limit = int(2 * in_bytes + 2 * w_bytes + 2 * out_bytes + scratch_bytes
                     + (16 << 20))

    out = pl.pallas_call(
        kernel,
        out_shape=jax.ShapeDtypeStruct((B, LANE), out_dtype),
        grid_spec=pltpu.PrefetchScalarGridSpec(
            num_scalar_prefetch=0,
            grid=(nb, K),
            in_specs=[
                pl.BlockSpec((block_b, S_tile_c, H), code_map),   # code chunk
                pl.BlockSpec((block_b, S_tile_t, H), text_map),   # text chunk
                pl.BlockSpec((H, H),        fixed),               # W0 (text half)
                pl.BlockSpec((H, H),        fixed),               # W0 (code half)
                pl.BlockSpec((1, H),        fixed),               # b0
                pl.BlockSpec((H, H // 2),   fixed),               # W1
                pl.BlockSpec((1, H // 2),   fixed),               # b1
                pl.BlockSpec((H // 2, LANE), fixed),              # W2 (lane-padded)
                pl.BlockSpec((1, LANE),     fixed),               # b2 (lane-padded)
            ],
            out_specs=pl.BlockSpec((block_b, LANE), lambda i, k: (i, 0)),
            scratch_shapes=[pltpu.VMEM((block_b, H), jnp.float32),   # pooled-sum code
                            pltpu.VMEM((block_b, H), jnp.float32)],  # pooled-sum text
        ),
        compiler_params=pltpu.CompilerParams(
            dimension_semantics=("parallel", "arbitrary"),
            vmem_limit_bytes=vmem_limit),
    )(code_hidden, text_hidden,
      w0_text, w0_code, b0.reshape(1, H), w1, b1.reshape(1, H // 2),
      w2p, b2p.reshape(1, LANE))

    return out[:, :NUM_CLASS]


def rch2_ref(code_hidden, text_hidden, params):
    """Pure-JAX reference mirroring the PyTorch forward."""
    w0, b0, w1, b1, w2, b2 = params
    hp = jax.lax.Precision.HIGHEST
    pool_code = code_hidden.astype(jnp.float32).mean(axis=1)
    pool_text = text_hidden.astype(jnp.float32).mean(axis=1)
    combine = jnp.concatenate([pool_text, pool_code], axis=-1)
    x = jnp.dot(combine, w0, precision=hp) + b0
    x = jnp.dot(x, w1, precision=hp) + b1
    return jnp.dot(x, w2, precision=hp) + b2


if __name__ == "__main__":
    # Small deterministic inputs (hidden size is fixed at 768 by the module).
    B, S_code, S_text, H = 2, 8, 16, 768
    key = jax.random.PRNGKey(0)
    kc, kt, k0, k1, k2, kb0, kb1, kb2 = jax.random.split(key, 8)

    code_hidden = jax.random.normal(kc, (B, S_code, H), jnp.float32)
    text_hidden = jax.random.normal(kt, (B, S_text, H), jnp.float32)

    w0 = jax.random.normal(k0, (2 * H, H), jnp.float32) / jnp.sqrt(2.0 * H)
    b0 = jax.random.normal(kb0, (H,), jnp.float32) * 0.01
    w1 = jax.random.normal(k1, (H, H // 2), jnp.float32) / jnp.sqrt(1.0 * H)
    b1 = jax.random.normal(kb1, (H // 2,), jnp.float32) * 0.01
    w2 = jax.random.normal(k2, (H // 2, NUM_CLASS), jnp.float32) / jnp.sqrt(H / 2.0)
    b2 = jax.random.normal(kb2, (NUM_CLASS,), jnp.float32) * 0.01
    params = (w0, b0, w1, b1, w2, b2)

    logits = relation_classify_header2(code_hidden, text_hidden, params)
    logits = jax.block_until_ready(logits)

    ref = rch2_ref(code_hidden, text_hidden, params)
    assert logits.shape == (B, NUM_CLASS), logits.shape
    assert jnp.allclose(logits, ref, rtol=5e-3, atol=5e-3), (logits, ref)

    print("KERNEL_OK")
</pallas_src>

<mosaic_0001>
module attributes {stable_mosaic.version = 11 : i64} {
  func.func @kernel(%arg0: i32, %arg1: i32, %arg2: memref<2x8x768xf32, #tpu.memory_space<vmem>>, %arg3: memref<2x16x768xf32, #tpu.memory_space<vmem>>, %arg4: memref<768x768xf32, #tpu.memory_space<vmem>>, %arg5: memref<768x768xf32, #tpu.memory_space<vmem>>, %arg6: memref<1x768xf32, #tpu.memory_space<vmem>>, %arg7: memref<768x384xf32, #tpu.memory_space<vmem>>, %arg8: memref<1x384xf32, #tpu.memory_space<vmem>>, %arg9: memref<384x128xf32, #tpu.memory_space<vmem>>, %arg10: memref<1x128xf32, #tpu.memory_space<vmem>>, %arg11: memref<2x128xf32, #tpu.memory_space<vmem>>, %arg12: memref<2x768xf32, #tpu.memory_space<vmem>>, %arg13: memref<2x768xf32, #tpu.memory_space<vmem>>) attributes {dimension_semantics = [#tpu.dimension_semantics<parallel>, #tpu.dimension_semantics<arbitrary>], iteration_bounds = array<i64: 1, 1>, scalar_prefetch = 0 : i64, scratch_operands = 2 : i64, tpu.core_type = #tpu.core_type<tc>, window_params = [{transform_indices = @transform_0, window_bounds = array<i64: 2, 8, 768>}, {transform_indices = @transform_1, window_bounds = array<i64: 2, 16, 768>}, {pipeline_mode = #tpu.pipeline_mode<synchronous>, transform_indices = @transform_2, window_bounds = array<i64: 768, 768>}, {pipeline_mode = #tpu.pipeline_mode<synchronous>, transform_indices = @transform_3, window_bounds = array<i64: 768, 768>}, {pipeline_mode = #tpu.pipeline_mode<synchronous>, transform_indices = @transform_4, window_bounds = array<i64: 1, 768>}, {pipeline_mode = #tpu.pipeline_mode<synchronous>, transform_indices = @transform_5, window_bounds = array<i64: 768, 384>}, {pipeline_mode = #tpu.pipeline_mode<synchronous>, transform_indices = @transform_6, window_bounds = array<i64: 1, 384>}, {pipeline_mode = #tpu.pipeline_mode<synchronous>, transform_indices = @transform_7, window_bounds = array<i64: 384, 128>}, {pipeline_mode = #tpu.pipeline_mode<synchronous>, transform_indices = @transform_8, window_bounds = array<i64: 1, 128>}, {transform_indices = @transform_9, window_bounds = array<i64: 2, 128>}]} {
    %c0_i32 = arith.constant 0 : i32
    %0 = arith.cmpi eq, %arg1, %c0_i32 : i32
    %1 = arith.extui %0 : i1 to i32
    %c0_i32_0 = arith.constant 0 : i32
    %2 = arith.cmpi ne, %1, %c0_i32_0 : i32
    scf.if %2 {
      %cst_17 = arith.constant 0.000000e+00 : f32
      %16 = vector.broadcast %cst_17 : f32 to vector<2x768xf32>
      %c0_18 = arith.constant 0 : index
      %c0_19 = arith.constant 0 : index
      %17 = vector.load %arg12[%c0_18, %c0_19] : memref<2x768xf32, #tpu.memory_space<vmem>>, vector<2x768xf32>
      tpu.vector_store %arg12[%c0_18, %c0_19], %16 {strides = array<i32>} : memref<2x768xf32, #tpu.memory_space<vmem>>, vector<2x768xf32>,
      %cst_20 = arith.constant 0.000000e+00 : f32
      %18 = vector.broadcast %cst_20 : f32 to vector<2x768xf32>
      %c0_21 = arith.constant 0 : index
      %c0_22 = arith.constant 0 : index
      %19 = vector.load %arg13[%c0_21, %c0_22] : memref<2x768xf32, #tpu.memory_space<vmem>>, vector<2x768xf32>
      tpu.vector_store %arg13[%c0_21, %c0_22], %18 {strides = array<i32>} : memref<2x768xf32, #tpu.memory_space<vmem>>, vector<2x768xf32>,
    } else {
    }
    %c0 = arith.constant 0 : index
    %c0_1 = arith.constant 0 : index
    %c0_2 = arith.constant 0 : index
    %3 = vector.load %arg2[%c0, %c0_1, %c0_2] : memref<2x8x768xf32, #tpu.memory_space<vmem>>, vector<2x8x768xf32>
    %c0_3 = arith.constant 0 : index
    %c0_4 = arith.constant 0 : index
    %4 = vector.load %arg12[%c0_3, %c0_4] : memref<2x768xf32, #tpu.memory_space<vmem>>, vector<2x768xf32>
    %cst = arith.constant dense<0.000000e+00> : vector<2x768xf32>
    %5 = vector.multi_reduction <add>, %3, %cst [1] : vector<2x8x768xf32> to vector<2x768xf32>
    %6 = arith.addf %4, %5 : vector<2x768xf32>
    %c0_5 = arith.constant 0 : index
    %c0_6 = arith.constant 0 : index
    %7 = vector.load %arg12[%c0_5, %c0_6] : memref<2x768xf32, #tpu.memory_space<vmem>>, vector<2x768xf32>
    tpu.vector_store %arg12[%c0_5, %c0_6], %6 {strides = array<i32>} : memref<2x768xf32, #tpu.memory_space<vmem>>, vector<2x768xf32>,
    %c0_7 = arith.constant 0 : index
    %c0_8 = arith.constant 0 : index
    %c0_9 = arith.constant 0 : index
    %8 = vector.load %arg3[%c0_7, %c0_8, %c0_9] : memref<2x16x768xf32, #tpu.memory_space<vmem>>, vector<2x16x768xf32>
    %c0_10 = arith.constant 0 : index
    %c0_11 = arith.constant 0 : index
    %9 = vector.load %arg13[%c0_10, %c0_11] : memref<2x768xf32, #tpu.memory_space<vmem>>, vector<2x768xf32>
    %cst_12 = arith.constant dense<0.000000e+00> : vector<2x768xf32>
    %10 = vector.multi_reduction <add>, %8, %cst_12 [1] : vector<2x16x768xf32> to vector<2x768xf32>
    %11 = arith.addf %9, %10 : vector<2x768xf32>
    %c0_13 = arith.constant 0 : index
    %c0_14 = arith.constant 0 : index
    %12 = vector.load %arg13[%c0_13, %c0_14] : memref<2x768xf32, #tpu.memory_space<vmem>>, vector<2x768xf32>
    tpu.vector_store %arg13[%c0_13, %c0_14], %11 {strides = array<i32>} : memref<2x768xf32, #tpu.memory_space<vmem>>, vector<2x768xf32>,
    %c0_i32_15 = arith.constant 0 : i32
    %13 = arith.cmpi eq, %arg1, %c0_i32_15 : i32
    %14 = arith.extui %13 : i1 to i32
    %c0_i32_16 = arith.constant 0 : i32
    %15 = arith.cmpi ne, %14, %c0_i32_16 : i32
    scf.if %15 {
      %c0_17 = arith.constant 0 : index
      %c0_18 = arith.constant 0 : index
      %16 = vector.load %arg12[%c0_17, %c0_18] : memref<2x768xf32, #tpu.memory_space<vmem>>, vector<2x768xf32>
      %cst_19 = arith.constant 1.250000e-01 : f32
      %17 = vector.broadcast %cst_19 : f32 to vector<2x768xf32>
      %18 = arith.mulf %16, %17 : vector<2x768xf32>
      %c0_20 = arith.constant 0 : index
      %c0_21 = arith.constant 0 : index
      %19 = vector.load %arg13[%c0_20, %c0_21] : memref<2x768xf32, #tpu.memory_space<vmem>>, vector<2x768xf32>
      %cst_22 = arith.constant 6.250000e-02 : f32
      %20 = vector.broadcast %cst_22 : f32 to vector<2x768xf32>
      %21 = arith.mulf %19, %20 : vector<2x768xf32>
      %c0_23 = arith.constant 0 : index
      %c0_24 = arith.constant 0 : index
      %22 = vector.load %arg4[%c0_23, %c0_24] : memref<768x768xf32, #tpu.memory_space<vmem>>, vector<768x768xf32>
      %cst_25 = arith.constant dense<0.000000e+00> : vector<2x768xf32>
      %23 = tpu.matmul %21, %22, %cst_25 {dimension_numbers = #tpu.dot_dimension_numbers<[1], [0], [0], [1], [0, 0, 1, 1], [], []>} : vector<2x768xf32>, vector<768x768xf32>, vector<2x768xf32> -> vector<2x768xf32>
      %c0_26 = arith.constant 0 : index
      %c0_27 = arith.constant 0 : index
      %24 = vector.load %arg5[%c0_26, %c0_27] : memref<768x768xf32, #tpu.memory_space<vmem>>, vector<768x768xf32>
      %cst_28 = arith.constant dense<0.000000e+00> : vector<2x768xf32>
      %25 = tpu.matmul %18, %24, %cst_28 {dimension_numbers = #tpu.dot_dimension_numbers<[1], [0], [0], [1], [0, 0, 1, 1], [], []>} : vector<2x768xf32>, vector<768x768xf32>, vector<2x768xf32> -> vector<2x768xf32>
      %26 = arith.addf %23, %25 : vector<2x768xf32>
      %c0_29 = arith.constant 0 : index
      %c0_30 = arith.constant 0 : index
      %27 = vector.load %arg6[%c0_29, %c0_30] : memref<1x768xf32, #tpu.memory_space<vmem>>, vector<1x768xf32>
      %28 = vector.broadcast %27 : vector<1x768xf32> to vector<2x768xf32>
      %29 = arith.addf %26, %28 : vector<2x768xf32>
      %c0_31 = arith.constant 0 : index
      %c0_32 = arith.constant 0 : index
      %30 = vector.load %arg7[%c0_31, %c0_32] : memref<768x384xf32, #tpu.memory_space<vmem>>, vector<768x384xf32>
      %cst_33 = arith.constant dense<0.000000e+00> : vector<2x384xf32>
      %31 = tpu.matmul %29, %30, %cst_33 {dimension_numbers = #tpu.dot_dimension_numbers<[1], [0], [0], [1], [0, 0, 1, 1], [], []>} : vector<2x768xf32>, vector<768x384xf32>, vector<2x384xf32> -> vector<2x384xf32>
      %c0_34 = arith.constant 0 : index
      %c0_35 = arith.constant 0 : index
      %32 = vector.load %arg8[%c0_34, %c0_35] : memref<1x384xf32, #tpu.memory_space<vmem>>, vector<1x384xf32>
      %33 = vector.broadcast %32 : vector<1x384xf32> to vector<2x384xf32>
      %34 = arith.addf %31, %33 : vector<2x384xf32>
      %c0_36 = arith.constant 0 : index
      %c0_37 = arith.constant 0 : index
      %35 = vector.load %arg9[%c0_36, %c0_37] : memref<384x128xf32, #tpu.memory_space<vmem>>, vector<384x128xf32>
      %cst_38 = arith.constant dense<0.000000e+00> : vector<2x128xf32>
      %36 = tpu.matmul %34, %35, %cst_38 {dimension_numbers = #tpu.dot_dimension_numbers<[1], [0], [0], [1], [0, 0, 1, 1], [], []>} : vector<2x384xf32>, vector<384x128xf32>, vector<2x128xf32> -> vector<2x128xf32>
      %c0_39 = arith.constant 0 : index
      %c0_40 = arith.constant 0 : index
      %37 = vector.load %arg10[%c0_39, %c0_40] : memref<1x128xf32, #tpu.memory_space<vmem>>, vector<1x128xf32>
      %38 = vector.broadcast %37 : vector<1x128xf32> to vector<2x128xf32>
      %39 = arith.addf %36, %38 : vector<2x128xf32>
      %c0_41 = arith.constant 0 : index
      %c0_42 = arith.constant 0 : index
      %40 = vector.load %arg11[%c0_41, %c0_42] : memref<2x128xf32, #tpu.memory_space<vmem>>, vector<2x128xf32>
      tpu.vector_store %arg11[%c0_41, %c0_42], %39 {strides = array<i32>} : memref<2x128xf32, #tpu.memory_space<vmem>>, vector<2x128xf32>,
    } else {
    }
    return
  }
  func.func @transform_0(%arg0: i32, %arg1: i32) -> (i32, i32, i32) {
    %c0_i32 = arith.constant 0 : i32
    %c0_i32_0 = arith.constant 0 : i32
    return %arg0, %arg1, %c0_i32 : i32, i32, i32
  }
  func.func @transform_1(%arg0: i32, %arg1: i32) -> (i32, i32, i32) {
    %c0_i32 = arith.constant 0 : i32
    %c0_i32_0 = arith.constant 0 : i32
    return %arg0, %arg1, %c0_i32 : i32, i32, i32
  }
  func.func @transform_2(%arg0: i32, %arg1: i32) -> (i32, i32) {
    %c0_i32 = arith.constant 0 : i32
    %c0_i32_0 = arith.constant 0 : i32
    %c0_i32_1 = arith.constant 0 : i32
    return %c0_i32, %c0_i32_0 : i32, i32
  }
  func.func @transform_3(%arg0: i32, %arg1: i32) -> (i32, i32) {
    %c0_i32 = arith.constant 0 : i32
    %c0_i32_0 = arith.constant 0 : i32
    %c0_i32_1 = arith.constant 0 : i32
    return %c0_i32, %c0_i32_0 : i32, i32
  }
  func.func @transform_4(%arg0: i32, %arg1: i32) -> (i32, i32) {
    %c0_i32 = arith.constant 0 : i32
    %c0_i32_0 = arith.constant 0 : i32
    %c0_i32_1 = arith.constant 0 : i32
    return %c0_i32, %c0_i32_0 : i32, i32
  }
  func.func @transform_5(%arg0: i32, %arg1: i32) -> (i32, i32) {
    %c0_i32 = arith.constant 0 : i32
    %c0_i32_0 = arith.constant 0 : i32
    %c0_i32_1 = arith.constant 0 : i32
    return %c0_i32, %c0_i32_0 : i32, i32
  }
  func.func @transform_6(%arg0: i32, %arg1: i32) -> (i32, i32) {
    %c0_i32 = arith.constant 0 : i32
    %c0_i32_0 = arith.constant 0 : i32
    %c0_i32_1 = arith.constant 0 : i32
    return %c0_i32, %c0_i32_0 : i32, i32
  }
  func.func @transform_7(%arg0: i32, %arg1: i32) -> (i32, i32) {
    %c0_i32 = arith.constant 0 : i32
    %c0_i32_0 = arith.constant 0 : i32
    %c0_i32_1 = arith.constant 0 : i32
    return %c0_i32, %c0_i32_0 : i32, i32
  }
  func.func @transform_8(%arg0: i32, %arg1: i32) -> (i32, i32) {
    %c0_i32 = arith.constant 0 : i32
    %c0_i32_0 = arith.constant 0 : i32
    %c0_i32_1 = arith.constant 0 : i32
    return %c0_i32, %c0_i32_0 : i32, i32
  }
  func.func @transform_9(%arg0: i32, %arg1: i32) -> (i32, i32) {
    %c0_i32 = arith.constant 0 : i32
    %c0_i32_0 = arith.constant 0 : i32
    return %arg0, %c0_i32 : i32, i32
  }
}

</mosaic_0001>

<bundles_post_ra>
// kernel: tpu_custom_call.1
= control target key start
LH: loop header
LB: loop body
LE: loop exit
PB: predicated region body
PF: predicated region fallthrough
CT: control target
= control target key end

     0   :  { %14 = vsyncpa [#allocation5], 0  ;;  %s4768_s0 = inlined_call_operand.hbm [shape: f32[2,8,768], index: 0, kind: input, shape index: {}]   ;;  %s4769_s1 = inlined_call_operand.hbm [shape: f32[2,16,768], index: 1, kind: input, shape index: {}]   ;;  %s4770_s2 = inlined_call_operand.hbm [shape: f32[768,768], index: 2, kind: input, shape index: {}]   ;;  %s4771_s3 = inlined_call_operand.hbm [shape: f32[768,768], index: 3, kind: input, shape index: {}]   ;;  %s4772_s4 = inlined_call_operand.hbm [shape: f32[1,768], index: 4, kind: input, shape index: {}]   ;;  %s4773_s5 = inlined_call_operand.hbm [shape: f32[768,384], index: 5, kind: input, shape index: {}]   ;;  %s4774_s6 = inlined_call_operand.hbm [shape: f32[1,384], index: 6, kind: input, shape index: {}]   ;;  %s4775_s7 = inlined_call_operand.hbm [shape: f32[384,128], index: 7, kind: input, shape index: {}]   ;;  %s4776_s8 = inlined_call_operand.hbm [shape: f32[1,128], index: 8, kind: input, shape index: {}]   ;;  %s4777_s9 = inlined_call_operand.hbm [shape: f32[2,128], index: 9, kind: output, shape index: {}]  }
   0x1   :  { %15 = vsyncpa [#allocation8], 0 }
   0x2   :  { %16 = vsyncpa [#allocation11], 0 }
   0x3   :  { %17 = vsyncpa [#allocation14], 0 }
   0x4   :  { %18 = vsyncpa [#allocation17], 0 }
   0x5   :  { %19 = vsyncpa [#allocation6], 0  ;;  %s4436_s30 = smov [#allocation7]   ;;  %s4437_s11 = smov [#allocation10]  }
   0x6   :  { %s37_s10 = sshll.u32 %s4436_s30, 4  ;;  %s61_s12 = sshll.u32 %s4437_s11, 4  ;;  %s38_s10 = int_to_ptr.vmem [resolvable:$true] %s37_s10  ;;  %s62_s12 = int_to_ptr.vmem [resolvable:$true] %s61_s12 }
   0x7   :  { %s4232_s13 = scalar_lea.vmem %s38_s10, 3072  ;;  %p4237_p1 = scmp.lt.s32.totalorder %s38_s10, %s38_s10 }
   0x8   :  { %p4233_p0 = scmp.ne.s32.totalorder %s38_s10, %s4232_s13  ;;  %p4238_p2 = scmp.lt.s32.totalorder %s4232_s13, %s4232_s13 }
   0xa   :  { %p4239_p3 = por %p4238_p2, %p4237_p1 }
   0xc   :  { %p4240_p4 = pnand %p4239_p3, %p4233_p0 }
   0xe   :  { %4243 = shalt.err (!%p4240_p4)
}
   0xf   :  { %s4438_s14 = smov 768   ;;  %s4439_s15 = smov 48  }
  0x10   :  { %43 = dma.hbm_to_vmem [thread:$0]  %s4769_s1, 3072, %s38_s10, [#allocation8], %s4438_s14, %s4438_s14, %s4439_s15  }
  0x11   :  { %s4252_s18 = scalar_lea.vmem %s62_s12, 73728  ;;  %p4257_p6 = scmp.lt.s32.totalorder %s62_s12, %s62_s12 }
  0x12   :  { %p4253_p5 = scmp.ne.s32.totalorder %s62_s12, %s4252_s18  ;;  %p4258_p7 = scmp.lt.s32.totalorder %s4252_s18, %s4252_s18 }
  0x14   :  { %p4259_p8 = por %p4258_p7, %p4257_p6 }
  0x16   :  { %p4260_p9 = pnand %p4259_p8, %p4253_p5 }
  0x18   :  { %4263 = shalt.err (!%p4260_p9)
}
  0x19   :  { %67 = dma.hbm_to_vmem [thread:$0]  %s4771_s3, 73728, %s62_s12, [#allocation11], %s4438_s14, %s4438_s14, %s4439_s15  }
  0x1a   :  { %s4440_s21 = smov [#allocation13]  }
  0x1b   :  { %s83_s22 = sshll.u32 %s4440_s21, 4  ;;  %s84_s22 = int_to_ptr.vmem [resolvable:$true] %s83_s22 }
  0x1c   :  { %s4272_s23 = scalar_lea.vmem %s84_s22, 36864  ;;  %p4277_p11 = scmp.lt.s32.totalorder %s84_s22, %s84_s22 }
  0x1d   :  { %p4273_p10 = scmp.ne.s32.totalorder %s84_s22, %s4272_s23  ;;  %p4278_p12 = scmp.lt.s32.totalorder %s4272_s23, %s4272_s23 }
  0x1f   :  { %p4279_p13 = por %p4278_p12, %p4277_p11 }
  0x21   :  { %p4280_p0 = pnand %p4279_p13, %p4273_p10 }
  0x23   :  { %4283 = shalt.err (!%p4280_p0)
}
  0x24   :  { %s4441_s1 = smov 384   ;;  %s4442_s24 = smov 24  }
  0x25   :  { %89 = dma.hbm_to_vmem [thread:$0]  %s4773_s5, 36864, %s84_s22, [#allocation14], %s4441_s1, %s4441_s1, %s4442_s24  }
  0x26   :  { %s4443_s27 = smov [#allocation16]  }
  0x27   :  { %s105_s28 = sshll.u32 %s4443_s27, 4  ;;  %s106_s28 = int_to_ptr.vmem [resolvable:$true] %s105_s28 }
  0x28   :  { %s4292_s3 = scalar_lea.vmem %s106_s28, 6144  ;;  %p4297_p2 = scmp.lt.s32.totalorder %s106_s28, %s106_s28 }
  0x29   :  { %p4293_p1 = scmp.ne.s32.totalorder %s106_s28, %s4292_s3  ;;  %p4298_p3 = scmp.lt.s32.totalorder %s4292_s3, %s4292_s3 }
  0x2b   :  { %p4299_p4 = por %p4298_p3, %p4297_p2 }
  0x2d   :  { %p4300_p5 = pnand %p4299_p4, %p4293_p1 }
  0x2f   :  { %4303 = shalt.err (!%p4300_p5)
}
  0x30   :  { %s4444_s29 = smov 128   ;;  %s4445_s30 = smov 8  }
  0x31   :  { %111 = dma.hbm_to_vmem [thread:$0]  %s4775_s7, 6144, %s106_s28, [#allocation17], %s4444_s29, %s4444_s29, %s4445_s30  }
  0x32   :  { %s4446_s12 = smov [#allocation4]   ;;  %s4447_s16 = smov [#allocation9]  }
  0x33   :  { %s25_s13 = sshll.u32 %s4446_s12, 4  ;;  %s49_s5 = sshll.u32 %s4447_s16, 4  ;;  %s26_s13 = int_to_ptr.vmem [resolvable:$true] %s25_s13  ;;  %s50_s5 = int_to_ptr.vmem [resolvable:$true] %s49_s5 }
  0x34   :  { %s4312_s17 = scalar_lea.vmem %s26_s13, 1536  ;;  %p4317_p7 = scmp.lt.s32.totalorder %s26_s13, %s26_s13 }
  0x35   :  { %p4313_p6 = scmp.ne.s32.totalorder %s26_s13, %s4312_s17  ;;  %p4318_p8 = scmp.lt.s32.totalorder %s4312_s17, %s4312_s17 }
  0x37   :  { %p4319_p9 = por %p4318_p8, %p4317_p7 }
  0x39   :  { %p4320_p10 = pnand %p4319_p9, %p4313_p6 }
  0x3b   :  { %4323 = shalt.err (!%p4320_p10)
}
  0x3c   :  { %31 = dma.hbm_to_vmem [thread:$0]  %s4768_s0, 1536, %s26_s13, [#allocation5], %s4438_s14, %s4438_s14, %s4439_s15  }
  0x3d   :  { %s4332_s7 = scalar_lea.vmem %s50_s5, 73728  ;;  %p4337_p12 = scmp.lt.s32.totalorder %s50_s5, %s50_s5 }
  0x3e   :  { %p4333_p11 = scmp.ne.s32.totalorder %s50_s5, %s4332_s7  ;;  %p4338_p13 = scmp.lt.s32.totalorder %s4332_s7, %s4332_s7 }
  0x40   :  { %p4339_p0 = por %p4338_p13, %p4337_p12 }
  0x42   :  { %p4340_p1 = pnand %p4339_p0, %p4333_p11 }
  0x44   :  { %4343 = shalt.err (!%p4340_p1)
}
  0x45   :  { %55 = dma.hbm_to_vmem [thread:$0]  %s4770_s2, 73728, %s50_s5, [#allocation8], %s4438_s14, %s4438_s14, %s4439_s15  }
  0x46   :  { %s4448_s22 = smov [#allocation12]   ;;  %s4449_s1 = smov [#allocation15]  }
  0x47   :  { %s74_s23 = sshll.u32 %s4448_s22, 4  ;;  %s96_s24 = sshll.u32 %s4449_s1, 4  ;;  %s75_s23 = int_to_ptr.vmem [resolvable:$true] %s74_s23  ;;  %s97_s24 = int_to_ptr.vmem [resolvable:$true] %s96_s24 }
  0x48   :  { %s4352_s0 = scalar_lea.vmem %s75_s23, 96  ;;  %p4357_p3 = scmp.lt.s32.totalorder %s75_s23, %s75_s23 }
  0x49   :  { %p4353_p2 = scmp.ne.s32.totalorder %s75_s23, %s4352_s0  ;;  %p4358_p4 = scmp.lt.s32.totalorder %s4352_s0, %s4352_s0 }
  0x4b   :  { %p4359_p5 = por %p4358_p4, %p4357_p3 }
  0x4d   :  { %p4360_p6 = pnand %p4359_p5, %p4353_p2 }
  0x4f   :  { %4363 = shalt.err (!%p4360_p6)
}
  0x50   :  { %77 = dma.hbm_to_vmem [thread:$0]  %s4772_s4, 96, %s75_s23, [#allocation11]  }
  0x51   :  { %s4372_s27 = scalar_lea.vmem %s97_s24, 48  ;;  %s4376_s2 = scalar_lea.vmem %s97_s24, 64 }
  0x52   :  { %p4373_p7 = scmp.ne.s32.totalorder %s97_s24, %s4372_s27  ;;  %p4377_p8 = scmp.lt.s32.totalorder %s97_s24, %s97_s24 }
  0x53   :  { %p4378_p9 = scmp.lt.s32.totalorder %s4376_s2, %s4372_s27 }
  0x55   :  { %p4379_p10 = por %p4378_p9, %p4377_p8 }
  0x57   :  { %p4380_p11 = pnand %p4379_p10, %p4373_p7 }
  0x59   :  { %4383 = shalt.err (!%p4380_p11)
}
  0x5a   :  { %99 = dma.hbm_to_vmem [thread:$0]  %s4774_s6, 48, %s97_s24, [#allocation14]  }
  0x5b   :  { %s4450_s28 = smov [#allocation18]  }
  0x5c   :  { %s118_s3 = sshll.u32 %s4450_s28, 4  ;;  %s119_s3 = int_to_ptr.vmem [resolvable:$true] %s118_s3 }
  0x5d   :  { %s4392_s29 = scalar_lea.vmem %s119_s3, 16  ;;  %s4396_s30 = scalar_lea.vmem %s119_s3, 32 }
  0x5e   :  { %p4393_p12 = scmp.ne.s32.totalorder %s119_s3, %s4392_s29  ;;  %p4397_p13 = scmp.lt.s32.totalorder %s119_s3, %s119_s3 }
  0x5f   :  { %p4398_p0 = scmp.lt.s32.totalorder %s4396_s30, %s4392_s29 }
  0x61   :  { %p4399_p1 = por %p4398_p0, %p4397_p13 }
  0x63   :  { %p4400_p2 = pnand %p4399_p1, %p4393_p12 }
  0x65   :  { %4403 = shalt.err (!%p4400_p2)
}
  0x66   :  { %121 = dma.hbm_to_vmem [thread:$0]  %s4776_s8, 16, %s119_s3, [#allocation17]  }
  0x67   :  { %4424 = dma.done.wait [#allocation5], 1536  }
  0x68   :  { %4425 = vsyncadd [#allocation5], 4294965760 }
  0x69   :  { %4426 = dma.done.wait [#allocation8], 76800  }
  0x6a   :  { %4427 = vsyncadd [#allocation8], 4294890496 }
  0x6b   :  { %4428 = dma.done.wait [#allocation11], 73824  }
  0x6c   :  { %4429 = vsyncadd [#allocation11], 4294893472 }
  0x6d   :  { %4430 = dma.done.wait [#allocation14], 36912  }
  0x6e   :  { %4431 = vsyncadd [#allocation14], 4294930384 }
  0x6f   :  { %4432 = dma.done.wait [#allocation17], 6160  }
  0x70   :  { %4433 = vsyncadd [#allocation17], 4294961136  ;;  %v4451_v0 = vmov 0.0   ;;  %v1201_v1 = vld [vmem:[#allocation10 + $0x2d8] sm:$0xff]  ;;  %v1200_v3 = vld [vmem:[#allocation10 + $0x2d0] sm:$0xff]  ;;  %vm310_vm0 = vcmask 1041409  }
  0x71   :  { %154 = vst [vmem:[#allocation2 + $0x8] sm:$0xf] %v4451_v0  ;;  %156 = vst [vmem:[#allocation3 + $0x8] sm:$0xf] %v4451_v0  ;;  %v1393_v2 = vld [vmem:[#allocation10 + $0x8d8] sm:$0xff]  ;;  %1719 = vmatprep.subr.mxu0 %v1201_v1  ;;  %v1392_v4 = vld [vmem:[#allocation10 + $0x8d0] sm:$0xff] }
  0x72   :  { %1790 = vmatprep.subr.mxu1 %v1393_v2  ;;  %v1195_v5 = vld [vmem:[#allocation10 + $0x2a8] sm:$0xff]  ;;  %1720 = vmatpush1.msra.mxu0 %v1200_v3  ;;  %v1194_v7 = vld [vmem:[#allocation10 + $0x2a0] sm:$0xff]  ;;  %v1189_v9 = vld [vmem:[#allocation10 + $0x278] sm:$0xff]  ;;  %vm312_vm1 = vcmask 1043459   ;;  %vm314_vm2 = vcmask 1045509   ;;  %vm316_vm3 = vcmask 1047559  }
  0x73   :  { %v1387_v6 = vld [vmem:[#allocation10 + $0x8a8] sm:$0xff]  ;;  %1791 = vmatpush1.msra.mxu1 %v1392_v4  ;;  %v1386_v8 = vld [vmem:[#allocation10 + $0x8a0] sm:$0xff]  ;;  %1721 = vmatprep.subr.mxu0 %v1195_v5  ;;  %v1381_v10 = vld [vmem:[#allocation10 + $0x878] sm:$0xff]  ;;  %vm4453_vm4 = vmmov 0   ;;  %s4454_s6 = smov [#allocation19]  }
  0x74   :  { %1792 = vmatprep.subr.mxu1 %v1387_v6  ;;  %v1188_v11 = vld [vmem:[#allocation10 + $0x270] sm:$0xff]  ;;  %1722 = vmatpush1.msra.mxu0 %v1194_v7  ;;  %v1183_v13 = vld [vmem:[#allocation10 + $0x248] sm:$0xff]  ;;  %v1182_v15 = vld [vmem:[#allocation10 + $0x240] sm:$0xff]  ;;  %s3998_s8 = sshll.u32 %s4454_s6, 4  ;;  %s3999_s8 = int_to_ptr.vmem [resolvable:$true] %s3998_s8 }
  0x75   :  { %v1380_v12 = vld [vmem:[#allocation10 + $0x870] sm:$0xff]  ;;  %1793 = vmatpush1.msra.mxu1 %v1386_v8  ;;  %v1375_v14 = vld [vmem:[#allocation10 + $0x848] sm:$0xff]  ;;  %1723 = vmatprep.subr.mxu0 %v1189_v9  ;;  %v1374_v16 = vld [vmem:[#allocation10 + $0x840] sm:$0xff]  ;;  %s4404_s11 = scalar_lea.vmem %s3999_s8, 32  ;;  %p4409_p4 = scmp.lt.s32.totalorder %s3999_s8, %s3999_s8 }
  0x76   :  { %1794 = vmatprep.subr.mxu1 %v1381_v10  ;;  %1724 = vmatpush1.msra.mxu0 %v1188_v11  ;;  %v1177_v17 = vld [vmem:[#allocation10 + $0x218] sm:$0xff]  ;;  %v1176_v19 = vld [vmem:[#allocation10 + $0x210] sm:$0xff]  ;;  %v1171_v21 = vld [vmem:[#allocation10 + $0x1e8] sm:$0xff]  ;;  %p4405_p3 = scmp.ne.s32.totalorder %s3999_s8, %s4404_s11  ;;  %p4410_p5 = scmp.lt.s32.totalorder %s4404_s11, %s4404_s11 }
  0x77   :  { %1795 = vmatpush1.msra.mxu1 %v1380_v12  ;;  %v1369_v18 = vld [vmem:[#allocation10 + $0x818] sm:$0xff]  ;;  %1725 = vmatprep.subr.mxu0 %v1183_v13  ;;  %v1368_v20 = vld [vmem:[#allocation10 + $0x810] sm:$0xff]  ;;  %v1363_v22 = vld [vmem:[#allocation10 + $0x7e8] sm:$0xff] }
  0x78   :  { %1796 = vmatprep.subr.mxu1 %v1375_v14  ;;  %1726 = vmatpush1.msra.mxu0 %v1182_v15  ;;  %v1170_v23 = vld [vmem:[#allocation10 + $0x1e0] sm:$0xff]  ;;  %v1165_v25 = vld [vmem:[#allocation10 + $0x1b8] sm:$0xff]  ;;  %v1164_v27 = vld [vmem:[#allocation10 + $0x1b0] sm:$0xff]  ;;  %p4411_p6 = por %p4410_p5, %p4409_p4 }
  0x79   :  { %1797 = vmatpush1.msra.mxu1 %v1374_v16  ;;  %1727 = vmatprep.subr.mxu0 %v1177_v17  ;;  %v1362_v24 = vld [vmem:[#allocation10 + $0x7e0] sm:$0xff]  ;;  %v1357_v26 = vld [vmem:[#allocation10 + $0x7b8] sm:$0xff]  ;;  %v1356_v28 = vld [vmem:[#allocation10 + $0x7b0] sm:$0xff]  ;;  %v4452_v16 = vmov 1983009808  }
  0x7a   :  { %1798 = vmatprep.subr.mxu1 %v1369_v18  ;;  %1728 = vmatpush1.msra.mxu0 %v1176_v19  ;;  %v1159_v29 = vld [vmem:[#allocation10 + $0x188] sm:$0xff]  ;;  %v1158_v31 = vld [vmem:[#allocation10 + $0x180] sm:$0xff]  ;;  %v1153_v33 = vld [vmem:[#allocation10 + $0x158] sm:$0xff]  ;;  %v258_v17 = vunpack.c.l.s4 %v4452_v16  ;;  %v260_v18 = vlaneseq  ;;  %p4412_p7 = pnand %p4411_p6, %p4405_p3 }
  0x7b   :  { %1799 = vmatpush1.msra.mxu1 %v1368_v20  ;;  %1729 = vmatprep.subr.mxu0 %v1171_v21  ;;  %v1351_v30 = vld [vmem:[#allocation10 + $0x788] sm:$0xff]  ;;  %v1350_v32 = vld [vmem:[#allocation10 + $0x780] sm:$0xff]  ;;  %v1345_v34 = vld [vmem:[#allocation10 + $0x758] sm:$0xff] }
  0x7c   :  { %1800 = vmatprep.subr.mxu1 %v1363_v22  ;;  %1730 = vmatpush1.msra.mxu0 %v1170_v23  ;;  %v1152_v35 = vld [vmem:[#allocation10 + $0x150] sm:$0xff]  ;;  %v1147_v37 = vld [vmem:[#allocation10 + $0x128] sm:$0xff]  ;;  %v1146_v39 = vld [vmem:[#allocation10 + $0x120] sm:$0xff] }
  0x7d   :  { %1801 = vmatpush1.msra.mxu1 %v1362_v24  ;;  %1731 = vmatprep.subr.mxu0 %v1165_v25  ;;  %v1344_v36 = vld [vmem:[#allocation10 + $0x750] sm:$0xff]  ;;  %v1339_v38 = vld [vmem:[#allocation10 + $0x728] sm:$0xff]  ;;  %v1338_v40 = vld [vmem:[#allocation10 + $0x720] sm:$0xff] }
  0x7e   :  { %1802 = vmatprep.subr.mxu1 %v1357_v26  ;;  %1732 = vmatpush1.msra.mxu0 %v1164_v27  ;;  %v1141_v41 = vld [vmem:[#allocation10 + $0xf8] sm:$0xff]  ;;  %v1140_v43 = vld [vmem:[#allocation10 + $0xf0] sm:$0xff]  ;;  %v1135_v45 = vld [vmem:[#allocation10 + $0xc8] sm:$0xff] }
  0x7f   :  { %1803 = vmatpush1.msra.mxu1 %v1356_v28  ;;  %1733 = vmatprep.subr.mxu0 %v1159_v29  ;;  %v1333_v42 = vld [vmem:[#allocation10 + $0x6f8] sm:$0xff]  ;;  %v1332_v44 = vld [vmem:[#allocation10 + $0x6f0] sm:$0xff]  ;;  %v1327_v46 = vld [vmem:[#allocation10 + $0x6c8] sm:$0xff] }
  0x80   :  { %1804 = vmatprep.subr.mxu1 %v1351_v30  ;;  %1734 = vmatpush1.msra.mxu0 %v1158_v31  ;;  %v1134_v47 = vld [vmem:[#allocation10 + $0xc0] sm:$0xff]  ;;  %v1129_v49 = vld [vmem:[#allocation10 + $0x98] sm:$0xff]  ;;  %v1128_v51 = vld [vmem:[#allocation10 + $0x90] sm:$0xff]  ;;  %v259_v30 = vunpack.c.0.s8 %v258_v17  ;;  %v4546_v31 = vshrl.u32 %v260_v18, 7 }
  0x81   :  { %1805 = vmatpush1.msra.mxu1 %v1350_v32  ;;  %1735 = vmatprep.subr.mxu0 %v1153_v33  ;;  %v1326_v48 = vld [vmem:[#allocation10 + $0x6c0] sm:$0xff]  ;;  %v1321_v50 = vld [vmem:[#allocation10 + $0x698] sm:$0xff]  ;;  %v1320_v52 = vld [vmem:[#allocation10 + $0x690] sm:$0xff] }
  0x82   :  { %1806 = vmatprep.subr.mxu1 %v1345_v34  ;;  %1736 = vmatpush1.msra.mxu0 %v1152_v35  ;;  %v1123_v53 = vld [vmem:[#allocation10 + $0x68] sm:$0xff]  ;;  %v1122_v55 = vld [vmem:[#allocation10 + $0x60] sm:$0xff]  ;;  %v1117_v57 = vld [vmem:[#allocation10 + $0x38] sm:$0xff] }
  0x83   :  { %1807 = vmatpush1.msra.mxu1 %v1344_v36  ;;  %1737 = vmatprep.subr.mxu0 %v1147_v37  ;;  %v1315_v54 = vld [vmem:[#allocation10 + $0x668] sm:$0xff]  ;;  %v1314_v56 = vld [vmem:[#allocation10 + $0x660] sm:$0xff]  ;;  %v1309_v58 = vld [vmem:[#allocation10 + $0x638] sm:$0xff] }
  0x84   :  { %1808 = vmatprep.subr.mxu1 %v1339_v38  ;;  %1738 = vmatpush1.msra.mxu0 %v1146_v39  ;;  %v1116_v59 = vld [vmem:[#allocation10 + $0x30] sm:$0xff]  ;;  %v1111_v61 = vld [vmem:[#allocation10 + $0x8] sm:$0xff]  ;;  %v1110_v63 = vld [vmem:[#allocation10] sm:$0xff] }
  0x85   :  { %1809 = vmatpush1.msra.mxu1 %v1338_v40  ;;  %1739 = vmatprep.subr.mxu0 %v1141_v41  ;;  %v1308_v60 = vld [vmem:[#allocation10 + $0x630] sm:$0xff]  ;;  %v1303_v62 = vld [vmem:[#allocation10 + $0x608] sm:$0xff]  ;;  %v1302_v1 = vld [vmem:[#allocation10 + $0x600] sm:$0xff] }
  0x86   :  { %1810 = vmatprep.subr.mxu1 %v1333_v42  ;;  %1740 = vmatpush1.msra.mxu0 %v1140_v43  ;;  %v1297_v2 = vld [vmem:[#allocation10 + $0x5d8] sm:$0xff]  ;;  %v1296_v4 = vld [vmem:[#allocation10 + $0x5d0] sm:$0xff]  ;;  %v1291_v6 = vld [vmem:[#allocation10 + $0x5a8] sm:$0xff] }
  0x87   :  { %1811 = vmatpush1.msra.mxu1 %v1332_v44  ;;  %1741 = vmatprep.subr.mxu0 %v1135_v45  ;;  %v1489_v3 = vld [vmem:[#allocation10 + $0xbd8] sm:$0xff]  ;;  %v1488_v5 = vld [vmem:[#allocation10 + $0xbd0] sm:$0xff]  ;;  %v1483_v7 = vld [vmem:[#allocation10 + $0xba8] sm:$0xff] }
  0x88   :  { %1812 = vmatprep.subr.mxu1 %v1327_v46  ;;  %1742 = vmatpush1.msra.mxu0 %v1134_v47  ;;  %v1290_v8 = vld [vmem:[#allocation10 + $0x5a0] sm:$0xff]  ;;  %v1285_v10 = vld [vmem:[#allocation10 + $0x578] sm:$0xff]  ;;  %v1284_v12 = vld [vmem:[#allocation10 + $0x570] sm:$0xff] }
  0x89   :  { %1813 = vmatpush1.msra.mxu1 %v1326_v48  ;;  %1743 = vmatprep.subr.mxu0 %v1129_v49  ;;  %v1482_v9 = vld [vmem:[#allocation10 + $0xba0] sm:$0xff]  ;;  %v1477_v11 = vld [vmem:[#allocation10 + $0xb78] sm:$0xff]  ;;  %v1476_v13 = vld [vmem:[#allocation10 + $0xb70] sm:$0xff] }
  0x8a   :  { %1814 = vmatprep.subr.mxu1 %v1321_v50  ;;  %1744 = vmatpush1.msra.mxu0 %v1128_v51  ;;  %v1279_v14 = vld [vmem:[#allocation10 + $0x548] sm:$0xff]  ;;  %v1278_v19 = vld [vmem:[#allocation10 + $0x540] sm:$0xff]  ;;  %v1273_v21 = vld [vmem:[#allocation10 + $0x518] sm:$0xff]  ;;  %v4549_v50 = vsub.s32 %v259_v30, %v4546_v31 }
  0x8b   :  { %1815 = vmatpush1.msra.mxu1 %v1320_v52  ;;  %1745 = vmatprep.subr.mxu0 %v1123_v53  ;;  %v1471_v15 = vld [vmem:[#allocation10 + $0xb48] sm:$0xff]  ;;  %v1470_v20 = vld [vmem:[#allocation10 + $0xb40] sm:$0xff]  ;;  %v1465_v22 = vld [vmem:[#allocation10 + $0xb18] sm:$0xff] }
  0x8c   :  { %1816 = vmatprep.subr.mxu1 %v1315_v54  ;;  %1746 = vmatpush1.msra.mxu0 %v1122_v55  ;;  %v1272_v23 = vld [vmem:[#allocation10 + $0x510] sm:$0xff]  ;;  %v1267_v25 = vld [vmem:[#allocation10 + $0x4e8] sm:$0xff]  ;;  %v1266_v27 = vld [vmem:[#allocation10 + $0x4e0] sm:$0xff] }
  0x8d   :  { %1817 = vmatpush1.msra.mxu1 %v1314_v56  ;;  %1747 = vmatprep.subr.mxu0 %v1117_v57  ;;  %v1464_v24 = vld [vmem:[#allocation10 + $0xb10] sm:$0xff]  ;;  %v1459_v26 = vld [vmem:[#allocation10 + $0xae8] sm:$0xff]  ;;  %v1458_v28 = vld [vmem:[#allocation10 + $0xae0] sm:$0xff] }
  0x8e   :  { %1818 = vmatprep.subr.mxu1 %v1309_v58  ;;  %1748 = vmatpush1.msra.mxu0 %v1116_v59  ;;  %v1261_v29 = vld [vmem:[#allocation10 + $0x4b8] sm:$0xff]  ;;  %v1260_v33 = vld [vmem:[#allocation10 + $0x4b0] sm:$0xff]  ;;  %v1255_v35 = vld [vmem:[#allocation10 + $0x488] sm:$0xff] }
  0x8f   :  { %1819 = vmatpush1.msra.mxu1 %v1308_v60  ;;  %1749 = vmatprep.subr.mxu0 %v1111_v61  ;;  %v1453_v32 = vld [vmem:[#allocation10 + $0xab8] sm:$0xff]  ;;  %v1452_v34 = vld [vmem:[#allocation10 + $0xab0] sm:$0xff]  ;;  %v1447_v36 = vld [vmem:[#allocation10 + $0xa88] sm:$0xff] }
  0x90   :  { %1820 = vmatprep.subr.mxu1 %v1303_v62  ;;  %1750 = vmatpush1.msra.mxu0 %v1110_v63  ;;  %v157_v37 = vld [vmem:[#allocation4] sm:$0xff]  ;;  %v158_v38 = vld [vmem:[#allocation4 + $0x8] sm:$0xff]  ;;  %v159_v39 = vld [vmem:[#allocation4 + $0x10] sm:$0xff] }
  0x91   :  { %1821 = vmatpush1.msra.mxu1 %v1302_v1  ;;  %1751 = vmatprep.subr.mxu0 %v1297_v2  ;;  %v160_v40 = vld [vmem:[#allocation4 + $0x18] sm:$0xff]  ;;  %v163_v41 = vld [vmem:[#allocation4 + $0x30] sm:$0xff]  ;;  %v171_v42 = vrot.slane %v157_v37, 4  ;;  %v177_v43 = vrot.slane %v158_v38, 4  ;;  %v165_v45 = vld [vmem:[#allocation4 + $0x40] sm:$0xff]  ;;  %v183_v47 = vrot.slane %v159_v39, 4 }
  0x92   :  { %1822 = vmatprep.subr.mxu1 %v1489_v3  ;;  %1752 = vmatpush2.msra.mxu0 %v1296_v4  ;;  %v164_v44 = vld [vmem:[#allocation4 + $0x38] sm:$0xff]  ;;  %v166_v46 = vld [vmem:[#allocation4 + $0x48] sm:$0xff]  ;;  %v189_v48 = vrot.slane %v160_v40, 4  ;;  %v207_v49 = vrot.slane %v163_v41, 4  ;;  %v1254_v51 = vld [vmem:[#allocation10 + $0x480] sm:$0xff]  ;;  %v219_v56 = vrot.slane %v165_v45, 4 }
  0x93   :  { %1823 = vmatpush2.msra.mxu1 %v1488_v5  ;;  %1753 = vmatprep.subr.mxu0 %v1291_v6  ;;  %v1446_v52 = vld [vmem:[#allocation10 + $0xa80] sm:$0xff]  ;;  %v172_v53 = vadd.f32 %v171_v42, %v157_v37  ;;  %v178_v54 = vadd.f32 %v177_v43, %v158_v38  ;;  %v213_v55 = vrot.slane %v164_v44, 4  ;;  %v1249_v57 = vld [vmem:[#allocation10 + $0x458] sm:$0xff]  ;;  %v184_v59 = vadd.f32 %v183_v47, %v159_v39  ;;  %v1248_v63 = vld [vmem:[#allocation10 + $0x450] sm:$0xff] }
  0x94   :  { %1824 = vmatprep.subr.mxu1 %v1483_v7  ;;  %1754 = vmatpush2.msra.mxu0 %v1290_v8  ;;  %v1441_v58 = vld [vmem:[#allocation10 + $0xa58] sm:$0xff]  ;;  %v190_v60 = vadd.f32 %v189_v48, %v160_v40  ;;  %v208_v61 = vadd.f32 %v207_v49, %v163_v41  ;;  %v225_v62 = vrot.slane %v166_v46, 4  ;;  %v1440_v1 = vld [vmem:[#allocation10 + $0xa50] sm:$0xff]  ;;  %v220_v5 = vadd.f32 %v219_v56, %v165_v45  ;;  %v1243_v6 = vld [vmem:[#allocation10 + $0x428] sm:$0xff] }
  0x95   :  { %1825 = vmatpush2.msra.mxu1 %v1482_v9  ;;  %1755 = vmatprep.subr.mxu0 %v1285_v10  ;;  %v173_v2 = vrot.slane %v172_v53, 2  ;;  %v179_v3 = vrot.slane %v178_v54, 2  ;;  %v214_v4 = vadd.f32 %v213_v55, %v164_v44  ;;  %v1435_v7 = vld [vmem:[#allocation10 + $0xa28] sm:$0xff]  ;;  %v185_v8 = vrot.slane %v184_v59, 2  ;;  %v1237_v18 = vld [vmem:[#allocation10 + $0x3f8] sm:$0xff]  ;;  %v1230_v37 = vld [vmem:[#allocation10 + $0x3c0] sm:$0xff] }
  0x96   :  { %1826 = vmatprep.subr.mxu1 %v1477_v11  ;;  %1756 = vmatpush2.msra.mxu0 %v1284_v12  ;;  %v191_v9 = vrot.slane %v190_v60, 2  ;;  %v209_v10 = vrot.slane %v208_v61, 2  ;;  %v226_v11 = vadd.f32 %v225_v62, %v166_v46  ;;  %v1242_v12 = vld [vmem:[#allocation10 + $0x420] sm:$0xff]  ;;  %v221_v17 = vrot.slane %v220_v5, 2  ;;  %v1231_v30 = vld [vmem:[#allocation10 + $0x3c8] sm:$0xff]  ;;  %v1225_v43 = vld [vmem:[#allocation10 + $0x398] sm:$0xff] }
  0x97   :  { %1827 = vmatpush2.msra.mxu1 %v1476_v13  ;;  %1757 = vmatprep.subr.mxu0 %v1279_v14  ;;  %v1434_v13 = vld [vmem:[#allocation10 + $0xa20] sm:$0xff]  ;;  %v174_v14 = vadd.f32 %v173_v2, %v172_v53  ;;  %v215_v16 = vrot.slane %v214_v4, 2  ;;  %v1417_v44 = vld [vmem:[#allocation10 + $0x998] sm:$0xff]  ;;  %v1224_v49 = vld [vmem:[#allocation10 + $0x390] sm:$0xff] }
  0x98   :  { %1828 = vmatprep.subr.mxu1 %v1471_v15  ;;  %1758 = vmatpush2.msra.mxu0 %v1278_v19  ;;  %v180_v15 = vadd.f32 %v179_v3, %v178_v54  ;;  %v1429_v19 = vld [vmem:[#allocation10 + $0x9f8] sm:$0xff]  ;;  %v1422_v38 = vld [vmem:[#allocation10 + $0x9c0] sm:$0xff]  ;;  %v1219_v55 = vld [vmem:[#allocation10 + $0x368] sm:$0xff] }
  0x99   :  { %1829 = vmatpush2.msra.mxu1 %v1470_v20  ;;  %1759 = vmatprep.subr.mxu0 %v1273_v21  ;;  %v186_v20 = vadd.f32 %v185_v8, %v184_v59  ;;  %v192_v21 = vadd.f32 %v191_v9, %v190_v60  ;;  %v1411_v56 = vld [vmem:[#allocation10 + $0x968] sm:$0xff]  ;;  %v1218_v59 = vld [vmem:[#allocation10 + $0x360] sm:$0xff]  ;;  %v1213_v62 = vld [vmem:[#allocation10 + $0x338] sm:$0xff] }
  0x9a   :  { %1830 = vmatprep.subr.mxu1 %v1465_v22  ;;  %1760 = vmatpush2.msra.mxu0 %v1272_v23  ;;  %v210_v22 = vadd.f32 %v209_v10, %v208_v61  ;;  %v227_v23 = vrot.slane %v226_v11, 2  ;;  %v1410_v60 = vld [vmem:[#allocation10 + $0x960] sm:$0xff]  ;;  %v1399_v8 = vld [vmem:[#allocation10 + $0x908] sm:$0xff] }
  0x9b   :  { %1831 = vmatpush2.msra.mxu1 %v1464_v24  ;;  %1761 = vmatprep.subr.mxu0 %v1267_v25  ;;  %v1236_v24 = vld [vmem:[#allocation10 + $0x3f0] sm:$0xff]  ;;  %v1206_v10 = vld [vmem:[#allocation10 + $0x300] sm:$0xff] }
  0x9c   :  { %1832 = vmatprep.subr.mxu1 %v1459_v26  ;;  %1762 = vmatpush2.msra.mxu0 %v1266_v27  ;;  %v1428_v25 = vld [vmem:[#allocation10 + $0x9f0] sm:$0xff]  ;;  %v175_v26 = vrot.slane %v174_v14, 1  ;;  %v181_v27 = vrot.slane %v180_v15, 1 }
  0x9d   :  { %1833 = vmatpush2.msra.mxu1 %v1458_v28  ;;  %1763 = vmatprep.subr.mxu0 %v1261_v29  ;;  %v216_v28 = vadd.f32 %v215_v16, %v214_v4  ;;  %v222_v29 = vadd.f32 %v221_v17, %v220_v5  ;;  %v1212_v4 = vld [vmem:[#allocation10 + $0x330] sm:$0xff] }
  0x9e   :  { %1834 = vmatprep.subr.mxu1 %v1453_v32  ;;  %1764 = vmatpush2.msra.mxu0 %v1260_v33  ;;  %v1423_v32 = vld [vmem:[#allocation10 + $0x9c8] sm:$0xff]  ;;  %v187_v33 = vrot.slane %v186_v20, 1  ;;  %v176_v39 = vadd.f32 %v175_v26, %v174_v14  ;;  %v182_v40 = vadd.f32 %v181_v27, %v180_v15  ;;  %v1404_v5 = vld [vmem:[#allocation10 + $0x930] sm:$0xff]  ;;  %v1585_v14 = vld [vmem:[#allocation10 + $0xed8] sm:$0xff] }
  0x9f   :  { %1835 = vmatpush2.msra.mxu1 %v1452_v34  ;;  %1765 = vmatprep.subr.mxu0 %v1255_v35  ;;  %v193_v34 = vrot.slane %v192_v21, 1  ;;  %v211_v35 = vrot.slane %v210_v22, 1  ;;  %v217_v41 = vrot.slane %v216_v28, 1  ;;  %v223_v42 = vrot.slane %v222_v29, 1  ;;  %v1203_v15 = vld [vmem:[#allocation10 + $0x2e8] sm:$0xff]  ;;  %v1584_v26 = vld [vmem:[#allocation10 + $0xed0] sm:$0xff] }
  0xa0   :  { %1836 = vmatprep.subr.mxu1 %v1447_v36  ;;  %1766 = vmatpush2.msra.mxu0 %v1254_v51  ;;  %v228_v36 = vadd.f32 %v227_v23, %v226_v11  ;;  %v188_v45 = vadd.f32 %v187_v33, %v186_v20  ;;  %v1416_v51 = vld [vmem:[#allocation10 + $0x990] sm:$0xff]  ;;  %v255_v54 = vcombine.low %v176_v39, %v182_v40  ;;  %v1398_v11 = vld [vmem:[#allocation10 + $0x900] sm:$0xff]  ;;  %v1573_v33 = vld [vmem:[#allocation10 + $0xe78] sm:$0xff] }
  0xa1   :  { %1837 = vmatpush2.msra.mxu1 %v1446_v52  ;;  %1767 = vmatprep.subr.mxu0 %v1249_v57  ;;  %v194_v46 = vadd.f32 %v193_v34, %v192_v21  ;;  %v212_v47 = vadd.f32 %v211_v35, %v210_v22  ;;  %v218_v52 = vadd.f32 %v217_v41, %v216_v28  ;;  %v1579_v28 = vld [vmem:[#allocation10 + $0xea8] sm:$0xff]  ;;  %v1196_v34 = vld [vmem:[#allocation10 + $0x2b0] sm:$0xff]  ;;  %v1566_v39 = vld [vmem:[#allocation10 + $0xe40] sm:$0xff] }
  0xa2   :  { %1838 = vmatprep.subr.mxu1 %v1441_v58  ;;  %1768 = vmatpush2.msra.mxu0 %v1248_v63  ;;  %v229_v48 = vrot.slane %v228_v36, 1  ;;  %v224_v53 = vadd.f32 %v223_v42, %v222_v29  ;;  %v1405_v63 = vld [vmem:[#allocation10 + $0x938] sm:$0xff]  ;;  %v1202_v29 = vld [vmem:[#allocation10 + $0x2e0] sm:$0xff]  ;;  %v1572_v35 = vld [vmem:[#allocation10 + $0xe70] sm:$0xff] }
  0xa3   :  { %1839 = vmatpush2.msra.mxu1 %v1440_v1  ;;  %1769 = vmatprep.subr.mxu0 %v1243_v6  ;;  %v256_v58 = vcombine.low %v188_v45, %v194_v46  ;;  %v280_v61 = vcombine.low %v212_v47, %v218_v52  ;;  %v263_v1 = vrot.slane %v255_v54, %v4549_v50  ;;  %v1185_v40 = vld [vmem:[#allocation10 + $0x258] sm:$0xff]  ;;  %v1184_v42 = vld [vmem:[#allocation10 + $0x250] sm:$0xff]  ;;  %v1178_v45 = vld [vmem:[#allocation10 + $0x220] sm:$0xff] }
  0xa4   :  { %1840 = vmatprep.subr.mxu1 %v1435_v7  ;;  %1770 = vmatpush2.msra.mxu0 %v1242_v12  ;;  %v230_v57 = vadd.f32 %v229_v48, %v228_v36  ;;  %v1207_v7 = vld [vmem:[#allocation10 + $0x308] sm:$0xff]  ;;  %v1561_v41 = vld [vmem:[#allocation10 + $0xe18] sm:$0xff]  ;;  %v1554_v48 = vld [vmem:[#allocation10 + $0xde0] sm:$0xff] }
  0xa5   :  { %1841 = vmatpush2.msra.mxu1 %v1434_v13  ;;  %1771 = vmatprep.subr.mxu0 %v1237_v18  ;;  %v270_v2 = vrot.slane %v256_v58, %v4549_v50  ;;  %v288_v6 = vrot.slane %v280_v61, %v4549_v50  ;;  %v1191_v36 = vld [vmem:[#allocation10 + $0x288] sm:$0xff]  ;;  %v1173_v47 = vld [vmem:[#allocation10 + $0x1f8] sm:$0xff] }
  0xa6   :  { %1842 = vmatprep.subr.mxu1 %v1429_v19  ;;  %1772 = vmatpush2.msra.mxu0 %v1236_v24  ;;  %v281_v3 = vcombine.low %v224_v53, %v230_v57  ;;  %v1555_v46 = vld [vmem:[#allocation10 + $0xde8] sm:$0xff]  ;;  %v167_v53 = vld [vmem:[#allocation4 + $0x50] sm:$0xff]  ;;  %v168_v54 = vld [vmem:[#allocation4 + $0x58] sm:$0xff] }
  0xa7   :  { %1843 = vmatpush2.msra.mxu1 %v1428_v25  ;;  %1773 = vmatprep.subr.mxu0 %v1231_v30  ;;  %v271_v12 = vcombine.low %v263_v1, %v270_v2  ;;  %v1578_v30 = vld [vmem:[#allocation10 + $0xea0] sm:$0xff]  ;;  %v162_v52 = vld [vmem:[#allocation4 + $0x28] sm:$0xff]  ;;  %v1548_v57 = vld [vmem:[#allocation10 + $0xdb0] sm:$0xff] }
  0xa8   :  { %1844 = vmatprep.subr.mxu1 %v1423_v32  ;;  %1774 = vmatpush2.msra.mxu0 %v1230_v37  ;;  %v295_v9 = vrot.slane %v281_v3, %v4549_v50  ;;  %v1197_v32 = vld [vmem:[#allocation10 + $0x2b8] sm:$0xff]  ;;  %v1567_v37 = vld [vmem:[#allocation10 + $0xe48] sm:$0xff]  ;;  %v201_v58 = vrot.slane %v162_v52, 4  ;;  %v1166_v1 = vld [vmem:[#allocation10 + $0x1c0] sm:$0xff] }
  0xa9   :  { %1845 = vmatpush2.msra.mxu1 %v1422_v38  ;;  %1775 = vmatprep.subr.mxu0 %v1225_v43  ;;  %v1190_v38 = vld [vmem:[#allocation10 + $0x280] sm:$0xff]  ;;  %v1179_v43 = vld [vmem:[#allocation10 + $0x228] sm:$0xff] }
  0xaa   :  { %1846 = vmatprep.subr.mxu1 %v1417_v44  ;;  %1776 = vmatpush2.msra.mxu0 %v1224_v49  ;;  %v296_v13 = vcombine.low %v288_v6, %v295_v9  ;;  %v1560_v44 = vld [vmem:[#allocation10 + $0xe10] sm:$0xff]  ;;  %v1549_v49 = vld [vmem:[#allocation10 + $0xdb8] sm:$0xff]  ;;  %v1167_v61 = vld [vmem:[#allocation10 + $0x1c8] sm:$0xff]  ;;  %v202_v3 = vadd.f32 %v201_v58, %v162_v52 }
  0xab   :  { %1847 = vmatpush2.msra.mxu1 %v1416_v51  ;;  %1777 = vmatprep.subr.mxu0 %v1219_v55  ;;  %v161_v51 = vld [vmem:[#allocation4 + $0x20] sm:$0xff]  ;;  %v1161_v6 = vld [vmem:[#allocation10 + $0x198] sm:$0xff]  ;;  %v1160_v9 = vld [vmem:[#allocation10 + $0x190] sm:$0xff] }
  0xac   :  { %1848 = vmatprep.subr.mxu1 %v1411_v56  ;;  %1778 = vmatpush2.msra.mxu0 %v1218_v59  ;;  %v309_v16 = vrot.slane %v296_v13, 7  ;;  %v195_v55 = vrot.slane %v161_v51, 4  ;;  %v1172_v56 = vld [vmem:[#allocation10 + $0x1f0] sm:$0xff]  ;;  %v231_v59 = vrot.slane %v167_v53, 4  ;;  %v1542_v2 = vld [vmem:[#allocation10 + $0xd80] sm:$0xff] }
  0xad   :  { %1849 = vmatpush2.msra.mxu1 %v1410_v60  ;;  %1779 = vmatprep.subr.mxu0 %v1213_v62  ;;  %v237_v60 = vrot.slane %v168_v54, 4  ;;  %v1543_v62 = vld [vmem:[#allocation10 + $0xd88] sm:$0xff]  ;;  %v1130_v52 = vld [vmem:[#allocation10 + $0xa0] sm:$0xff]  ;;  %v1124_v58 = vld [vmem:[#allocation10 + $0x70] sm:$0xff] }
  0xae   :  { %1850 = vmatprep.subr.mxu1 %v1405_v63  ;;  %1780 = vmatpush2.msra.mxu0 %v1212_v4  ;;  %v311_v17 = vsel %vm310_vm0, %v309_v16, %v271_v12  ;;  %v196_v63 = vadd.f32 %v195_v55, %v161_v51  ;;  %v232_v4 = vadd.f32 %v231_v59, %v167_v53  ;;  %v1507_v51 = vld [vmem:[#allocation10 + $0xc68] sm:$0xff]  ;;  %v1506_v53 = vld [vmem:[#allocation10 + $0xc60] sm:$0xff]  ;;  %v1500_v59 = vld [vmem:[#allocation10 + $0xc30] sm:$0xff] }
  0xaf   :  { %1851 = vmatpush2.msra.mxu1 %v1404_v5  ;;  %1781 = vmatprep.subr.mxu0 %v1207_v7  ;;  %v313_v18 = vsel %vm312_vm1, %v309_v16, %v311_v17  ;;  %v238_v5 = vadd.f32 %v237_v60, %v168_v54  ;;  %v1537_v7 = vld [vmem:[#allocation10 + $0xd58] sm:$0xff]  ;;  %v1154_v17 = vld [vmem:[#allocation10 + $0x160] sm:$0xff] }
  0xb0   :  { %1852 = vmatprep.subr.mxu1 %v1399_v8  ;;  %1782 = vmatpush2.msra.mxu0 %v1206_v10  ;;  %v315_v19 = vsel %vm314_vm2, %v309_v16, %v313_v18  ;;  %v197_v8 = vrot.slane %v196_v63, 2  ;;  %v1536_v10 = vld [vmem:[#allocation10 + $0xd50] sm:$0xff]  ;;  %v233_v12 = vrot.slane %v232_v4, 2  ;;  %v1530_v18 = vld [vmem:[#allocation10 + $0xd20] sm:$0xff] }
  0xb1   :  { %1853 = vmatpush2.msra.mxu1 %v1398_v11  ;;  %1861 = vmatprep.subr.mxu0 %v1585_v14  ;;  %v317_v20 = vsel %vm316_vm3, %v309_v16, %v315_v19  ;;  %v203_v11 = vrot.slane %v202_v3, 2  ;;  %v239_v13 = vrot.slane %v238_v5, 2  ;;  %v1155_v14 = vld [vmem:[#allocation10 + $0x168] sm:$0xff] }
  0xb2   :  { %1932 = vmatprep.subr.mxu1 %v1203_v15  ;;  %v528_v21 = vmul.f32 0.125, %v317_v20  ;;  %v1531_v15 = vld [vmem:[#allocation10 + $0xd28] sm:$0xff]  ;;  %v198_v16 = vadd.f32 %v197_v8, %v196_v63  ;;  %v234_v20 = vadd.f32 %v233_v12, %v232_v4  ;;  %v1118_v63 = vld [vmem:[#allocation10 + $0x40] sm:$0xff]  ;;  %v1681_v4 = vld [vmem:[#allocation10 + $0x11d8] sm:$0xff] }
  0xb3   :  { %v204_v19 = vadd.f32 %v203_v11, %v202_v3  ;;  %v1113_v3 = vld [vmem:[#allocation10 + $0x18] sm:$0xff]  ;;  %v1680_v8 = vld [vmem:[#allocation10 + $0x11d0] sm:$0xff]  ;;  %v1675_v11 = vld [vmem:[#allocation10 + $0x11a8] sm:$0xff] }
  0xb4   :  { %v4560_v22 = vrot.slane %v528_v21, %v4549_v50  ;;  %v1688_v23 = vcombine.high %v528_v21, %v528_v21  ;;  %v240_v21 = vadd.f32 %v239_v13, %v238_v5  ;;  %v170_v5 = vld [vmem:[#allocation2 + $0x8] sm:$0xf]  ;;  %v1298_v13 = vld [vmem:[#allocation10 + $0x5e0] sm:$0xff] }
  0xb6   :  { %v4564_v24 = vcombine.high %v4560_v22, %v4560_v22  ;;  %v4567_v25 = vrot.slane %v1688_v23, %v4549_v50  ;;  %v1149_v23 = vld [vmem:[#allocation10 + $0x138] sm:$0xff] }
  0xb8   :  { %1783 = vmatprep.mubr.f32.mxu0 %v4564_v24  ;;  %v4572_v27 = vcombine.high %v4567_v25, %v4567_v25 }
  0xb9   :  { %1784 = vmatmul.mubr.f32.vlgmr.msra.gmra.mxu0 %v4560_v22 }
  0xba   :  { %1854 = vmatprep.mubr.f32.mxu1 %v4572_v27  ;;  %1862 = vmatpush1.msra.mxu0 %v1584_v26  ;;  %v1525_v26 = vld [vmem:[#allocation10 + $0xcf8] sm:$0xff] }
  0xbb   :  { %1855 = vmatmul.mubr.f32.vlgmr.msra.gmra.mxu1 %v4567_v25  ;;  %1863 = vmatprep.subr.mxu0 %v1579_v28  ;;  %v199_v28 = vrot.slane %v198_v16, 1 }
  0xbc   :  { %1933 = vmatpush1.msra.mxu1 %v1202_v29  ;;  %1864 = vmatpush1.msra.mxu0 %v1578_v30  ;;  %v1148_v29 = vld [vmem:[#allocation10 + $0x130] sm:$0xff] }
  0xbd   :  { %1934 = vmatprep.subr.mxu1 %v1197_v32  ;;  %1865 = vmatprep.subr.mxu0 %v1573_v33  ;;  %v1524_v30 = vld [vmem:[#allocation10 + $0xcf0] sm:$0xff]  ;;  %v205_v32 = vrot.slane %v204_v19, 1  ;;  %v235_v33 = vrot.slane %v234_v20, 1 }
  0xbe   :  { %1935 = vmatpush1.msra.mxu1 %v1196_v34  ;;  %1866 = vmatpush1.msra.mxu0 %v1572_v35  ;;  %v241_v34 = vrot.slane %v240_v21, 1  ;;  %v1143_v35 = vld [vmem:[#allocation10 + $0x108] sm:$0xff] }
  0xbf   :  { %1936 = vmatprep.subr.mxu1 %v1191_v36  ;;  %1867 = vmatprep.subr.mxu0 %v1567_v37  ;;  %v1519_v36 = vld [vmem:[#allocation10 + $0xcc8] sm:$0xff]  ;;  %v200_v37 = vadd.f32 %v199_v28, %v198_v16  ;;  %v1293_v16 = vld [vmem:[#allocation10 + $0x5b8] sm:$0xff] }
  0xc0   :  { %1937 = vmatpush1.msra.mxu1 %v1190_v38  ;;  %1868 = vmatpush1.msra.mxu0 %v1566_v39  ;;  %v1142_v38 = vld [vmem:[#allocation10 + $0x100] sm:$0xff]  ;;  %v1281_v28 = vld [vmem:[#allocation10 + $0x558] sm:$0xff] }
  0xc1   :  { %1938 = vmatprep.subr.mxu1 %v1185_v40  ;;  %1869 = vmatprep.subr.mxu0 %v1561_v41  ;;  %v1518_v39 = vld [vmem:[#allocation10 + $0xcc0] sm:$0xff]  ;;  %v206_v40 = vadd.f32 %v205_v32, %v204_v19  ;;  %v236_v41 = vadd.f32 %v235_v33, %v234_v20  ;;  %v1668_v19 = vld [vmem:[#allocation10 + $0x1170] sm:$0xff]  ;;  %v1287_v20 = vld [vmem:[#allocation10 + $0x588] sm:$0xff] }
  0xc2   :  { %1939 = vmatpush1.msra.mxu1 %v1184_v42  ;;  %1870 = vmatpush1.msra.mxu0 %v1560_v44  ;;  %v242_v42 = vadd.f32 %v241_v34, %v240_v21  ;;  %v1513_v44 = vld [vmem:[#allocation10 + $0xc98] sm:$0xff]  ;;  %v1663_v21 = vld [vmem:[#allocation10 + $0x1148] sm:$0xff]  ;;  %v1656_v32 = vld [vmem:[#allocation10 + $0x1110] sm:$0xff] }
  0xc3   :  { %1940 = vmatprep.subr.mxu1 %v1179_v43  ;;  %1871 = vmatprep.subr.mxu0 %v1555_v46  ;;  %v1137_v43 = vld [vmem:[#allocation10 + $0xd8] sm:$0xff]  ;;  %v1512_v46 = vld [vmem:[#allocation10 + $0xc90] sm:$0xff]  ;;  %v1275_v33 = vld [vmem:[#allocation10 + $0x528] sm:$0xff] }
  0xc4   :  { %1941 = vmatpush1.msra.mxu1 %v1178_v45  ;;  %1872 = vmatpush1.msra.mxu0 %v1554_v48  ;;  %v1136_v45 = vld [vmem:[#allocation10 + $0xd0] sm:$0xff]  ;;  %v297_v48 = vcombine.low %v236_v41, %v242_v42  ;;  %v1651_v34 = vld [vmem:[#allocation10 + $0x10e8] sm:$0xff] }
  0xc5   :  { %1942 = vmatprep.subr.mxu1 %v1173_v47  ;;  %1873 = vmatprep.subr.mxu0 %v1549_v49  ;;  %v272_v47 = vcombine.low %v200_v37, %v206_v40  ;;  %v1131_v49 = vld [vmem:[#allocation10 + $0xa8] sm:$0xff]  ;;  %v1269_v37 = vld [vmem:[#allocation10 + $0x4f8] sm:$0xff]  ;;  %v1644_v40 = vld [vmem:[#allocation10 + $0x10b0] sm:$0xff] }
  0xc6   :  { %1943 = vmatpush1.msra.mxu1 %v1172_v56  ;;  %1874 = vmatpush1.msra.mxu0 %v1548_v57  ;;  %v304_v55 = vrot.slane %v297_v48, %v4549_v50  ;;  %v1125_v56 = vld [vmem:[#allocation10 + $0x78] sm:$0xff]  ;;  %v1263_v41 = vld [vmem:[#allocation10 + $0x4c8] sm:$0xff]  ;;  %v1632_v48 = vld [vmem:[#allocation10 + $0x1050] sm:$0xff] }
  0xc7   :  { %1944 = vmatprep.subr.mxu1 %v1167_v61  ;;  %1875 = vmatprep.subr.mxu0 %v1543_v62  ;;  %v279_v54 = vrot.slane %v272_v47, %v4549_v50  ;;  %v1501_v57 = vld [vmem:[#allocation10 + $0xc38] sm:$0xff]  ;;  %v1119_v61 = vld [vmem:[#allocation10 + $0x48] sm:$0xff]  ;;  %v1256_v47 = vld [vmem:[#allocation10 + $0x490] sm:$0xff] }
  0xc8   :  { %1945 = vmatpush1.msra.mxu1 %v1166_v1  ;;  %1876 = vmatpush1.msra.mxu0 %v1542_v2  ;;  %v320_v60 = vrot.slane %v304_v55, 7  ;;  %v1495_v62 = vld [vmem:[#allocation10 + $0xc08] sm:$0xff]  ;;  %v1494_v1 = vld [vmem:[#allocation10 + $0xc00] sm:$0xff]  ;;  %v1621_v55 = vld [vmem:[#allocation10 + $0xff8] sm:$0xff] }
  0xc9   :  { %1946 = vmatprep.subr.mxu1 %v1161_v6  ;;  %1877 = vmatprep.subr.mxu0 %v1537_v7  ;;  %v1112_v7 = vld [vmem:[#allocation10 + $0x10] sm:$0xff]  ;;  %v1639_v42 = vld [vmem:[#allocation10 + $0x1088] sm:$0xff] }
  0xca   :  { %1947 = vmatpush1.msra.mxu1 %v1160_v9  ;;  %1878 = vmatpush1.msra.mxu0 %v1536_v10  ;;  %v321_v2 = vsel %vm310_vm0, %v320_v60, %v279_v54  ;;  %v1299_v10 = vld [vmem:[#allocation10 + $0x5e8] sm:$0xff]  ;;  %v1245_v54 = vld [vmem:[#allocation10 + $0x438] sm:$0xff] }
  0xcb   :  { %1948 = vmatprep.subr.mxu1 %v1155_v14  ;;  %1879 = vmatprep.subr.mxu0 %v1531_v15  ;;  %v322_v6 = vsel %vm312_vm1, %v320_v60, %v321_v2  ;;  %v1674_v14 = vld [vmem:[#allocation10 + $0x11a0] sm:$0xff]  ;;  %v1609_v2 = vld [vmem:[#allocation10 + $0xf98] sm:$0xff] }
  0xcc   :  { %1949 = vmatpush1.msra.mxu1 %v1154_v17  ;;  %1880 = vmatpush1.msra.mxu0 %v1530_v18  ;;  %v323_v9 = vsel %vm314_vm2, %v320_v60, %v322_v6  ;;  %v1669_v17 = vld [vmem:[#allocation10 + $0x1178] sm:$0xff]  ;;  %v1292_v18 = vld [vmem:[#allocation10 + $0x5b0] sm:$0xff]  ;;  %v1603_v6 = vld [vmem:[#allocation10 + $0xf68] sm:$0xff] }
  0xcd   :  { %1950 = vmatprep.subr.mxu1 %v1149_v23  ;;  %1881 = vmatprep.subr.mxu0 %v1525_v26  ;;  %v324_v12 = vsel %vm316_vm3, %v320_v60, %v323_v9  ;;  %v1286_v23 = vld [vmem:[#allocation10 + $0x580] sm:$0xff]  ;;  %v1615_v60 = vld [vmem:[#allocation10 + $0xfc8] sm:$0xff] }
  0xce   :  { %1951 = vmatpush1.msra.mxu1 %v1148_v29  ;;  %1882 = vmatpush1.msra.mxu0 %v1524_v30  ;;  %v328_v15 = vadd.f32 %v324_v12, %v170_v5  ;;  %v1662_v26 = vld [vmem:[#allocation10 + $0x1140] sm:$0xff]  ;;  %v1657_v29 = vld [vmem:[#allocation10 + $0x1118] sm:$0xff]  ;;  %v1280_v30 = vld [vmem:[#allocation10 + $0x550] sm:$0xff] }
  0xcf   :  { %1952 = vmatprep.subr.mxu1 %v1143_v35  ;;  %1883 = vmatprep.subr.mxu0 %v1519_v36  ;;  %v1274_v35 = vld [vmem:[#allocation10 + $0x520] sm:$0xff]  ;;  %v1227_v5 = vld [vmem:[#allocation10 + $0x3a8] sm:$0xff]  ;;  %v1220_v12 = vld [vmem:[#allocation10 + $0x370] sm:$0xff] }
  0xd0   :  { %1953 = vmatpush1.msra.mxu1 %v1142_v38  ;;  %1884 = vmatpush1.msra.mxu0 %v1518_v39  ;;  %330 = vst [vmem:[#allocation2 + $0x8] sm:$0xf] %v328_v15  ;;  %v1650_v36 = vld [vmem:[#allocation10 + $0x10e0] sm:$0xff]  ;;  %v1645_v38 = vld [vmem:[#allocation10 + $0x10b8] sm:$0xff]  ;;  %v1268_v39 = vld [vmem:[#allocation10 + $0x4f0] sm:$0xff] }
  0xd1   :  { %1954 = vmatprep.subr.mxu1 %v1137_v43  ;;  %1885 = vmatprep.subr.mxu0 %v1513_v44  ;;  %v1262_v43 = vld [vmem:[#allocation10 + $0x4c0] sm:$0xff]  ;;  %v1591_v15 = vld [vmem:[#allocation10 + $0xf08] sm:$0xff] }
  0xd2   :  { %1955 = vmatpush1.msra.mxu1 %v1136_v45  ;;  %1886 = vmatpush1.msra.mxu0 %v1512_v46  ;;  %v1638_v44 = vld [vmem:[#allocation10 + $0x1080] sm:$0xff]  ;;  %v1257_v45 = vld [vmem:[#allocation10 + $0x498] sm:$0xff] }
  0xd3   :  { %1956 = vmatprep.subr.mxu1 %v1131_v49  ;;  %1887 = vmatprep.subr.mxu0 %v1507_v51  ;;  %v1633_v46 = vld [vmem:[#allocation10 + $0x1058] sm:$0xff]  ;;  %v1251_v49 = vld [vmem:[#allocation10 + $0x468] sm:$0xff] }
  0xd4   :  { %1957 = vmatpush1.msra.mxu1 %v1130_v52  ;;  %1888 = vmatpush1.msra.mxu0 %v1506_v53  ;;  %v1627_v51 = vld [vmem:[#allocation10 + $0x1028] sm:$0xff]  ;;  %v1250_v52 = vld [vmem:[#allocation10 + $0x460] sm:$0xff] }
  0xd5   :  { %1958 = vmatprep.subr.mxu1 %v1125_v56  ;;  %1889 = vmatprep.subr.mxu0 %v1501_v57  ;;  %v1626_v53 = vld [vmem:[#allocation10 + $0x1020] sm:$0xff]  ;;  %v1244_v57 = vld [vmem:[#allocation10 + $0x430] sm:$0xff] }
  0xd6   :  { %1959 = vmatpush1.msra.mxu1 %v1124_v58  ;;  %1890 = vmatpush1.msra.mxu0 %v1500_v59  ;;  %v1620_v58 = vld [vmem:[#allocation10 + $0xff0] sm:$0xff]  ;;  %v1239_v59 = vld [vmem:[#allocation10 + $0x408] sm:$0xff] }
  0xd7   :  { %1960 = vmatprep.subr.mxu1 %v1119_v61  ;;  %1891 = vmatprep.subr.mxu0 %v1495_v62  ;;  %v527_v56 = vld [vmem:[#allocation2 + $0x8] sm:$0xf]  ;;  %v1238_v61 = vld [vmem:[#allocation10 + $0x400] sm:$0xff] }
  0xd8   :  { %1961 = vmatpush1.msra.mxu1 %v1118_v63  ;;  %1892 = vmatpush1.msra.mxu0 %v1494_v1  ;;  %v1614_v62 = vld [vmem:[#allocation10 + $0xfc0] sm:$0xff]  ;;  %v529_v63 = vmul.f32 0.125, %v527_v56  ;;  %v1233_v1 = vld [vmem:[#allocation10 + $0x3d8] sm:$0xff] }
  0xd9   :  { %1962 = vmatprep.subr.mxu1 %v1113_v3  ;;  %1893 = vmatprep.subr.mxu0 %v1681_v4  ;;  %v1232_v3 = vld [vmem:[#allocation10 + $0x3d0] sm:$0xff]  ;;  %v1545_v56 = vld [vmem:[#allocation10 + $0xd98] sm:$0xff] }
  0xda   :  { %1963 = vmatpush1.msra.mxu1 %v1112_v7  ;;  %1894 = vmatpush2.msra.mxu0 %v1680_v8  ;;  %v1608_v4 = vld [vmem:[#allocation10 + $0xf90] sm:$0xff]  ;;  %v1226_v7 = vld [vmem:[#allocation10 + $0x3a0] sm:$0xff]  ;;  %v4584_v9 = vrot.slane %v529_v63, %v4549_v50  ;;  %v1341_v63 = vld [vmem:[#allocation10 + $0x738] sm:$0xff] }
  0xdb   :  { %1964 = vmatprep.subr.mxu1 %v1299_v10  ;;  %1895 = vmatprep.subr.mxu0 %v1675_v11  ;;  %v1602_v8 = vld [vmem:[#allocation10 + $0xf60] sm:$0xff]  ;;  %v1221_v10 = vld [vmem:[#allocation10 + $0x378] sm:$0xff] }
  0xdc   :  { %1965 = vmatpush2.msra.mxu1 %v1298_v13  ;;  %1896 = vmatpush2.msra.mxu0 %v1674_v14  ;;  %v1597_v11 = vld [vmem:[#allocation10 + $0xf38] sm:$0xff]  ;;  %v1596_v13 = vld [vmem:[#allocation10 + $0xf30] sm:$0xff]  ;;  %v1215_v14 = vld [vmem:[#allocation10 + $0x348] sm:$0xff] }
  0xdd   :  { %1966 = vmatprep.subr.mxu1 %v1293_v16  ;;  %1897 = vmatprep.subr.mxu0 %v1669_v17  ;;  %v1214_v16 = vld [vmem:[#allocation10 + $0x340] sm:$0xff] }
  0xde   :  { %1967 = vmatpush2.msra.mxu1 %v1292_v18  ;;  %1898 = vmatpush2.msra.mxu0 %v1668_v19  ;;  %v1590_v17 = vld [vmem:[#allocation10 + $0xf00] sm:$0xff]  ;;  %v4588_v18 = vcombine.high %v4584_v9, %v4584_v9  ;;  %v1209_v19 = vld [vmem:[#allocation10 + $0x318] sm:$0xff] }
  0xdf   :  { %1968 = vmatprep.subr.mxu1 %v1287_v20  ;;  %1899 = vmatprep.subr.mxu0 %v1663_v21  ;;  %v1208_v20 = vld [vmem:[#allocation10 + $0x310] sm:$0xff]  ;;  %v1395_v21 = vld [vmem:[#allocation10 + $0x8e8] sm:$0xff] }
  0xe0   :  { %1969 = vmatpush2.msra.mxu1 %v1286_v23  ;;  %1900 = vmatpush2.msra.mxu0 %v1662_v26  ;;  %v1587_v23 = vld [vmem:[#allocation10 + $0xee8] sm:$0xff]  ;;  %v1394_v26 = vld [vmem:[#allocation10 + $0x8e0] sm:$0xff] }
  0xe1   :  { %1970 = vmatprep.subr.mxu1 %v1281_v28  ;;  %1901 = vmatprep.subr.mxu0 %v1657_v29  ;;  %v1586_v28 = vld [vmem:[#allocation10 + $0xee0] sm:$0xff]  ;;  %v1389_v29 = vld [vmem:[#allocation10 + $0x8b8] sm:$0xff] }
  0xe2   :  { %1971 = vmatpush2.msra.mxu1 %v1280_v30  ;;  %1902 = vmatpush2.msra.mxu0 %v1656_v32  ;;  %v1581_v30 = vld [vmem:[#allocation10 + $0xeb8] sm:$0xff]  ;;  %v1388_v32 = vld [vmem:[#allocation10 + $0x8b0] sm:$0xff] }
  0xe3   :  { %1972 = vmatprep.subr.mxu1 %v1275_v33  ;;  %1903 = vmatprep.subr.mxu0 %v1651_v34  ;;  %v1580_v33 = vld [vmem:[#allocation10 + $0xeb0] sm:$0xff]  ;;  %v1383_v34 = vld [vmem:[#allocation10 + $0x888] sm:$0xff] }
  0xe4   :  { %1973 = vmatpush2.msra.mxu1 %v1274_v35  ;;  %1904 = vmatpush2.msra.mxu0 %v1650_v36  ;;  %v1575_v35 = vld [vmem:[#allocation10 + $0xe88] sm:$0xff]  ;;  %v1382_v36 = vld [vmem:[#allocation10 + $0x880] sm:$0xff] }
  0xe5   :  { %1974 = vmatprep.subr.mxu1 %v1269_v37  ;;  %1905 = vmatprep.subr.mxu0 %v1645_v38  ;;  %v1574_v37 = vld [vmem:[#allocation10 + $0xe80] sm:$0xff]  ;;  %v1377_v38 = vld [vmem:[#allocation10 + $0x858] sm:$0xff] }
  0xe6   :  { %1975 = vmatpush2.msra.mxu1 %v1268_v39  ;;  %1906 = vmatpush2.msra.mxu0 %v1644_v40  ;;  %v1569_v39 = vld [vmem:[#allocation10 + $0xe58] sm:$0xff]  ;;  %v1376_v40 = vld [vmem:[#allocation10 + $0x850] sm:$0xff] }
  0xe7   :  { %1976 = vmatprep.subr.mxu1 %v1263_v41  ;;  %1907 = vmatprep.subr.mxu0 %v1639_v42  ;;  %v1568_v41 = vld [vmem:[#allocation10 + $0xe50] sm:$0xff]  ;;  %v1371_v42 = vld [vmem:[#allocation10 + $0x828] sm:$0xff] }
  0xe8   :  { %1977 = vmatpush2.msra.mxu1 %v1262_v43  ;;  %1908 = vmatpush2.msra.mxu0 %v1638_v44  ;;  %v1563_v43 = vld [vmem:[#allocation10 + $0xe28] sm:$0xff]  ;;  %v1370_v44 = vld [vmem:[#allocation10 + $0x820] sm:$0xff] }
  0xe9   :  { %1978 = vmatprep.subr.mxu1 %v1257_v45  ;;  %1909 = vmatprep.subr.mxu0 %v1633_v46  ;;  %v1562_v45 = vld [vmem:[#allocation10 + $0xe20] sm:$0xff]  ;;  %v1365_v46 = vld [vmem:[#allocation10 + $0x7f8] sm:$0xff] }
  0xea   :  { %1979 = vmatpush2.msra.mxu1 %v1256_v47  ;;  %1910 = vmatpush2.msra.mxu0 %v1632_v48  ;;  %v1557_v47 = vld [vmem:[#allocation10 + $0xdf8] sm:$0xff]  ;;  %v1364_v48 = vld [vmem:[#allocation10 + $0x7f0] sm:$0xff] }
  0xeb   :  { %1980 = vmatprep.subr.mxu1 %v1251_v49  ;;  %1911 = vmatprep.subr.mxu0 %v1627_v51  ;;  %v1556_v49 = vld [vmem:[#allocation10 + $0xdf0] sm:$0xff]  ;;  %v1359_v51 = vld [vmem:[#allocation10 + $0x7c8] sm:$0xff] }
  0xec   :  { %1981 = vmatpush2.msra.mxu1 %v1250_v52  ;;  %1912 = vmatpush2.msra.mxu0 %v1626_v53  ;;  %v1551_v52 = vld [vmem:[#allocation10 + $0xdc8] sm:$0xff]  ;;  %v1358_v53 = vld [vmem:[#allocation10 + $0x7c0] sm:$0xff] }
  0xed   :  { %1982 = vmatprep.subr.mxu1 %v1245_v54  ;;  %1913 = vmatprep.subr.mxu0 %v1621_v55  ;;  %v1550_v54 = vld [vmem:[#allocation10 + $0xdc0] sm:$0xff]  ;;  %v1353_v55 = vld [vmem:[#allocation10 + $0x798] sm:$0xff] }
  0xee   :  { %1983 = vmatpush2.msra.mxu1 %v1244_v57  ;;  %1914 = vmatpush2.msra.mxu0 %v1620_v58  ;;  %v1352_v57 = vld [vmem:[#allocation10 + $0x790] sm:$0xff] }
  0xef   :  { %1984 = vmatprep.subr.mxu1 %v1239_v59  ;;  %1915 = vmatprep.subr.mxu0 %v1615_v60  ;;  %v1544_v58 = vld [vmem:[#allocation10 + $0xd90] sm:$0xff]  ;;  %v1347_v59 = vld [vmem:[#allocation10 + $0x768] sm:$0xff] }
  0xf0   :  { %1985 = vmatpush2.msra.mxu1 %v1238_v61  ;;  %1916 = vmatpush2.msra.mxu0 %v1614_v62  ;;  %v1539_v60 = vld [vmem:[#allocation10 + $0xd68] sm:$0xff]  ;;  %v1346_v61 = vld [vmem:[#allocation10 + $0x760] sm:$0xff] }
  0xf1   :  { %1986 = vmatprep.subr.mxu1 %v1233_v1  ;;  %1917 = vmatprep.subr.mxu0 %v1609_v2  ;;  %v1538_v62 = vld [vmem:[#allocation10 + $0xd60] sm:$0xff]  ;;  %v1533_v1 = vld [vmem:[#allocation10 + $0xd38] sm:$0xff]  ;;  %v1340_v2 = vld [vmem:[#allocation10 + $0x730] sm:$0xff] }
  0xf2   :  { %1987 = vmatpush2.msra.mxu1 %v1232_v3  ;;  %1918 = vmatpush2.msra.mxu0 %v1608_v4  ;;  %v1532_v3 = vld [vmem:[#allocation10 + $0xd30] sm:$0xff]  ;;  %v1335_v4 = vld [vmem:[#allocation10 + $0x708] sm:$0xff] }
  0xf3   :  { %1988 = vmatprep.subr.mxu1 %v1227_v5  ;;  %1919 = vmatprep.subr.mxu0 %v1603_v6  ;;  %v1527_v5 = vld [vmem:[#allocation10 + $0xd08] sm:$0xff]  ;;  %v1334_v6 = vld [vmem:[#allocation10 + $0x700] sm:$0xff] }
  0xf4   :  { %1989 = vmatpush2.msra.mxu1 %v1226_v7  ;;  %1920 = vmatpush2.msra.mxu0 %v1602_v8  ;;  %v1526_v7 = vld [vmem:[#allocation10 + $0xd00] sm:$0xff]  ;;  %v1329_v8 = vld [vmem:[#allocation10 + $0x6d8] sm:$0xff] }
  0xf5   :  { %1990 = vmatprep.subr.mxu1 %v1221_v10  ;;  %1921 = vmatprep.subr.mxu0 %v1597_v11  ;;  %v1521_v10 = vld [vmem:[#allocation10 + $0xcd8] sm:$0xff]  ;;  %v1328_v11 = vld [vmem:[#allocation10 + $0x6d0] sm:$0xff] }
  0xf6   :  { %1991 = vmatpush2.msra.mxu1 %v1220_v12  ;;  %1922 = vmatpush2.msra.mxu0 %v1596_v13  ;;  %v1520_v12 = vld [vmem:[#allocation10 + $0xcd0] sm:$0xff]  ;;  %v1323_v13 = vld [vmem:[#allocation10 + $0x6a8] sm:$0xff] }
  0xf7   :  { %1992 = vmatprep.subr.mxu1 %v1215_v14  ;;  %1923 = vmatprep.subr.mxu0 %v1591_v15  ;;  %v1515_v14 = vld [vmem:[#allocation10 + $0xca8] sm:$0xff]  ;;  %v1322_v15 = vld [vmem:[#allocation10 + $0x6a0] sm:$0xff] }
  0xf8   :  { %1993 = vmatpush2.msra.mxu1 %v1214_v16  ;;  %1924 = vmatpush2.msra.mxu0 %v1590_v17  ;;  %v1514_v16 = vld [vmem:[#allocation10 + $0xca0] sm:$0xff]  ;;  %v1317_v17 = vld [vmem:[#allocation10 + $0x678] sm:$0xff] }
  0xf9   :  { %1994 = vmatprep.subr.mxu1 %v1209_v19  ;;  %1925 = vmatprep.mubr.f32.mxu0 %v4588_v18  ;;  %v1509_v19 = vld [vmem:[#allocation10 + $0xc78] sm:$0xff] }
  0xfa   :  { %1995 = vmatpush2.msra.mxu1 %v1208_v20  ;;  %1926 = vmatmul.mubr.f32.vlgmr.msra.gmra.mxu0 %v4584_v9  ;;  %v1316_v20 = vld [vmem:[#allocation10 + $0x670] sm:$0xff] }
  0xfb   :  { %1996 = vmatprep.mubr.f32.mxu1 %v4564_v24  ;;  %2003 = vmatprep.subr.mxu0 %v1395_v21  ;;  %v1508_v21 = vld [vmem:[#allocation10 + $0xc70] sm:$0xff] }
  0xfc   :  { %2074 = vmatprep.subr.mxu1 %v1587_v23  ;;  %1997 = vmatmul.mubr.f32.vlgmr.msra.gmra.mxu1 %v4560_v22  ;;  %v1311_v23 = vld [vmem:[#allocation10 + $0x648] sm:$0xff] }
  0xfd   :  { %2004 = vmatpush1.msra.mxu0 %v1394_v26  ;;  %2075 = vmatpush1.msra.mxu1 %v1586_v28  ;;  %v1503_v26 = vld [vmem:[#allocation10 + $0xc48] sm:$0xff]  ;;  %v1310_v28 = vld [vmem:[#allocation10 + $0x640] sm:$0xff] }
  0xfe   :  { %2005 = vmatprep.subr.mxu0 %v1389_v29  ;;  %2076 = vmatprep.subr.mxu1 %v1581_v30  ;;  %v1502_v29 = vld [vmem:[#allocation10 + $0xc40] sm:$0xff]  ;;  %v1305_v30 = vld [vmem:[#allocation10 + $0x618] sm:$0xff] }
  0xff   :  { %2006 = vmatpush1.msra.mxu0 %v1388_v32  ;;  %2077 = vmatpush1.msra.mxu1 %v1580_v33  ;;  %v1497_v32 = vld [vmem:[#allocation10 + $0xc18] sm:$0xff]  ;;  %v1304_v33 = vld [vmem:[#allocation10 + $0x610] sm:$0xff] }
 0x100   :  { %2007 = vmatprep.subr.mxu0 %v1383_v34  ;;  %2078 = vmatprep.subr.mxu1 %v1575_v35  ;;  %v1496_v34 = vld [vmem:[#allocation10 + $0xc10] sm:$0xff]  ;;  %v1491_v35 = vld [vmem:[#allocation10 + $0xbe8] sm:$0xff] }
 0x101   :  { %2008 = vmatpush1.msra.mxu0 %v1382_v36  ;;  %2079 = vmatpush1.msra.mxu1 %v1574_v37  ;;  %v1683_v36 = vld [vmem:[#allocation10 + $0x11e8] sm:$0xff]  ;;  %v1490_v37 = vld [vmem:[#allocation10 + $0xbe0] sm:$0xff] }
 0x102   :  { %2009 = vmatprep.subr.mxu0 %v1377_v38  ;;  %2080 = vmatprep.subr.mxu1 %v1569_v39  ;;  %v1682_v38 = vld [vmem:[#allocation10 + $0x11e0] sm:$0xff]  ;;  %v1485_v39 = vld [vmem:[#allocation10 + $0xbb8] sm:$0xff] }
 0x103   :  { %2010 = vmatpush1.msra.mxu0 %v1376_v40  ;;  %2081 = vmatpush1.msra.mxu1 %v1568_v41  ;;  %v1677_v40 = vld [vmem:[#allocation10 + $0x11b8] sm:$0xff]  ;;  %v1484_v41 = vld [vmem:[#allocation10 + $0xbb0] sm:$0xff] }
 0x104   :  { %2011 = vmatprep.subr.mxu0 %v1371_v42  ;;  %2082 = vmatprep.subr.mxu1 %v1563_v43  ;;  %v1676_v42 = vld [vmem:[#allocation10 + $0x11b0] sm:$0xff]  ;;  %v1479_v43 = vld [vmem:[#allocation10 + $0xb88] sm:$0xff] }
 0x105   :  { %2012 = vmatpush1.msra.mxu0 %v1370_v44  ;;  %2083 = vmatpush1.msra.mxu1 %v1562_v45  ;;  %v1671_v44 = vld [vmem:[#allocation10 + $0x1188] sm:$0xff]  ;;  %v1478_v45 = vld [vmem:[#allocation10 + $0xb80] sm:$0xff] }
 0x106   :  { %2013 = vmatprep.subr.mxu0 %v1365_v46  ;;  %2084 = vmatprep.subr.mxu1 %v1557_v47  ;;  %v1670_v46 = vld [vmem:[#allocation10 + $0x1180] sm:$0xff]  ;;  %v1473_v47 = vld [vmem:[#allocation10 + $0xb58] sm:$0xff] }
 0x107   :  { %2014 = vmatpush1.msra.mxu0 %v1364_v48  ;;  %2085 = vmatpush1.msra.mxu1 %v1556_v49  ;;  %v1665_v48 = vld [vmem:[#allocation10 + $0x1158] sm:$0xff]  ;;  %v1472_v49 = vld [vmem:[#allocation10 + $0xb50] sm:$0xff] }
 0x108   :  { %2015 = vmatprep.subr.mxu0 %v1359_v51  ;;  %2086 = vmatprep.subr.mxu1 %v1551_v52  ;;  %v1664_v51 = vld [vmem:[#allocation10 + $0x1150] sm:$0xff]  ;;  %v1467_v52 = vld [vmem:[#allocation10 + $0xb28] sm:$0xff] }
 0x109   :  { %2016 = vmatpush1.msra.mxu0 %v1358_v53  ;;  %2087 = vmatpush1.msra.mxu1 %v1550_v54  ;;  %v1659_v53 = vld [vmem:[#allocation10 + $0x1128] sm:$0xff]  ;;  %v1466_v54 = vld [vmem:[#allocation10 + $0xb20] sm:$0xff] }
 0x10a   :  { %2017 = vmatprep.subr.mxu0 %v1353_v55  ;;  %2088 = vmatprep.subr.mxu1 %v1545_v56  ;;  %v1658_v55 = vld [vmem:[#allocation10 + $0x1120] sm:$0xff]  ;;  %v1461_v56 = vld [vmem:[#allocation10 + $0xaf8] sm:$0xff] }
 0x10b   :  { %2018 = vmatpush1.msra.mxu0 %v1352_v57  ;;  %2089 = vmatpush1.msra.mxu1 %v1544_v58  ;;  %v1653_v57 = vld [vmem:[#allocation10 + $0x10f8] sm:$0xff]  ;;  %v1460_v58 = vld [vmem:[#allocation10 + $0xaf0] sm:$0xff] }
 0x10c   :  { %2019 = vmatprep.subr.mxu0 %v1347_v59  ;;  %2090 = vmatprep.subr.mxu1 %v1539_v60  ;;  %v1652_v59 = vld [vmem:[#allocation10 + $0x10f0] sm:$0xff]  ;;  %v1455_v60 = vld [vmem:[#allocation10 + $0xac8] sm:$0xff] }
 0x10d   :  { %2020 = vmatpush1.msra.mxu0 %v1346_v61  ;;  %2091 = vmatpush1.msra.mxu1 %v1538_v62  ;;  %v1647_v61 = vld [vmem:[#allocation10 + $0x10c8] sm:$0xff]  ;;  %v1454_v62 = vld [vmem:[#allocation10 + $0xac0] sm:$0xff] }
 0x10e   :  { %2021 = vmatprep.subr.mxu0 %v1341_v63  ;;  %2092 = vmatprep.subr.mxu1 %v1533_v1  ;;  %v1646_v63 = vld [vmem:[#allocation10 + $0x10c0] sm:$0xff]  ;;  %v1449_v1 = vld [vmem:[#allocation10 + $0xa98] sm:$0xff] }
 0x10f   :  { %2022 = vmatpush1.msra.mxu0 %v1340_v2  ;;  %2093 = vmatpush1.msra.mxu1 %v1532_v3  ;;  %v1641_v2 = vld [vmem:[#allocation10 + $0x1098] sm:$0xff]  ;;  %v1448_v3 = vld [vmem:[#allocation10 + $0xa90] sm:$0xff] }
 0x110   :  { %2023 = vmatprep.subr.mxu0 %v1335_v4  ;;  %2094 = vmatprep.subr.mxu1 %v1527_v5  ;;  %v1640_v4 = vld [vmem:[#allocation10 + $0x1090] sm:$0xff]  ;;  %v1443_v5 = vld [vmem:[#allocation10 + $0xa68] sm:$0xff] }
 0x111   :  { %2024 = vmatpush1.msra.mxu0 %v1334_v6  ;;  %2095 = vmatpush1.msra.mxu1 %v1526_v7  ;;  %v1635_v6 = vld [vmem:[#allocation10 + $0x1068] sm:$0xff]  ;;  %v1442_v7 = vld [vmem:[#allocation10 + $0xa60] sm:$0xff] }
 0x112   :  { %2025 = vmatprep.subr.mxu0 %v1329_v8  ;;  %2096 = vmatprep.subr.mxu1 %v1521_v10  ;;  %v1634_v8 = vld [vmem:[#allocation10 + $0x1060] sm:$0xff]  ;;  %v1437_v10 = vld [vmem:[#allocation10 + $0xa38] sm:$0xff] }
 0x113   :  { %2026 = vmatpush1.msra.mxu0 %v1328_v11  ;;  %2097 = vmatpush1.msra.mxu1 %v1520_v12  ;;  %v1629_v11 = vld [vmem:[#allocation10 + $0x1038] sm:$0xff]  ;;  %v1436_v12 = vld [vmem:[#allocation10 + $0xa30] sm:$0xff] }
 0x114   :  { %2027 = vmatprep.subr.mxu0 %v1323_v13  ;;  %2098 = vmatprep.subr.mxu1 %v1515_v14  ;;  %v1628_v13 = vld [vmem:[#allocation10 + $0x1030] sm:$0xff]  ;;  %v1431_v14 = vld [vmem:[#allocation10 + $0xa08] sm:$0xff] }
 0x115   :  { %2028 = vmatpush1.msra.mxu0 %v1322_v15  ;;  %2099 = vmatpush1.msra.mxu1 %v1514_v16  ;;  %v1623_v15 = vld [vmem:[#allocation10 + $0x1008] sm:$0xff]  ;;  %v1430_v16 = vld [vmem:[#allocation10 + $0xa00] sm:$0xff] }
 0x116   :  { %2029 = vmatprep.subr.mxu0 %v1317_v17  ;;  %2100 = vmatprep.subr.mxu1 %v1509_v19  ;;  %v1622_v17 = vld [vmem:[#allocation10 + $0x1000] sm:$0xff]  ;;  %v1425_v19 = vld [vmem:[#allocation10 + $0x9d8] sm:$0xff] }
 0x117   :  { %2030 = vmatpush1.msra.mxu0 %v1316_v20  ;;  %2101 = vmatpush1.msra.mxu1 %v1508_v21  ;;  %v1617_v20 = vld [vmem:[#allocation10 + $0xfd8] sm:$0xff]  ;;  %v1424_v21 = vld [vmem:[#allocation10 + $0x9d0] sm:$0xff] }
 0x118   :  { %2031 = vmatprep.subr.mxu0 %v1311_v23  ;;  %2102 = vmatprep.subr.mxu1 %v1503_v26  ;;  %v1616_v23 = vld [vmem:[#allocation10 + $0xfd0] sm:$0xff]  ;;  %v1419_v26 = vld [vmem:[#allocation10 + $0x9a8] sm:$0xff] }
 0x119   :  { %2032 = vmatpush1.msra.mxu0 %v1310_v28  ;;  %2103 = vmatpush1.msra.mxu1 %v1502_v29  ;;  %v1611_v28 = vld [vmem:[#allocation10 + $0xfa8] sm:$0xff]  ;;  %v1418_v29 = vld [vmem:[#allocation10 + $0x9a0] sm:$0xff] }
 0x11a   :  { %2033 = vmatprep.subr.mxu0 %v1305_v30  ;;  %2104 = vmatprep.subr.mxu1 %v1497_v32  ;;  %v1610_v30 = vld [vmem:[#allocation10 + $0xfa0] sm:$0xff]  ;;  %v1413_v32 = vld [vmem:[#allocation10 + $0x978] sm:$0xff] }
 0x11b   :  { %2034 = vmatpush1.msra.mxu0 %v1304_v33  ;;  %2105 = vmatpush1.msra.mxu1 %v1496_v34  ;;  %v1605_v33 = vld [vmem:[#allocation10 + $0xf78] sm:$0xff]  ;;  %v1412_v34 = vld [vmem:[#allocation10 + $0x970] sm:$0xff] }
 0x11c   :  { %2035 = vmatprep.subr.mxu0 %v1491_v35  ;;  %2106 = vmatprep.subr.mxu1 %v1683_v36  ;;  %v1604_v35 = vld [vmem:[#allocation10 + $0xf70] sm:$0xff]  ;;  %v1407_v36 = vld [vmem:[#allocation10 + $0x948] sm:$0xff] }
 0x11d   :  { %2036 = vmatpush2.msra.mxu0 %v1490_v37  ;;  %2107 = vmatpush2.msra.mxu1 %v1682_v38  ;;  %v1599_v37 = vld [vmem:[#allocation10 + $0xf48] sm:$0xff]  ;;  %v1406_v38 = vld [vmem:[#allocation10 + $0x940] sm:$0xff] }
 0x11e   :  { %2037 = vmatprep.subr.mxu0 %v1485_v39  ;;  %2108 = vmatprep.subr.mxu1 %v1677_v40  ;;  %v1598_v39 = vld [vmem:[#allocation10 + $0xf40] sm:$0xff]  ;;  %v1401_v40 = vld [vmem:[#allocation10 + $0x918] sm:$0xff] }
 0x11f   :  { %2038 = vmatpush2.msra.mxu0 %v1484_v41  ;;  %2109 = vmatpush2.msra.mxu1 %v1676_v42  ;;  %v1593_v41 = vld [vmem:[#allocation10 + $0xf18] sm:$0xff]  ;;  %v1400_v42 = vld [vmem:[#allocation10 + $0x910] sm:$0xff] }
 0x120   :  { %2039 = vmatprep.subr.mxu0 %v1479_v43  ;;  %2110 = vmatprep.subr.mxu1 %v1671_v44  ;;  %v1592_v43 = vld [vmem:[#allocation10 + $0xf10] sm:$0xff]  ;;  %v1205_v44 = vld [vmem:[#allocation10 + $0x2f8] sm:$0xff] }
 0x121   :  { %2040 = vmatpush2.msra.mxu0 %v1478_v45  ;;  %2111 = vmatpush2.msra.mxu1 %v1670_v46  ;;  %v1397_v45 = vld [vmem:[#allocation10 + $0x8f8] sm:$0xff]  ;;  %v1204_v46 = vld [vmem:[#allocation10 + $0x2f0] sm:$0xff] }
 0x122   :  { %2041 = vmatprep.subr.mxu0 %v1473_v47  ;;  %2112 = vmatprep.subr.mxu1 %v1665_v48  ;;  %v1396_v47 = vld [vmem:[#allocation10 + $0x8f0] sm:$0xff]  ;;  %v1199_v48 = vld [vmem:[#allocation10 + $0x2c8] sm:$0xff] }
 0x123   :  { %2042 = vmatpush2.msra.mxu0 %v1472_v49  ;;  %2113 = vmatpush2.msra.mxu1 %v1664_v51  ;;  %v1391_v49 = vld [vmem:[#allocation10 + $0x8c8] sm:$0xff]  ;;  %v1198_v51 = vld [vmem:[#allocation10 + $0x2c0] sm:$0xff] }
 0x124   :  { %2043 = vmatprep.subr.mxu0 %v1467_v52  ;;  %2114 = vmatprep.subr.mxu1 %v1659_v53  ;;  %v1390_v52 = vld [vmem:[#allocation10 + $0x8c0] sm:$0xff]  ;;  %v1193_v53 = vld [vmem:[#allocation10 + $0x298] sm:$0xff] }
 0x125   :  { %2044 = vmatpush2.msra.mxu0 %v1466_v54  ;;  %2115 = vmatpush2.msra.mxu1 %v1658_v55  ;;  %v1385_v54 = vld [vmem:[#allocation10 + $0x898] sm:$0xff]  ;;  %v1192_v55 = vld [vmem:[#allocation10 + $0x290] sm:$0xff] }
 0x126   :  { %2045 = vmatprep.subr.mxu0 %v1461_v56  ;;  %2116 = vmatprep.subr.mxu1 %v1653_v57  ;;  %v1384_v56 = vld [vmem:[#allocation10 + $0x890] sm:$0xff]  ;;  %v1187_v57 = vld [vmem:[#allocation10 + $0x268] sm:$0xff] }
 0x127   :  { %2046 = vmatpush2.msra.mxu0 %v1460_v58  ;;  %2117 = vmatpush2.msra.mxu1 %v1652_v59  ;;  %v1379_v58 = vld [vmem:[#allocation10 + $0x868] sm:$0xff]  ;;  %v1186_v59 = vld [vmem:[#allocation10 + $0x260] sm:$0xff] }
 0x128   :  { %2047 = vmatprep.subr.mxu0 %v1455_v60  ;;  %2118 = vmatprep.subr.mxu1 %v1647_v61  ;;  %v1378_v60 = vld [vmem:[#allocation10 + $0x860] sm:$0xff]  ;;  %v1181_v61 = vld [vmem:[#allocation10 + $0x238] sm:$0xff] }
 0x129   :  { %2048 = vmatpush2.msra.mxu0 %v1454_v62  ;;  %2119 = vmatpush2.msra.mxu1 %v1646_v63  ;;  %v1373_v62 = vld [vmem:[#allocation10 + $0x838] sm:$0xff]  ;;  %v1180_v63 = vld [vmem:[#allocation10 + $0x230] sm:$0xff] }
 0x12a   :  { %2049 = vmatprep.subr.mxu0 %v1449_v1  ;;  %2120 = vmatprep.subr.mxu1 %v1641_v2  ;;  %v1372_v1 = vld [vmem:[#allocation10 + $0x830] sm:$0xff]  ;;  %v1175_v2 = vld [vmem:[#allocation10 + $0x208] sm:$0xff] }
 0x12b   :  { %2050 = vmatpush2.msra.mxu0 %v1448_v3  ;;  %2121 = vmatpush2.msra.mxu1 %v1640_v4  ;;  %v1367_v3 = vld [vmem:[#allocation10 + $0x808] sm:$0xff]  ;;  %v1174_v4 = vld [vmem:[#allocation10 + $0x200] sm:$0xff] }
 0x12c   :  { %2051 = vmatprep.subr.mxu0 %v1443_v5  ;;  %2122 = vmatprep.subr.mxu1 %v1635_v6  ;;  %v1366_v5 = vld [vmem:[#allocation10 + $0x800] sm:$0xff] }
 0x12d   :  { %2052 = vmatpush2.msra.mxu0 %v1442_v7  ;;  %2123 = vmatpush2.msra.mxu1 %v1634_v8  ;;  %v331_v6 = vld [vmem:[#allocation7] sm:$0xff]  ;;  %v332_v7 = vld [vmem:[#allocation7 + $0x8] sm:$0xff]  ;;  %v1169_v8 = vld [vmem:[#allocation10 + $0x1d8] sm:$0xff] }
 0x12e   :  { %2053 = vmatprep.subr.mxu0 %v1437_v10  ;;  %2124 = vmatprep.subr.mxu1 %v1629_v11  ;;  %v1361_v10 = vld [vmem:[#allocation10 + $0x7d8] sm:$0xff]  ;;  %v333_v11 = vld [vmem:[#allocation7 + $0x10] sm:$0xff] }
 0x12f   :  { %2054 = vmatpush2.msra.mxu0 %v1436_v12  ;;  %2125 = vmatpush2.msra.mxu1 %v1628_v13  ;;  %v334_v12 = vld [vmem:[#allocation7 + $0x18] sm:$0xff]  ;;  %v337_v13 = vld [vmem:[#allocation7 + $0x30] sm:$0xff] }
 0x130   :  { %2055 = vmatprep.subr.mxu0 %v1431_v14  ;;  %2126 = vmatprep.subr.mxu1 %v1623_v15  ;;  %v1168_v14 = vld [vmem:[#allocation10 + $0x1d0] sm:$0xff] }
 0x131   :  { %2056 = vmatpush2.msra.mxu0 %v1430_v16  ;;  %2127 = vmatpush2.msra.mxu1 %v1622_v17  ;;  %v1360_v15 = vld [vmem:[#allocation10 + $0x7d0] sm:$0xff]  ;;  %v338_v16 = vld [vmem:[#allocation7 + $0x38] sm:$0xff]  ;;  %v339_v17 = vld [vmem:[#allocation7 + $0x40] sm:$0xff] }
 0x132   :  { %2057 = vmatprep.subr.mxu0 %v1425_v19  ;;  %2128 = vmatprep.subr.mxu1 %v1617_v20  ;;  %v340_v19 = vld [vmem:[#allocation7 + $0x48] sm:$0xff]  ;;  %v357_v20 = vadd.f32 %v337_v13, %v331_v6  ;;  %v1342_v6 = vld [vmem:[#allocation10 + $0x740] sm:$0xff]  ;;  %v1337_v13 = vld [vmem:[#allocation10 + $0x718] sm:$0xff] }
 0x133   :  { %2058 = vmatpush2.msra.mxu0 %v1424_v21  ;;  %2129 = vmatpush2.msra.mxu1 %v1616_v23  ;;  %v1163_v21 = vld [vmem:[#allocation10 + $0x1a8] sm:$0xff]  ;;  %v343_v23 = vld [vmem:[#allocation7 + $0x60] sm:$0xff] }
 0x134   :  { %2059 = vmatprep.subr.mxu0 %v1419_v26  ;;  %2130 = vmatprep.subr.mxu1 %v1611_v28  ;;  %v344_v26 = vld [vmem:[#allocation7 + $0x68] sm:$0xff]  ;;  %v345_v28 = vld [vmem:[#allocation7 + $0x70] sm:$0xff] }
 0x135   :  { %2060 = vmatpush2.msra.mxu0 %v1418_v29  ;;  %2131 = vmatpush2.msra.mxu1 %v1610_v30  ;;  %v364_v29 = vadd.f32 %v338_v16, %v332_v7  ;;  %v371_v30 = vadd.f32 %v339_v17, %v333_v11 }
 0x136   :  { %2061 = vmatprep.subr.mxu0 %v1413_v32  ;;  %2132 = vmatprep.subr.mxu1 %v1605_v33  ;;  %v378_v32 = vadd.f32 %v340_v19, %v334_v12  ;;  %v1355_v33 = vld [vmem:[#allocation10 + $0x7a8] sm:$0xff]  ;;  %v1145_v12 = vld [vmem:[#allocation10 + $0x118] sm:$0xff]  ;;  %v1144_v19 = vld [vmem:[#allocation10 + $0x110] sm:$0xff] }
 0x137   :  { %2062 = vmatpush2.msra.mxu0 %v1412_v34  ;;  %2133 = vmatpush2.msra.mxu1 %v1604_v35  ;;  %v349_v34 = vld [vmem:[#allocation7 + $0x90] sm:$0xff]  ;;  %v350_v35 = vld [vmem:[#allocation7 + $0x98] sm:$0xff] }
 0x138   :  { %2063 = vmatprep.subr.mxu0 %v1407_v36  ;;  %2134 = vmatprep.subr.mxu1 %v1599_v37  ;;  %v358_v36 = vrot.slane %v357_v20, 4  ;;  %v346_v37 = vld [vmem:[#allocation7 + $0x78] sm:$0xff] }
 0x139   :  { %2064 = vmatpush2.msra.mxu0 %v1406_v38  ;;  %2135 = vmatpush2.msra.mxu1 %v1598_v39  ;;  %v351_v38 = vld [vmem:[#allocation7 + $0xa0] sm:$0xff]  ;;  %v352_v39 = vld [vmem:[#allocation7 + $0xa8] sm:$0xff] }
 0x13a   :  { %2065 = vmatprep.subr.mxu0 %v1401_v40  ;;  %2136 = vmatprep.subr.mxu1 %v1593_v41  ;;  %v365_v40 = vrot.slane %v364_v29, 4  ;;  %v372_v41 = vrot.slane %v371_v30, 4 }
 0x13b   :  { %2066 = vmatpush2.msra.mxu0 %v1400_v42  ;;  %2067 = vmatprep.mubr.f32.mxu0 %v4572_v27  ;;  %v379_v42 = vrot.slane %v378_v32, 4 }
 0x13c   :  { %2137 = vmatpush2.msra.mxu1 %v1592_v43  ;;  %2068 = vmatmul.mubr.f32.vlgmr.msra.gmra.mxu0 %v4567_v25  ;;  %v399_v43 = vadd.f32 %v349_v34, %v343_v23 }
 0x13d   :  { %2138 = vmatprep.mubr.f32.mxu1 %v4588_v18  ;;  %2145 = vmatprep.subr.mxu0 %v1205_v44  ;;  %v1162_v44 = vld [vmem:[#allocation10 + $0x1a0] sm:$0xff] }
 0x13e   :  { %2216 = vmatprep.subr.mxu1 %v1397_v45  ;;  %2139 = vmatmul.mubr.f32.vlgmr.msra.gmra.mxu1 %v4584_v9  ;;  %v1354_v45 = vld [vmem:[#allocation10 + $0x7a0] sm:$0xff] }
 0x13f   :  { %2146 = vmatpush1.msra.mxu0 %v1204_v46  ;;  %2217 = vmatpush1.msra.mxu1 %v1396_v47  ;;  %v359_v46 = vadd.f32 %v358_v36, %v357_v20  ;;  %v406_v47 = vadd.f32 %v350_v35, %v344_v26  ;;  %v1336_v20 = vld [vmem:[#allocation10 + $0x710] sm:$0xff]  ;;  %v1138_v36 = vld [vmem:[#allocation10 + $0xe0] sm:$0xff] }
 0x140   :  { %2147 = vmatprep.subr.mxu0 %v1199_v48  ;;  %2218 = vmatprep.subr.mxu1 %v1391_v49  ;;  %v413_v48 = vadd.f32 %v351_v38, %v345_v28  ;;  %v1157_v49 = vld [vmem:[#allocation10 + $0x178] sm:$0xff] }
 0x141   :  { %2148 = vmatpush1.msra.mxu0 %v1198_v51  ;;  %2219 = vmatpush1.msra.mxu1 %v1390_v52  ;;  %v1349_v51 = vld [vmem:[#allocation10 + $0x778] sm:$0xff]  ;;  %v366_v52 = vadd.f32 %v365_v40, %v364_v29  ;;  %v1139_v29 = vld [vmem:[#allocation10 + $0xe8] sm:$0xff] }
 0x142   :  { %2149 = vmatprep.subr.mxu0 %v1193_v53  ;;  %2220 = vmatprep.subr.mxu1 %v1385_v54  ;;  %v373_v53 = vadd.f32 %v372_v41, %v371_v30  ;;  %v380_v54 = vadd.f32 %v379_v42, %v378_v32  ;;  %v1331_v30 = vld [vmem:[#allocation10 + $0x6e8] sm:$0xff]  ;;  %v1133_v42 = vld [vmem:[#allocation10 + $0xb8] sm:$0xff] }
 0x143   :  { %2150 = vmatpush1.msra.mxu0 %v1192_v55  ;;  %2221 = vmatpush1.msra.mxu1 %v1384_v56  ;;  %v400_v55 = vrot.slane %v399_v43, 4  ;;  %v1156_v56 = vld [vmem:[#allocation10 + $0x170] sm:$0xff] }
 0x144   :  { %2151 = vmatprep.subr.mxu0 %v1187_v57  ;;  %2222 = vmatprep.subr.mxu1 %v1379_v58  ;;  %v1348_v57 = vld [vmem:[#allocation10 + $0x770] sm:$0xff]  ;;  %v360_v58 = vrot.slane %v359_v46, 2 }
 0x145   :  { %2152 = vmatpush1.msra.mxu0 %v1186_v59  ;;  %2223 = vmatpush1.msra.mxu1 %v1378_v60  ;;  %v407_v59 = vrot.slane %v406_v47, 4  ;;  %v414_v60 = vrot.slane %v413_v48, 4 }
 0x146   :  { %2153 = vmatprep.subr.mxu0 %v1181_v61  ;;  %2224 = vmatprep.subr.mxu1 %v1373_v62  ;;  %v420_v61 = vadd.f32 %v352_v39, %v346_v37  ;;  %v1151_v62 = vld [vmem:[#allocation10 + $0x148] sm:$0xff]  ;;  %v361_v7 = vadd.f32 %v360_v58, %v359_v46  ;;  %v1330_v37 = vld [vmem:[#allocation10 + $0x6e0] sm:$0xff] }
 0x147   :  { %2154 = vmatpush1.msra.mxu0 %v1180_v63  ;;  %2225 = vmatpush1.msra.mxu1 %v1372_v1  ;;  %v1343_v63 = vld [vmem:[#allocation10 + $0x748] sm:$0xff]  ;;  %v367_v1 = vrot.slane %v366_v52, 2  ;;  %v1126_v58 = vld [vmem:[#allocation10 + $0x80] sm:$0xff] }
 0x148   :  { %2155 = vmatprep.subr.mxu0 %v1175_v2  ;;  %2226 = vmatprep.subr.mxu1 %v1367_v3  ;;  %v374_v2 = vrot.slane %v373_v53, 2  ;;  %v381_v3 = vrot.slane %v380_v54, 2  ;;  %v421_v11 = vrot.slane %v420_v61, 4 }
 0x149   :  { %2156 = vmatpush1.msra.mxu0 %v1174_v4  ;;  %2227 = vmatpush1.msra.mxu1 %v1366_v5  ;;  %v401_v4 = vadd.f32 %v400_v55, %v399_v43  ;;  %v1150_v5 = vld [vmem:[#allocation10 + $0x140] sm:$0xff]  ;;  %v1325_v43 = vld [vmem:[#allocation10 + $0x6b8] sm:$0xff]  ;;  %v1319_v55 = vld [vmem:[#allocation10 + $0x688] sm:$0xff] }
 0x14a   :  { %2157 = vmatprep.subr.mxu0 %v1169_v8  ;;  %2228 = vmatprep.subr.mxu1 %v1361_v10  ;;  %v408_v8 = vadd.f32 %v407_v59, %v406_v47  ;;  %v415_v10 = vadd.f32 %v414_v60, %v413_v48  ;;  %v382_v16 = vadd.f32 %v381_v3, %v380_v54  ;;  %v1132_v48 = vld [vmem:[#allocation10 + $0xb0] sm:$0xff]  ;;  %v1127_v54 = vld [vmem:[#allocation10 + $0x88] sm:$0xff]  ;;  %v1318_v59 = vld [vmem:[#allocation10 + $0x680] sm:$0xff] }
 0x14b   :  { %2158 = vmatpush1.msra.mxu0 %v1168_v14  ;;  %2229 = vmatpush1.msra.mxu1 %v1360_v15  ;;  %v368_v14 = vadd.f32 %v367_v1, %v366_v52  ;;  %v375_v15 = vadd.f32 %v374_v2, %v373_v53  ;;  %v402_v17 = vrot.slane %v401_v4, 2  ;;  %v422_v28 = vadd.f32 %v421_v11, %v420_v61  ;;  %v1121_v1 = vld [vmem:[#allocation10 + $0x58] sm:$0xff]  ;;  %v1120_v3 = vld [vmem:[#allocation10 + $0x50] sm:$0xff]  ;;  %v1114_v11 = vld [vmem:[#allocation10 + $0x20] sm:$0xff] }
 0x14c   :  { %2159 = vmatprep.subr.mxu0 %v1163_v21  ;;  %2230 = vmatprep.subr.mxu1 %v1355_v33  ;;  %v362_v21 = vrot.slane %v361_v7, 1  ;;  %v409_v23 = vrot.slane %v408_v8, 2  ;;  %v416_v26 = vrot.slane %v415_v10, 2  ;;  %v383_v34 = vrot.slane %v382_v16, 1  ;;  %v1313_v2 = vld [vmem:[#allocation10 + $0x658] sm:$0xff] }
 0x14d   :  { %2160 = vmatpush1.msra.mxu0 %v1162_v44  ;;  %2231 = vmatpush1.msra.mxu1 %v1354_v45  ;;  %v369_v32 = vrot.slane %v368_v14, 1  ;;  %v376_v33 = vrot.slane %v375_v15, 1  ;;  %v403_v35 = vadd.f32 %v402_v17, %v401_v4  ;;  %v423_v41 = vrot.slane %v422_v28, 2  ;;  %v1312_v4 = vld [vmem:[#allocation10 + $0x650] sm:$0xff]  ;;  %v1493_v17 = vld [vmem:[#allocation10 + $0xbf8] sm:$0xff] }
 0x14e   :  { %2161 = vmatprep.subr.mxu0 %v1157_v49  ;;  %2232 = vmatprep.subr.mxu1 %v1349_v51  ;;  %v363_v38 = vadd.f32 %v362_v21, %v361_v7  ;;  %v410_v39 = vadd.f32 %v409_v23, %v408_v8  ;;  %v417_v40 = vadd.f32 %v416_v26, %v415_v10  ;;  %v1324_v49 = vld [vmem:[#allocation10 + $0x6b0] sm:$0xff]  ;;  %v1115_v7 = vld [vmem:[#allocation10 + $0x28] sm:$0xff]  ;;  %v335_v26 = vld [vmem:[#allocation7 + $0x20] sm:$0xff] }
 0x14f   :  { %2162 = vmatpush1.msra.mxu0 %v1156_v56  ;;  %2233 = vmatpush1.msra.mxu1 %v1348_v57  ;;  %v370_v44 = vadd.f32 %v369_v32, %v368_v14  ;;  %v377_v45 = vadd.f32 %v376_v33, %v375_v15  ;;  %v384_v46 = vadd.f32 %v383_v34, %v382_v16  ;;  %v404_v47 = vrot.slane %v403_v35, 1  ;;  %v1307_v8 = vld [vmem:[#allocation10 + $0x628] sm:$0xff]  ;;  %v1301_v16 = vld [vmem:[#allocation10 + $0x5f8] sm:$0xff]  ;;  %v1486_v32 = vld [vmem:[#allocation10 + $0xbc0] sm:$0xff] }
 0x150   :  { %2163 = vmatprep.subr.mxu0 %v1151_v62  ;;  %2234 = vmatprep.subr.mxu1 %v1343_v63  ;;  %v411_v51 = vrot.slane %v410_v39, 1  ;;  %v418_v52 = vrot.slane %v417_v40, 1  ;;  %v424_v53 = vadd.f32 %v423_v41, %v422_v28  ;;  %v1295_v21 = vld [vmem:[#allocation10 + $0x5c8] sm:$0xff]  ;;  %v1289_v33 = vld [vmem:[#allocation10 + $0x598] sm:$0xff]  ;;  %v1288_v41 = vld [vmem:[#allocation10 + $0x590] sm:$0xff] }
 0x151   :  { %2164 = vmatpush1.msra.mxu0 %v1150_v5  ;;  %2235 = vmatpush1.msra.mxu1 %v1342_v6  ;;  %v405_v56 = vadd.f32 %v404_v47, %v403_v35  ;;  %v453_v57 = vcombine.low %v363_v38, %v370_v44  ;;  %v454_v63 = vcombine.low %v377_v45, %v384_v46  ;;  %v1487_v28 = vld [vmem:[#allocation10 + $0xbc8] sm:$0xff]  ;;  %v342_v38 = vld [vmem:[#allocation7 + $0x58] sm:$0xff] }
 0x152   :  { %2165 = vmatprep.subr.mxu0 %v1145_v12  ;;  %2236 = vmatprep.subr.mxu1 %v1337_v13  ;;  %v412_v60 = vadd.f32 %v411_v51, %v410_v39  ;;  %v419_v61 = vadd.f32 %v418_v52, %v417_v40  ;;  %v425_v62 = vrot.slane %v424_v53, 1  ;;  %v1306_v12 = vld [vmem:[#allocation10 + $0x620] sm:$0xff]  ;;  %v348_v44 = vld [vmem:[#allocation7 + $0x88] sm:$0xff] }
 0x153   :  { %2166 = vmatpush1.msra.mxu0 %v1144_v19  ;;  %2237 = vmatpush1.msra.mxu1 %v1336_v20  ;;  %v461_v10 = vrot.slane %v453_v57, %v4549_v50  ;;  %v468_v13 = vrot.slane %v454_v63, %v4549_v50  ;;  %v1300_v19 = vld [vmem:[#allocation10 + $0x5f0] sm:$0xff]  ;;  %v347_v39 = vld [vmem:[#allocation7 + $0x80] sm:$0xff]  ;;  %v1283_v46 = vld [vmem:[#allocation10 + $0x568] sm:$0xff] }
 0x154   :  { %2167 = vmatprep.subr.mxu0 %v1139_v29  ;;  %2238 = vmatprep.subr.mxu1 %v1331_v30  ;;  %v426_v5 = vadd.f32 %v425_v62, %v424_v53  ;;  %v478_v6 = vcombine.low %v405_v56, %v412_v60  ;;  %v1492_v20 = vld [vmem:[#allocation10 + $0xbf0] sm:$0xff]  ;;  %v1294_v29 = vld [vmem:[#allocation10 + $0x5c0] sm:$0xff]  ;;  %v336_v30 = vld [vmem:[#allocation7 + $0x28] sm:$0xff] }
 0x155   :  { %2168 = vmatpush1.msra.mxu0 %v1138_v36  ;;  %2239 = vmatpush1.msra.mxu1 %v1330_v37  ;;  %v469_v34 = vcombine.low %v461_v10, %v468_v13  ;;  %v341_v36 = vld [vmem:[#allocation7 + $0x50] sm:$0xff]  ;;  %v1481_v37 = vld [vmem:[#allocation10 + $0xb98] sm:$0xff]  ;;  %v392_v45 = vadd.f32 %v342_v38, %v336_v30  ;;  %v1475_v47 = vld [vmem:[#allocation10 + $0xb68] sm:$0xff] }
 0x156   :  { %2169 = vmatprep.subr.mxu0 %v1133_v42  ;;  %2240 = vmatprep.subr.mxu1 %v1325_v43  ;;  %v479_v14 = vcombine.low %v419_v61, %v426_v5  ;;  %v486_v15 = vrot.slane %v478_v6, %v4549_v50  ;;  %v385_v40 = vadd.f32 %v341_v36, %v335_v26  ;;  %v1480_v42 = vld [vmem:[#allocation10 + $0xb90] sm:$0xff]  ;;  %v1282_v51 = vld [vmem:[#allocation10 + $0x560] sm:$0xff]  ;;  %v1277_v57 = vld [vmem:[#allocation10 + $0x538] sm:$0xff] }
 0x157   :  { %2170 = vmatpush1.msra.mxu0 %v1132_v48  ;;  %2241 = vmatpush1.msra.mxu1 %v1324_v49  ;;  %v353_v48 = vld [vmem:[#allocation7 + $0xb0] sm:$0xff]  ;;  %v1474_v52 = vld [vmem:[#allocation10 + $0xb60] sm:$0xff]  ;;  %v1463_v5 = vld [vmem:[#allocation10 + $0xb08] sm:$0xff] }
 0x158   :  { %2171 = vmatprep.subr.mxu0 %v1127_v54  ;;  %2242 = vmatprep.subr.mxu1 %v1319_v55  ;;  %v493_v23 = vrot.slane %v479_v14, %v4549_v50  ;;  %v386_v49 = vrot.slane %v385_v40, 4  ;;  %v354_v54 = vld [vmem:[#allocation7 + $0xb8] sm:$0xff]  ;;  %v393_v55 = vrot.slane %v392_v45, 4  ;;  %v427_v56 = vadd.f32 %v353_v48, %v347_v39  ;;  %v1276_v62 = vld [vmem:[#allocation10 + $0x530] sm:$0xff]  ;;  %v1270_v10 = vld [vmem:[#allocation10 + $0x500] sm:$0xff] }
 0x159   :  { %2172 = vmatpush1.msra.mxu0 %v1126_v58  ;;  %2243 = vmatpush1.msra.mxu1 %v1318_v59  ;;  %v1469_v58 = vld [vmem:[#allocation10 + $0xb38] sm:$0xff]  ;;  %v434_v61 = vadd.f32 %v354_v54, %v348_v44  ;;  %v1468_v63 = vld [vmem:[#allocation10 + $0xb30] sm:$0xff]  ;;  %v1259_v26 = vld [vmem:[#allocation10 + $0x4a8] sm:$0xff] }
 0x15a   :  { %2173 = vmatprep.subr.mxu0 %v1121_v1  ;;  %2244 = vmatprep.subr.mxu1 %v1313_v2  ;;  %v494_v35 = vcombine.low %v486_v15, %v493_v23  ;;  %v387_v60 = vadd.f32 %v386_v49, %v385_v40  ;;  %v394_v2 = vadd.f32 %v393_v55, %v392_v45  ;;  %v1265_v14 = vld [vmem:[#allocation10 + $0x4d8] sm:$0xff]  ;;  %v1252_v40 = vld [vmem:[#allocation10 + $0x470] sm:$0xff]  ;;  %v1247_v44 = vld [vmem:[#allocation10 + $0x448] sm:$0xff] }
 0x15b   :  { %2174 = vmatpush1.msra.mxu0 %v1120_v3  ;;  %2245 = vmatpush1.msra.mxu1 %v1312_v4  ;;  %v428_v3 = vrot.slane %v427_v56, 4  ;;  %v1271_v4 = vld [vmem:[#allocation10 + $0x508] sm:$0xff]  ;;  %v1457_v15 = vld [vmem:[#allocation10 + $0xad8] sm:$0xff]  ;;  %v1438_v48 = vld [vmem:[#allocation10 + $0xa40] sm:$0xff] }
 0x15c   :  { %2175 = vmatprep.subr.mxu0 %v1115_v7  ;;  %2246 = vmatprep.subr.mxu1 %v1307_v8  ;;  %v505_v43 = vrot.slane %v494_v35, 7  ;;  %v388_v7 = vrot.slane %v387_v60, 2  ;;  %v435_v8 = vrot.slane %v434_v61, 4  ;;  %v1253_v36 = vld [vmem:[#allocation10 + $0x478] sm:$0xff]  ;;  %v1439_v45 = vld [vmem:[#allocation10 + $0xa48] sm:$0xff]  ;;  %v1240_v55 = vld [vmem:[#allocation10 + $0x410] sm:$0xff] }
 0x15d   :  { %2176 = vmatpush1.msra.mxu0 %v1114_v11  ;;  %2247 = vmatpush1.msra.mxu1 %v1306_v12  ;;  %v1462_v11 = vld [vmem:[#allocation10 + $0xb00] sm:$0xff]  ;;  %v395_v12 = vrot.slane %v394_v2, 2  ;;  %v429_v13 = vadd.f32 %v428_v3, %v427_v56  ;;  %v1432_v56 = vld [vmem:[#allocation10 + $0xa10] sm:$0xff] }
 0x15e   :  { %2177 = vmatprep.subr.mxu0 %v1301_v16  ;;  %2248 = vmatprep.subr.mxu1 %v1493_v17  ;;  %v506_v53 = vsel %vm310_vm0, %v505_v43, %v469_v34  ;;  %v389_v16 = vadd.f32 %v388_v7, %v387_v60  ;;  %v436_v17 = vadd.f32 %v435_v8, %v434_v61  ;;  %v1234_v60 = vld [vmem:[#allocation10 + $0x3e0] sm:$0xff]  ;;  %v1228_v3 = vld [vmem:[#allocation10 + $0x3b0] sm:$0xff]  ;;  %v1415_v7 = vld [vmem:[#allocation10 + $0x988] sm:$0xff] }
 0x15f   :  { %2178 = vmatpush2.msra.mxu0 %v1300_v19  ;;  %2249 = vmatpush2.msra.mxu1 %v1492_v20  ;;  %v507_v59 = vsel %vm312_vm1, %v505_v43, %v506_v53  ;;  %v1264_v19 = vld [vmem:[#allocation10 + $0x4d0] sm:$0xff]  ;;  %v430_v23 = vrot.slane %v429_v13, 2  ;;  %v1426_v61 = vld [vmem:[#allocation10 + $0x9e0] sm:$0xff] }
 0x160   :  { %2179 = vmatprep.subr.mxu0 %v1295_v21  ;;  %2250 = vmatprep.subr.mxu1 %v1487_v28  ;;  %v508_v1 = vsel %vm314_vm2, %v505_v43, %v507_v59  ;;  %v1456_v20 = vld [vmem:[#allocation10 + $0xad0] sm:$0xff]  ;;  %v396_v21 = vadd.f32 %v395_v12, %v394_v2  ;;  %v1451_v28 = vld [vmem:[#allocation10 + $0xaa8] sm:$0xff]  ;;  %v437_v30 = vrot.slane %v436_v17, 2  ;;  %v1217_v12 = vld [vmem:[#allocation10 + $0x358] sm:$0xff] }
 0x161   :  { %2180 = vmatpush2.msra.mxu0 %v1294_v29  ;;  %2251 = vmatpush2.msra.mxu1 %v1486_v32  ;;  %v4606_v6 = vsel %vm316_vm3, %v505_v43, %v508_v1  ;;  %v390_v29 = vrot.slane %v389_v16, 1  ;;  %v1258_v32 = vld [vmem:[#allocation10 + $0x4a0] sm:$0xff]  ;;  %v431_v35 = vadd.f32 %v430_v23, %v429_v13  ;;  %v1409_v13 = vld [vmem:[#allocation10 + $0x958] sm:$0xff] }
 0x162   :  { %2181 = vmatprep.subr.mxu0 %v1289_v33  ;;  %2252 = vmatprep.subr.mxu1 %v1481_v37  ;;  %v1450_v33 = vld [vmem:[#allocation10 + $0xaa0] sm:$0xff]  ;;  %v397_v34 = vrot.slane %v396_v21, 1  ;;  %v1445_v37 = vld [vmem:[#allocation10 + $0xa78] sm:$0xff]  ;;  %v438_v39 = vadd.f32 %v437_v30, %v436_v17 }
 0x163   :  { %2182 = vmatpush2.msra.mxu0 %v1288_v41  ;;  %2253 = vmatpush2.msra.mxu1 %v1480_v42  ;;  %v391_v38 = vadd.f32 %v390_v29, %v389_v16  ;;  %v1444_v41 = vld [vmem:[#allocation10 + $0xa70] sm:$0xff]  ;;  %v432_v43 = vrot.slane %v431_v35, 1  ;;  %v356_v17 = vld [vmem:[#allocation3 + $0x8] sm:$0xf]  ;;  %v1402_v30 = vld [vmem:[#allocation10 + $0x920] sm:$0xff] }
 0x164   :  { %2183 = vmatprep.subr.mxu0 %v1283_v46  ;;  %2254 = vmatprep.subr.mxu1 %v1475_v47  ;;  %v398_v42 = vadd.f32 %v397_v34, %v396_v21  ;;  %v439_v46 = vrot.slane %v438_v39, 1  ;;  %v1246_v47 = vld [vmem:[#allocation10 + $0x440] sm:$0xff]  ;;  %v1408_v16 = vld [vmem:[#allocation10 + $0x950] sm:$0xff]  ;;  %v1403_v21 = vld [vmem:[#allocation10 + $0x928] sm:$0xff] }
 0x165   :  { %2184 = vmatpush2.msra.mxu0 %v1282_v51  ;;  %2255 = vmatpush2.msra.mxu1 %v1474_v52  ;;  %v433_v49 = vadd.f32 %v432_v43, %v431_v35  ;;  %v1241_v51 = vld [vmem:[#allocation10 + $0x418] sm:$0xff] }
 0x166   :  { %2185 = vmatprep.subr.mxu0 %v1277_v57  ;;  %2256 = vmatprep.subr.mxu1 %v1469_v58  ;;  %v1433_v52 = vld [vmem:[#allocation10 + $0xa18] sm:$0xff]  ;;  %v440_v53 = vadd.f32 %v439_v46, %v438_v39  ;;  %v470_v54 = vcombine.low %v391_v38, %v398_v42  ;;  %v1235_v57 = vld [vmem:[#allocation10 + $0x3e8] sm:$0xff]  ;;  %v624_v38 = vld [vmem:[#allocation9 + $0x2d0] sm:$0xff] }
 0x167   :  { %2186 = vmatpush2.msra.mxu0 %v1276_v62  ;;  %2257 = vmatpush2.msra.mxu1 %v1468_v63  ;;  %v1427_v58 = vld [vmem:[#allocation10 + $0x9e8] sm:$0xff]  ;;  %v1229_v62 = vld [vmem:[#allocation10 + $0x3b8] sm:$0xff]  ;;  %v618_v42 = vld [vmem:[#allocation9 + $0x2a0] sm:$0xff] }
 0x168   :  { %2187 = vmatprep.subr.mxu0 %v1271_v4  ;;  %2258 = vmatprep.subr.mxu1 %v1463_v5  ;;  %v495_v59 = vcombine.low %v433_v49, %v440_v53  ;;  %v1421_v63 = vld [vmem:[#allocation10 + $0x9b8] sm:$0xff]  ;;  %v477_v1 = vrot.slane %v470_v54, %v4549_v50  ;;  %v1420_v4 = vld [vmem:[#allocation10 + $0x9b0] sm:$0xff]  ;;  %v1223_v5 = vld [vmem:[#allocation10 + $0x388] sm:$0xff] }
 0x169   :  { %2188 = vmatpush2.msra.mxu0 %v1270_v10  ;;  %2259 = vmatpush2.msra.mxu1 %v1462_v11  ;;  %v1222_v10 = vld [vmem:[#allocation10 + $0x380] sm:$0xff]  ;;  %v1589_v35 = vld [vmem:[#allocation10 + $0xef8] sm:$0xff]  ;;  %v1583_v39 = vld [vmem:[#allocation10 + $0xec8] sm:$0xff] }
 0x16a   :  { %2189 = vmatprep.subr.mxu0 %v1265_v14  ;;  %2260 = vmatprep.subr.mxu1 %v1457_v15  ;;  %v502_v2 = vrot.slane %v495_v59, %v4549_v50  ;;  %v1414_v11 = vld [vmem:[#allocation10 + $0x980] sm:$0xff]  ;;  %v1216_v15 = vld [vmem:[#allocation10 + $0x350] sm:$0xff]  ;;  %v613_v43 = vld [vmem:[#allocation9 + $0x278] sm:$0xff] }
 0x16b   :  { %2190 = vmatpush2.msra.mxu0 %v1264_v19  ;;  %2261 = vmatpush2.msra.mxu1 %v1456_v20  ;;  %v1211_v20 = vld [vmem:[#allocation10 + $0x328] sm:$0xff]  ;;  %v606_v46 = vld [vmem:[#allocation9 + $0x240] sm:$0xff]  ;;  %v1564_v49 = vld [vmem:[#allocation10 + $0xe30] sm:$0xff] }
 0x16c   :  { %2191 = vmatprep.subr.mxu0 %v1259_v26  ;;  %2262 = vmatprep.subr.mxu1 %v1451_v28  ;;  %v512_v8 = vrot.slane %v502_v2, 7  ;;  %v1210_v28 = vld [vmem:[#allocation10 + $0x320] sm:$0xff]  ;;  %v595_v53 = vld [vmem:[#allocation9 + $0x1e8] sm:$0xff]  ;;  %v588_v59 = vld [vmem:[#allocation9 + $0x1b0] sm:$0xff] }
 0x16d   :  { %2192 = vmatpush2.msra.mxu0 %v1258_v32  ;;  %2263 = vmatpush2.msra.mxu1 %v1450_v33  ;;  %v1558_v54 = vld [vmem:[#allocation10 + $0xe00] sm:$0xff]  ;;  %v577_v2 = vld [vmem:[#allocation9 + $0x158] sm:$0xff] }
 0x16e   :  { %2193 = vmatprep.subr.mxu0 %v1253_v36  ;;  %2264 = vmatprep.subr.mxu1 %v1445_v37  ;;  %v513_v14 = vsel %vm310_vm0, %v512_v8, %v477_v1  ;;  %v625_v36 = vld [vmem:[#allocation9 + $0x2d8] sm:$0xff]  ;;  %v1588_v37 = vld [vmem:[#allocation10 + $0xef0] sm:$0xff] }
 0x16f   :  { %2194 = vmatpush2.msra.mxu0 %v1252_v40  ;;  %2265 = vmatpush2.msra.mxu1 %v1444_v41  ;;  %v514_v19 = vsel %vm312_vm1, %v512_v8, %v513_v14  ;;  %v619_v40 = vld [vmem:[#allocation9 + $0x2a8] sm:$0xff]  ;;  %v1582_v41 = vld [vmem:[#allocation10 + $0xec0] sm:$0xff]  ;;  %v1541_v1 = vld [vmem:[#allocation10 + $0xd78] sm:$0xff] }
 0x170   :  { %2195 = vmatprep.subr.mxu0 %v1247_v44  ;;  %2266 = vmatprep.subr.mxu1 %v1439_v45  ;;  %v515_v26 = vsel %vm314_vm2, %v512_v8, %v514_v19  ;;  %v1576_v44 = vld [vmem:[#allocation10 + $0xe90] sm:$0xff]  ;;  %v1571_v45 = vld [vmem:[#allocation10 + $0xe68] sm:$0xff]  ;;  %v558_v19 = vld [vmem:[#allocation9 + $0xc0] sm:$0xff] }
 0x171   :  { %2196 = vmatpush2.msra.mxu0 %v1246_v47  ;;  %2267 = vmatpush2.msra.mxu1 %v1438_v48  ;;  %v516_v29 = vsel %vm316_vm3, %v512_v8, %v515_v26  ;;  %v1565_v47 = vld [vmem:[#allocation10 + $0xe38] sm:$0xff]  ;;  %v1534_v8 = vld [vmem:[#allocation10 + $0xd40] sm:$0xff]  ;;  %v564_v14 = vld [vmem:[#allocation9 + $0xf0] sm:$0xff] }
 0x172   :  { %2197 = vmatprep.subr.mxu0 %v1241_v51  ;;  %2268 = vmatprep.subr.mxu1 %v1433_v52  ;;  %v520_v33 = vadd.f32 %v516_v29, %v356_v17  ;;  %v601_v48 = vld [vmem:[#allocation9 + $0x218] sm:$0xff]  ;;  %v600_v51 = vld [vmem:[#allocation9 + $0x210] sm:$0xff]  ;;  %v1559_v52 = vld [vmem:[#allocation10 + $0xe08] sm:$0xff] }
 0x173   :  { %2198 = vmatpush2.msra.mxu0 %v1240_v55  ;;  %2269 = vmatpush2.msra.mxu1 %v1432_v56  ;;  %v594_v55 = vld [vmem:[#allocation9 + $0x1e0] sm:$0xff]  ;;  %v1553_v56 = vld [vmem:[#allocation10 + $0xdd8] sm:$0xff]  ;;  %v552_v26 = vld [vmem:[#allocation9 + $0x90] sm:$0xff] }
 0x174   :  { %2199 = vmatprep.subr.mxu0 %v1235_v57  ;;  %2270 = vmatprep.subr.mxu1 %v1427_v58  ;;  %522 = vst [vmem:[#allocation3 + $0x8] sm:$0xf] %v520_v33  ;;  %v589_v57 = vld [vmem:[#allocation9 + $0x1b8] sm:$0xff]  ;;  %v1552_v58 = vld [vmem:[#allocation10 + $0xdd0] sm:$0xff]  ;;  %v1522_v17 = vld [vmem:[#allocation10 + $0xce0] sm:$0xff] }
 0x175   :  { %2200 = vmatpush2.msra.mxu0 %v1234_v60  ;;  %2271 = vmatpush2.msra.mxu1 %v1426_v61  ;;  %v1547_v60 = vld [vmem:[#allocation10 + $0xda8] sm:$0xff]  ;;  %v1505_v33 = vld [vmem:[#allocation10 + $0xc58] sm:$0xff] }
 0x176   :  { %2201 = vmatprep.subr.mxu0 %v1229_v62  ;;  %2272 = vmatprep.subr.mxu1 %v1421_v63  ;;  %v583_v61 = vld [vmem:[#allocation9 + $0x188] sm:$0xff]  ;;  %v1546_v62 = vld [vmem:[#allocation10 + $0xda0] sm:$0xff] }
 0x177   :  { %2202 = vmatpush2.msra.mxu0 %v1228_v3  ;;  %2273 = vmatpush2.msra.mxu1 %v1420_v4  ;;  %v582_v63 = vld [vmem:[#allocation9 + $0x180] sm:$0xff]  ;;  %v1540_v3 = vld [vmem:[#allocation10 + $0xd70] sm:$0xff]  ;;  %v547_v29 = vld [vmem:[#allocation9 + $0x68] sm:$0xff] }
 0x178   :  { %2203 = vmatprep.subr.mxu0 %v1223_v5  ;;  %2274 = vmatprep.subr.mxu1 %v1415_v7  ;;  %v576_v4 = vld [vmem:[#allocation9 + $0x150] sm:$0xff]  ;;  %v1535_v5 = vld [vmem:[#allocation10 + $0xd48] sm:$0xff] }
 0x179   :  { %2204 = vmatpush2.msra.mxu0 %v1222_v10  ;;  %2275 = vmatpush2.msra.mxu1 %v1414_v11  ;;  %v1785_v23 = vpop.f32.mrf.mxu0  ;;  %v571_v7 = vld [vmem:[#allocation9 + $0x128] sm:$0xff]  ;;  %v570_v10 = vld [vmem:[#allocation9 + $0x120] sm:$0xff]  ;;  %v1529_v11 = vld [vmem:[#allocation10 + $0xd18] sm:$0xff] }
 0x17a   :  { %2205 = vmatprep.subr.mxu0 %v1217_v12  ;;  %2276 = vmatprep.subr.mxu1 %v1409_v13  ;;  %v565_v12 = vld [vmem:[#allocation9 + $0xf8] sm:$0xff]  ;;  %v1528_v13 = vld [vmem:[#allocation10 + $0xd10] sm:$0xff] }
 0x17b   :  { %2206 = vmatpush2.msra.mxu0 %v1216_v15  ;;  %2277 = vmatpush2.msra.mxu1 %v1408_v16  ;;  %v1856_v32 = vpop.f32.mrf.mxu1  ;;  %v1523_v15 = vld [vmem:[#allocation10 + $0xce8] sm:$0xff] }
 0x17c   :  { %2207 = vmatprep.subr.mxu0 %v1211_v20  ;;  %2278 = vmatprep.subr.mxu1 %v1403_v21  ;;  %v4614_v34 = vadd.f32 %v1856_v32, %v1785_v23  ;;  %v559_v16 = vld [vmem:[#allocation9 + $0xc8] sm:$0xff]  ;;  %v1517_v20 = vld [vmem:[#allocation10 + $0xcb8] sm:$0xff]  ;;  %v1516_v23 = vld [vmem:[#allocation10 + $0xcb0] sm:$0xff] }
 0x17d   :  { %2208 = vmatpush2.msra.mxu0 %v1210_v28  ;;  %2209 = vmatprep.mubr.f32.mxu0 %v4564_v24  ;;  %v1577_v24 = vld [vmem:[#allocation10 + $0xe98] sm:$0xff]  ;;  %v1511_v28 = vld [vmem:[#allocation10 + $0xc88] sm:$0xff]  ;;  %v546_v32 = vld [vmem:[#allocation9 + $0x60] sm:$0xff] }
 0x17e   :  { %2279 = vmatpush2.msra.mxu1 %v1402_v30  ;;  %2280 = vmatprep.mubr.f32.mxu1 %v4572_v27  ;;  %v612_v27 = vld [vmem:[#allocation9 + $0x270] sm:$0xff]  ;;  %v553_v21 = vld [vmem:[#allocation9 + $0x98] sm:$0xff]  ;;  %v1510_v30 = vld [vmem:[#allocation10 + $0xc80] sm:$0xff] }
 0x17f   :  { %2210 = vmatmul.mubr.f32.vlgmr.msra.gmra.mxu0 %v4560_v22  ;;  %2281 = vmatmul.mubr.f32.vlgmr.msra.gmra.mxu1 %v4567_v25  ;;  %v607_v22 = vld [vmem:[#allocation9 + $0x248] sm:$0xff]  ;;  %v1570_v25 = vld [vmem:[#allocation10 + $0xe60] sm:$0xff] }
 0x180   :  { %2287 = vmatprep.subr.mxu0 %v1589_v35  ;;  %2391 = vmatprep.subr.mxu1 %v625_v36  ;;  %v541_v35 = vld [vmem:[#allocation9 + $0x38] sm:$0xff]  ;;  %v1504_v36 = vld [vmem:[#allocation10 + $0xc50] sm:$0xff] }
 0x181   :  { %2288 = vmatpush1.msra.mxu0 %v1588_v37  ;;  %2392 = vmatpush1.msra.mxu1 %v624_v38  ;;  %v540_v37 = vld [vmem:[#allocation9 + $0x30] sm:$0xff]  ;;  %v1499_v38 = vld [vmem:[#allocation10 + $0xc28] sm:$0xff] }
 0x182   :  { %2289 = vmatprep.subr.mxu0 %v1583_v39  ;;  %2393 = vmatprep.subr.mxu1 %v619_v40  ;;  %v535_v39 = vld [vmem:[#allocation9 + $0x8] sm:$0xff]  ;;  %v1498_v40 = vld [vmem:[#allocation10 + $0xc20] sm:$0xff] }
 0x183   :  { %2290 = vmatpush1.msra.mxu0 %v1582_v41  ;;  %2394 = vmatpush1.msra.mxu1 %v618_v42  ;;  %v534_v41 = vld [vmem:[#allocation9] sm:$0xff]  ;;  %v1685_v42 = vld [vmem:[#allocation10 + $0x11f8] sm:$0xff] }
 0x184   :  { %2291 = vmatprep.subr.mxu0 %v1577_v24  ;;  %2395 = vmatprep.subr.mxu1 %v613_v43  ;;  %v721_v24 = vld [vmem:[#allocation9 + $0x5d8] sm:$0xff]  ;;  %v1684_v43 = vld [vmem:[#allocation10 + $0x11f0] sm:$0xff] }
 0x185   :  { %2292 = vmatpush1.msra.mxu0 %v1576_v44  ;;  %2396 = vmatpush1.msra.mxu1 %v612_v27  ;;  %v720_v44 = vld [vmem:[#allocation9 + $0x5d0] sm:$0xff]  ;;  %v1679_v27 = vld [vmem:[#allocation10 + $0x11c8] sm:$0xff] }
 0x186   :  { %2293 = vmatprep.subr.mxu0 %v1571_v45  ;;  %2397 = vmatprep.subr.mxu1 %v607_v22  ;;  %v715_v45 = vld [vmem:[#allocation9 + $0x5a8] sm:$0xff]  ;;  %v1678_v22 = vld [vmem:[#allocation10 + $0x11c0] sm:$0xff] }
 0x187   :  { %2294 = vmatpush1.msra.mxu0 %v1570_v25  ;;  %2398 = vmatpush1.msra.mxu1 %v606_v46  ;;  %v714_v25 = vld [vmem:[#allocation9 + $0x5a0] sm:$0xff]  ;;  %v1673_v46 = vld [vmem:[#allocation10 + $0x1198] sm:$0xff] }
 0x188   :  { %2295 = vmatprep.subr.mxu0 %v1565_v47  ;;  %2399 = vmatprep.subr.mxu1 %v601_v48  ;;  %v709_v47 = vld [vmem:[#allocation9 + $0x578] sm:$0xff]  ;;  %v1672_v48 = vld [vmem:[#allocation10 + $0x1190] sm:$0xff] }
 0x189   :  { %2296 = vmatpush1.msra.mxu0 %v1564_v49  ;;  %2400 = vmatpush1.msra.mxu1 %v600_v51  ;;  %v708_v49 = vld [vmem:[#allocation9 + $0x570] sm:$0xff]  ;;  %v1667_v51 = vld [vmem:[#allocation10 + $0x1168] sm:$0xff] }
 0x18a   :  { %2297 = vmatprep.subr.mxu0 %v1559_v52  ;;  %2401 = vmatprep.subr.mxu1 %v595_v53  ;;  %v703_v52 = vld [vmem:[#allocation9 + $0x548] sm:$0xff]  ;;  %v1666_v53 = vld [vmem:[#allocation10 + $0x1160] sm:$0xff] }
 0x18b   :  { %2298 = vmatpush1.msra.mxu0 %v1558_v54  ;;  %2402 = vmatpush1.msra.mxu1 %v594_v55  ;;  %v702_v54 = vld [vmem:[#allocation9 + $0x540] sm:$0xff]  ;;  %v1661_v55 = vld [vmem:[#allocation10 + $0x1138] sm:$0xff] }
 0x18c   :  { %2299 = vmatprep.subr.mxu0 %v1553_v56  ;;  %2403 = vmatprep.subr.mxu1 %v589_v57  ;;  %v697_v56 = vld [vmem:[#allocation9 + $0x518] sm:$0xff]  ;;  %v1660_v57 = vld [vmem:[#allocation10 + $0x1130] sm:$0xff] }
 0x18d   :  { %2300 = vmatpush1.msra.mxu0 %v1552_v58  ;;  %2404 = vmatpush1.msra.mxu1 %v588_v59  ;;  %v696_v58 = vld [vmem:[#allocation9 + $0x510] sm:$0xff]  ;;  %v1655_v59 = vld [vmem:[#allocation10 + $0x1108] sm:$0xff] }
 0x18e   :  { %2301 = vmatprep.subr.mxu0 %v1547_v60  ;;  %2405 = vmatprep.subr.mxu1 %v583_v61  ;;  %v691_v60 = vld [vmem:[#allocation9 + $0x4e8] sm:$0xff]  ;;  %v1654_v61 = vld [vmem:[#allocation10 + $0x1100] sm:$0xff] }
 0x18f   :  { %2302 = vmatpush1.msra.mxu0 %v1546_v62  ;;  %2406 = vmatpush1.msra.mxu1 %v582_v63  ;;  %v690_v62 = vld [vmem:[#allocation9 + $0x4e0] sm:$0xff]  ;;  %v1649_v63 = vld [vmem:[#allocation10 + $0x10d8] sm:$0xff] }
 0x190   :  { %2303 = vmatprep.subr.mxu0 %v1541_v1  ;;  %2407 = vmatprep.subr.mxu1 %v577_v2  ;;  %v685_v1 = vld [vmem:[#allocation9 + $0x4b8] sm:$0xff]  ;;  %v1648_v2 = vld [vmem:[#allocation10 + $0x10d0] sm:$0xff] }
 0x191   :  { %2304 = vmatpush1.msra.mxu0 %v1540_v3  ;;  %2408 = vmatpush1.msra.mxu1 %v576_v4  ;;  %v684_v3 = vld [vmem:[#allocation9 + $0x4b0] sm:$0xff]  ;;  %v1643_v4 = vld [vmem:[#allocation10 + $0x10a8] sm:$0xff] }
 0x192   :  { %2305 = vmatprep.subr.mxu0 %v1535_v5  ;;  %2409 = vmatprep.subr.mxu1 %v571_v7  ;;  %v679_v5 = vld [vmem:[#allocation9 + $0x488] sm:$0xff]  ;;  %v1642_v7 = vld [vmem:[#allocation10 + $0x10a0] sm:$0xff] }
 0x193   :  { %2306 = vmatpush1.msra.mxu0 %v1534_v8  ;;  %2410 = vmatpush1.msra.mxu1 %v570_v10  ;;  %v678_v8 = vld [vmem:[#allocation9 + $0x480] sm:$0xff]  ;;  %v1637_v10 = vld [vmem:[#allocation10 + $0x1078] sm:$0xff] }
 0x194   :  { %2307 = vmatprep.subr.mxu0 %v1529_v11  ;;  %2411 = vmatprep.subr.mxu1 %v565_v12  ;;  %v673_v11 = vld [vmem:[#allocation9 + $0x458] sm:$0xff]  ;;  %v1636_v12 = vld [vmem:[#allocation10 + $0x1070] sm:$0xff] }
 0x195   :  { %2308 = vmatpush1.msra.mxu0 %v1528_v13  ;;  %2412 = vmatpush1.msra.mxu1 %v564_v14  ;;  %v672_v13 = vld [vmem:[#allocation9 + $0x450] sm:$0xff]  ;;  %v1631_v14 = vld [vmem:[#allocation10 + $0x1048] sm:$0xff] }
 0x196   :  { %2309 = vmatprep.subr.mxu0 %v1523_v15  ;;  %2413 = vmatprep.subr.mxu1 %v559_v16  ;;  %v667_v15 = vld [vmem:[#allocation9 + $0x428] sm:$0xff]  ;;  %v1630_v16 = vld [vmem:[#allocation10 + $0x1040] sm:$0xff] }
 0x197   :  { %2310 = vmatpush1.msra.mxu0 %v1522_v17  ;;  %2414 = vmatpush1.msra.mxu1 %v558_v19  ;;  %v666_v17 = vld [vmem:[#allocation9 + $0x420] sm:$0xff]  ;;  %v1625_v19 = vld [vmem:[#allocation10 + $0x1018] sm:$0xff] }
 0x198   :  { %2311 = vmatprep.subr.mxu0 %v1517_v20  ;;  %2415 = vmatprep.subr.mxu1 %v553_v21  ;;  %v661_v20 = vld [vmem:[#allocation9 + $0x3f8] sm:$0xff]  ;;  %v1624_v21 = vld [vmem:[#allocation10 + $0x1010] sm:$0xff] }
 0x199   :  { %2312 = vmatpush1.msra.mxu0 %v1516_v23  ;;  %2416 = vmatpush1.msra.mxu1 %v552_v26  ;;  %v660_v23 = vld [vmem:[#allocation9 + $0x3f0] sm:$0xff]  ;;  %v1619_v26 = vld [vmem:[#allocation10 + $0xfe8] sm:$0xff] }
 0x19a   :  { %2313 = vmatprep.subr.mxu0 %v1511_v28  ;;  %2417 = vmatprep.subr.mxu1 %v547_v29  ;;  %v655_v28 = vld [vmem:[#allocation9 + $0x3c8] sm:$0xff]  ;;  %v1618_v29 = vld [vmem:[#allocation10 + $0xfe0] sm:$0xff] }
 0x19b   :  { %2314 = vmatpush1.msra.mxu0 %v1510_v30  ;;  %2418 = vmatpush1.msra.mxu1 %v546_v32  ;;  %v654_v30 = vld [vmem:[#allocation9 + $0x3c0] sm:$0xff]  ;;  %v4621_v32 = vmul.f32 0.0625, %v4606_v6 }
 0x19c   :  { %2315 = vmatprep.subr.mxu0 %v1505_v33  ;;  %2419 = vmatprep.subr.mxu1 %v541_v35  ;;  %v1613_v33 = vld [vmem:[#allocation10 + $0xfb8] sm:$0xff] }
 0x19d   :  { %2316 = vmatpush1.msra.mxu0 %v1504_v36  ;;  %2420 = vmatpush1.msra.mxu1 %v540_v37  ;;  %v649_v35 = vld [vmem:[#allocation9 + $0x398] sm:$0xff]  ;;  %v1612_v36 = vld [vmem:[#allocation10 + $0xfb0] sm:$0xff]  ;;  %v4627_v6 = vrot.slane %v4621_v32, %v4549_v50 }
 0x19e   :  { %2317 = vmatprep.subr.mxu0 %v1499_v38  ;;  %2421 = vmatprep.subr.mxu1 %v535_v39  ;;  %v648_v37 = vld [vmem:[#allocation9 + $0x390] sm:$0xff]  ;;  %v1607_v38 = vld [vmem:[#allocation10 + $0xf88] sm:$0xff] }
 0x19f   :  { %2318 = vmatpush1.msra.mxu0 %v1498_v40  ;;  %2422 = vmatpush1.msra.mxu1 %v534_v41  ;;  %v643_v39 = vld [vmem:[#allocation9 + $0x368] sm:$0xff]  ;;  %v4623_v40 = vpop.f32.mrf.mxu0  ;;  %v1606_v41 = vld [vmem:[#allocation10 + $0xf80] sm:$0xff] }
 0x1a0   :  { %2319 = vmatprep.subr.mxu0 %v1685_v42  ;;  %2423 = vmatprep.subr.mxu1 %v721_v24  ;;  %v642_v42 = vld [vmem:[#allocation9 + $0x360] sm:$0xff]  ;;  %v1601_v24 = vld [vmem:[#allocation10 + $0xf58] sm:$0xff] }
 0x1a1   :  { %2320 = vmatpush2.msra.mxu0 %v1684_v43  ;;  %2424 = vmatpush2.msra.mxu1 %v720_v44  ;;  %v637_v43 = vld [vmem:[#allocation9 + $0x338] sm:$0xff]  ;;  %v1600_v44 = vld [vmem:[#allocation10 + $0xf50] sm:$0xff] }
 0x1a2   :  { %2321 = vmatprep.subr.mxu0 %v1679_v27  ;;  %2425 = vmatprep.subr.mxu1 %v715_v45  ;;  %v636_v27 = vld [vmem:[#allocation9 + $0x330] sm:$0xff] }
 0x1a3   :  { %2322 = vmatpush2.msra.mxu0 %v1678_v22  ;;  %2426 = vmatpush2.msra.mxu1 %v714_v25  ;;  %v1595_v22 = vld [vmem:[#allocation10 + $0xf28] sm:$0xff] }
 0x1a4   :  { %2323 = vmatprep.subr.mxu0 %v1673_v46  ;;  %2427 = vmatprep.subr.mxu1 %v709_v47  ;;  %v631_v25 = vld [vmem:[#allocation9 + $0x308] sm:$0xff]  ;;  %v1594_v47 = vld [vmem:[#allocation10 + $0xf20] sm:$0xff] }
 0x1a5   :  { %2324 = vmatpush2.msra.mxu0 %v1672_v48  ;;  %2428 = vmatpush2.msra.mxu1 %v708_v49  ;;  %v4634_v48 = vcombine.high %v4627_v6, %v4627_v6  ;;  %v630_v49 = vld [vmem:[#allocation9 + $0x300] sm:$0xff] }
 0x1a6   :  { %2325 = vmatprep.subr.mxu0 %v1667_v51  ;;  %2429 = vmatprep.subr.mxu1 %v703_v52  ;;  %v817_v51 = vld [vmem:[#allocation9 + $0x8d8] sm:$0xff] }
 0x1a7   :  { %2326 = vmatpush2.msra.mxu0 %v1666_v53  ;;  %2430 = vmatpush2.msra.mxu1 %v702_v54  ;;  %v1009_v52 = vld [vmem:[#allocation9 + $0xed8] sm:$0xff]  ;;  %v1008_v53 = vld [vmem:[#allocation9 + $0xed0] sm:$0xff]  ;;  %v811_v54 = vld [vmem:[#allocation9 + $0x8a8] sm:$0xff] }
 0x1a8   :  { %2327 = vmatprep.subr.mxu0 %v1661_v55  ;;  %2431 = vmatprep.subr.mxu1 %v697_v56  ;;  %v1003_v55 = vld [vmem:[#allocation9 + $0xea8] sm:$0xff]  ;;  %v810_v56 = vld [vmem:[#allocation9 + $0x8a0] sm:$0xff] }
 0x1a9   :  { %2328 = vmatpush2.msra.mxu0 %v1660_v57  ;;  %2432 = vmatpush2.msra.mxu1 %v696_v58  ;;  %v1002_v57 = vld [vmem:[#allocation9 + $0xea0] sm:$0xff]  ;;  %v997_v58 = vld [vmem:[#allocation9 + $0xe78] sm:$0xff] }
 0x1aa   :  { %2329 = vmatprep.subr.mxu0 %v1655_v59  ;;  %2433 = vmatprep.subr.mxu1 %v691_v60  ;;  %v804_v59 = vld [vmem:[#allocation9 + $0x870] sm:$0xff] }
 0x1ab   :  { %2330 = vmatpush2.msra.mxu0 %v1654_v61  ;;  %2434 = vmatpush2.msra.mxu1 %v690_v62  ;;  %v996_v60 = vld [vmem:[#allocation9 + $0xe70] sm:$0xff]  ;;  %v799_v61 = vld [vmem:[#allocation9 + $0x848] sm:$0xff]  ;;  %v798_v62 = vld [vmem:[#allocation9 + $0x840] sm:$0xff] }
 0x1ac   :  { %2331 = vmatprep.subr.mxu0 %v1649_v63  ;;  %2435 = vmatprep.subr.mxu1 %v685_v1  ;;  %v990_v63 = vld [vmem:[#allocation9 + $0xe40] sm:$0xff]  ;;  %v793_v1 = vld [vmem:[#allocation9 + $0x818] sm:$0xff] }
 0x1ad   :  { %2332 = vmatpush2.msra.mxu0 %v1648_v2  ;;  %2436 = vmatpush2.msra.mxu1 %v684_v3  ;;  %v985_v2 = vld [vmem:[#allocation9 + $0xe18] sm:$0xff]  ;;  %v792_v3 = vld [vmem:[#allocation9 + $0x810] sm:$0xff] }
 0x1ae   :  { %2333 = vmatprep.subr.mxu0 %v1643_v4  ;;  %2437 = vmatprep.subr.mxu1 %v679_v5  ;;  %v984_v4 = vld [vmem:[#allocation9 + $0xe10] sm:$0xff]  ;;  %v787_v5 = vld [vmem:[#allocation9 + $0x7e8] sm:$0xff] }
 0x1af   :  { %2334 = vmatpush2.msra.mxu0 %v1642_v7  ;;  %2438 = vmatpush2.msra.mxu1 %v678_v8  ;;  %v979_v7 = vld [vmem:[#allocation9 + $0xde8] sm:$0xff]  ;;  %v786_v8 = vld [vmem:[#allocation9 + $0x7e0] sm:$0xff] }
 0x1b0   :  { %2335 = vmatprep.subr.mxu0 %v1637_v10  ;;  %2439 = vmatprep.subr.mxu1 %v673_v11  ;;  %v978_v10 = vld [vmem:[#allocation9 + $0xde0] sm:$0xff]  ;;  %v781_v11 = vld [vmem:[#allocation9 + $0x7b8] sm:$0xff] }
 0x1b1   :  { %2336 = vmatpush2.msra.mxu0 %v1636_v12  ;;  %2440 = vmatpush2.msra.mxu1 %v672_v13  ;;  %v973_v12 = vld [vmem:[#allocation9 + $0xdb8] sm:$0xff]  ;;  %v780_v13 = vld [vmem:[#allocation9 + $0x7b0] sm:$0xff] }
 0x1b2   :  { %2337 = vmatprep.subr.mxu0 %v1631_v14  ;;  %2441 = vmatprep.subr.mxu1 %v667_v15  ;;  %v972_v14 = vld [vmem:[#allocation9 + $0xdb0] sm:$0xff]  ;;  %v775_v15 = vld [vmem:[#allocation9 + $0x788] sm:$0xff] }
 0x1b3   :  { %2338 = vmatpush2.msra.mxu0 %v1630_v16  ;;  %2442 = vmatpush2.msra.mxu1 %v666_v17  ;;  %v967_v16 = vld [vmem:[#allocation9 + $0xd88] sm:$0xff]  ;;  %v774_v17 = vld [vmem:[#allocation9 + $0x780] sm:$0xff] }
 0x1b4   :  { %2339 = vmatprep.subr.mxu0 %v1625_v19  ;;  %2443 = vmatprep.subr.mxu1 %v661_v20  ;;  %v966_v19 = vld [vmem:[#allocation9 + $0xd80] sm:$0xff]  ;;  %v769_v20 = vld [vmem:[#allocation9 + $0x758] sm:$0xff] }
 0x1b5   :  { %2340 = vmatpush2.msra.mxu0 %v1624_v21  ;;  %2444 = vmatpush2.msra.mxu1 %v660_v23  ;;  %v961_v21 = vld [vmem:[#allocation9 + $0xd58] sm:$0xff]  ;;  %v768_v23 = vld [vmem:[#allocation9 + $0x750] sm:$0xff] }
 0x1b6   :  { %2341 = vmatprep.subr.mxu0 %v1619_v26  ;;  %2445 = vmatprep.subr.mxu1 %v655_v28  ;;  %v960_v26 = vld [vmem:[#allocation9 + $0xd50] sm:$0xff]  ;;  %v763_v28 = vld [vmem:[#allocation9 + $0x728] sm:$0xff] }
 0x1b7   :  { %2342 = vmatpush2.msra.mxu0 %v1618_v29  ;;  %2446 = vmatpush2.msra.mxu1 %v654_v30  ;;  %v955_v29 = vld [vmem:[#allocation9 + $0xd28] sm:$0xff]  ;;  %v762_v30 = vld [vmem:[#allocation9 + $0x720] sm:$0xff] }
 0x1b8   :  { %2343 = vmatprep.subr.mxu0 %v1613_v33  ;;  %2447 = vmatprep.subr.mxu1 %v649_v35  ;;  %v954_v33 = vld [vmem:[#allocation9 + $0xd20] sm:$0xff]  ;;  %v757_v35 = vld [vmem:[#allocation9 + $0x6f8] sm:$0xff] }
 0x1b9   :  { %2344 = vmatpush2.msra.mxu0 %v1612_v36  ;;  %2448 = vmatpush2.msra.mxu1 %v648_v37  ;;  %v949_v36 = vld [vmem:[#allocation9 + $0xcf8] sm:$0xff]  ;;  %v756_v37 = vld [vmem:[#allocation9 + $0x6f0] sm:$0xff] }
 0x1ba   :  { %2345 = vmatprep.subr.mxu0 %v1607_v38  ;;  %2449 = vmatprep.subr.mxu1 %v643_v39  ;;  %v1927_v45 = vpop.f32.mrf.mxu0  ;;  %v948_v38 = vld [vmem:[#allocation9 + $0xcf0] sm:$0xff]  ;;  %v751_v39 = vld [vmem:[#allocation9 + $0x6c8] sm:$0xff] }
 0x1bb   :  { %2346 = vmatpush2.msra.mxu0 %v1606_v41  ;;  %2450 = vmatpush2.msra.mxu1 %v642_v42  ;;  %v4630_v46 = vadd.f32 %v1927_v45, %v4614_v34  ;;  %v816_v34 = vld [vmem:[#allocation9 + $0x8d0] sm:$0xff]  ;;  %v943_v41 = vld [vmem:[#allocation9 + $0xcc8] sm:$0xff]  ;;  %v750_v42 = vld [vmem:[#allocation9 + $0x6c0] sm:$0xff] }
 0x1bc   :  { %2347 = vmatprep.subr.mxu0 %v1601_v24  ;;  %2451 = vmatprep.subr.mxu1 %v637_v43  ;;  %v942_v24 = vld [vmem:[#allocation9 + $0xcc0] sm:$0xff]  ;;  %v745_v43 = vld [vmem:[#allocation9 + $0x698] sm:$0xff]  ;;  %v936_v45 = vld [vmem:[#allocation9 + $0xc90] sm:$0xff] }
 0x1bd   :  { %2348 = vmatpush2.msra.mxu0 %v1600_v44  ;;  %2452 = vmatpush2.msra.mxu1 %v636_v27  ;;  %v937_v44 = vld [vmem:[#allocation9 + $0xc98] sm:$0xff]  ;;  %v744_v27 = vld [vmem:[#allocation9 + $0x690] sm:$0xff] }
 0x1be   :  { %2349 = vmatprep.subr.mxu0 %v1595_v22  ;;  %2453 = vmatprep.subr.mxu1 %v631_v25  ;;  %v739_v22 = vld [vmem:[#allocation9 + $0x668] sm:$0xff] }
 0x1bf   :  { %2350 = vmatpush2.msra.mxu0 %v1594_v47  ;;  %2351 = vmatprep.mubr.f32.mxu0 %v4588_v18  ;;  %v805_v18 = vld [vmem:[#allocation9 + $0x878] sm:$0xff]  ;;  %v931_v25 = vld [vmem:[#allocation9 + $0xc68] sm:$0xff]  ;;  %v738_v47 = vld [vmem:[#allocation9 + $0x660] sm:$0xff] }
 0x1c0   :  { %2454 = vmatpush2.msra.mxu1 %v630_v49  ;;  %2455 = vmatprep.mubr.f32.mxu1 %v4634_v48  ;;  %v930_v49 = vld [vmem:[#allocation9 + $0xc60] sm:$0xff] }
 0x1c1   :  { %2352 = vmatmul.mubr.f32.vlgmr.msra.gmra.mxu0 %v4584_v9  ;;  %2456 = vmatmul.mubr.f32.vlgmr.msra.gmra.mxu1 %v4627_v6  ;;  %v991_v9 = vld [vmem:[#allocation9 + $0xe48] sm:$0xff] }
 0x1c2   :  { %2462 = vmatprep.subr.mxu0 %v817_v51  ;;  %2533 = vmatprep.subr.mxu1 %v1009_v52  ;;  %v733_v51 = vld [vmem:[#allocation9 + $0x638] sm:$0xff] }
 0x1c3   :  { %2463 = vmatpush1.msra.mxu0 %v816_v34  ;;  %2534 = vmatpush1.msra.mxu1 %v1008_v53  ;;  %v925_v52 = vld [vmem:[#allocation9 + $0xc38] sm:$0xff]  ;;  %v732_v34 = vld [vmem:[#allocation9 + $0x630] sm:$0xff] }
 0x1c4   :  { %2464 = vmatprep.subr.mxu0 %v811_v54  ;;  %2535 = vmatprep.subr.mxu1 %v1003_v55  ;;  %v924_v53 = vld [vmem:[#allocation9 + $0xc30] sm:$0xff]  ;;  %v727_v54 = vld [vmem:[#allocation9 + $0x608] sm:$0xff] }
 0x1c5   :  { %2465 = vmatpush1.msra.mxu0 %v810_v56  ;;  %2536 = vmatpush1.msra.mxu1 %v1002_v57  ;;  %v919_v55 = vld [vmem:[#allocation9 + $0xc08] sm:$0xff]  ;;  %v726_v56 = vld [vmem:[#allocation9 + $0x600] sm:$0xff] }
 0x1c6   :  { %2466 = vmatprep.subr.mxu0 %v805_v18  ;;  %2537 = vmatprep.subr.mxu1 %v997_v58  ;;  %v918_v57 = vld [vmem:[#allocation9 + $0xc00] sm:$0xff]  ;;  %v913_v18 = vld [vmem:[#allocation9 + $0xbd8] sm:$0xff] }
 0x1c7   :  { %2467 = vmatpush1.msra.mxu0 %v804_v59  ;;  %2538 = vmatpush1.msra.mxu1 %v996_v60  ;;  %v1105_v58 = vld [vmem:[#allocation9 + $0x11d8] sm:$0xff]  ;;  %v912_v59 = vld [vmem:[#allocation9 + $0xbd0] sm:$0xff] }
 0x1c8   :  { %2468 = vmatprep.subr.mxu0 %v799_v61  ;;  %2539 = vmatprep.subr.mxu1 %v991_v9  ;;  %v1104_v60 = vld [vmem:[#allocation9 + $0x11d0] sm:$0xff]  ;;  %v907_v61 = vld [vmem:[#allocation9 + $0xba8] sm:$0xff] }
 0x1c9   :  { %2469 = vmatpush1.msra.mxu0 %v798_v62  ;;  %2540 = vmatpush1.msra.mxu1 %v990_v63  ;;  %v1099_v9 = vld [vmem:[#allocation9 + $0x11a8] sm:$0xff]  ;;  %v906_v62 = vld [vmem:[#allocation9 + $0xba0] sm:$0xff] }
 0x1ca   :  { %2470 = vmatprep.subr.mxu0 %v793_v1  ;;  %2541 = vmatprep.subr.mxu1 %v985_v2  ;;  %v1098_v63 = vld [vmem:[#allocation9 + $0x11a0] sm:$0xff]  ;;  %v901_v1 = vld [vmem:[#allocation9 + $0xb78] sm:$0xff] }
 0x1cb   :  { %2471 = vmatpush1.msra.mxu0 %v792_v3  ;;  %2542 = vmatpush1.msra.mxu1 %v984_v4  ;;  %v1093_v2 = vld [vmem:[#allocation9 + $0x1178] sm:$0xff]  ;;  %v900_v3 = vld [vmem:[#allocation9 + $0xb70] sm:$0xff] }
 0x1cc   :  { %2472 = vmatprep.subr.mxu0 %v787_v5  ;;  %2543 = vmatprep.subr.mxu1 %v979_v7  ;;  %v1092_v4 = vld [vmem:[#allocation9 + $0x1170] sm:$0xff]  ;;  %v895_v5 = vld [vmem:[#allocation9 + $0xb48] sm:$0xff] }
 0x1cd   :  { %2473 = vmatpush1.msra.mxu0 %v786_v8  ;;  %2544 = vmatpush1.msra.mxu1 %v978_v10  ;;  %v1087_v7 = vld [vmem:[#allocation9 + $0x1148] sm:$0xff]  ;;  %v894_v8 = vld [vmem:[#allocation9 + $0xb40] sm:$0xff] }
 0x1ce   :  { %2474 = vmatprep.subr.mxu0 %v781_v11  ;;  %2545 = vmatprep.subr.mxu1 %v973_v12  ;;  %v1086_v10 = vld [vmem:[#allocation9 + $0x1140] sm:$0xff]  ;;  %v889_v11 = vld [vmem:[#allocation9 + $0xb18] sm:$0xff] }
 0x1cf   :  { %2475 = vmatpush1.msra.mxu0 %v780_v13  ;;  %2546 = vmatpush1.msra.mxu1 %v972_v14  ;;  %v1081_v12 = vld [vmem:[#allocation9 + $0x1118] sm:$0xff]  ;;  %v888_v13 = vld [vmem:[#allocation9 + $0xb10] sm:$0xff] }
 0x1d0   :  { %2476 = vmatprep.subr.mxu0 %v775_v15  ;;  %2547 = vmatprep.subr.mxu1 %v967_v16  ;;  %v1080_v14 = vld [vmem:[#allocation9 + $0x1110] sm:$0xff]  ;;  %v883_v15 = vld [vmem:[#allocation9 + $0xae8] sm:$0xff] }
 0x1d1   :  { %2477 = vmatpush1.msra.mxu0 %v774_v17  ;;  %2548 = vmatpush1.msra.mxu1 %v966_v19  ;;  %v1075_v16 = vld [vmem:[#allocation9 + $0x10e8] sm:$0xff]  ;;  %v882_v17 = vld [vmem:[#allocation9 + $0xae0] sm:$0xff] }
 0x1d2   :  { %2478 = vmatprep.subr.mxu0 %v769_v20  ;;  %2549 = vmatprep.subr.mxu1 %v961_v21  ;;  %v1074_v19 = vld [vmem:[#allocation9 + $0x10e0] sm:$0xff]  ;;  %v877_v20 = vld [vmem:[#allocation9 + $0xab8] sm:$0xff] }
 0x1d3   :  { %2479 = vmatpush1.msra.mxu0 %v768_v23  ;;  %2550 = vmatpush1.msra.mxu1 %v960_v26  ;;  %v1069_v21 = vld [vmem:[#allocation9 + $0x10b8] sm:$0xff]  ;;  %v876_v23 = vld [vmem:[#allocation9 + $0xab0] sm:$0xff] }
 0x1d4   :  { %2480 = vmatprep.subr.mxu0 %v763_v28  ;;  %2551 = vmatprep.subr.mxu1 %v955_v29  ;;  %v1068_v26 = vld [vmem:[#allocation9 + $0x10b0] sm:$0xff]  ;;  %v871_v28 = vld [vmem:[#allocation9 + $0xa88] sm:$0xff] }
 0x1d5   :  { %2481 = vmatpush1.msra.mxu0 %v762_v30  ;;  %2552 = vmatpush1.msra.mxu1 %v954_v33  ;;  %v1063_v29 = vld [vmem:[#allocation9 + $0x1088] sm:$0xff]  ;;  %v870_v30 = vld [vmem:[#allocation9 + $0xa80] sm:$0xff] }
 0x1d6   :  { %2482 = vmatprep.subr.mxu0 %v757_v35  ;;  %2553 = vmatprep.subr.mxu1 %v949_v36  ;;  %v1062_v33 = vld [vmem:[#allocation9 + $0x1080] sm:$0xff]  ;;  %v865_v35 = vld [vmem:[#allocation9 + $0xa58] sm:$0xff] }
 0x1d7   :  { %2483 = vmatpush1.msra.mxu0 %v756_v37  ;;  %2554 = vmatpush1.msra.mxu1 %v948_v38  ;;  %v1057_v36 = vld [vmem:[#allocation9 + $0x1058] sm:$0xff]  ;;  %v864_v37 = vld [vmem:[#allocation9 + $0xa50] sm:$0xff] }
 0x1d8   :  { %2484 = vmatprep.subr.mxu0 %v751_v39  ;;  %2555 = vmatprep.subr.mxu1 %v943_v41  ;;  %v1056_v38 = vld [vmem:[#allocation9 + $0x1050] sm:$0xff]  ;;  %v859_v39 = vld [vmem:[#allocation9 + $0xa28] sm:$0xff] }
 0x1d9   :  { %2485 = vmatpush1.msra.mxu0 %v750_v42  ;;  %2556 = vmatpush1.msra.mxu1 %v942_v24  ;;  %v1051_v41 = vld [vmem:[#allocation9 + $0x1028] sm:$0xff]  ;;  %v858_v42 = vld [vmem:[#allocation9 + $0xa20] sm:$0xff] }
 0x1da   :  { %2486 = vmatprep.subr.mxu0 %v745_v43  ;;  %2557 = vmatprep.subr.mxu1 %v937_v44  ;;  %v1050_v24 = vld [vmem:[#allocation9 + $0x1020] sm:$0xff]  ;;  %v853_v43 = vld [vmem:[#allocation9 + $0x9f8] sm:$0xff] }
 0x1db   :  { %2487 = vmatpush1.msra.mxu0 %v744_v27  ;;  %2558 = vmatpush1.msra.mxu1 %v936_v45  ;;  %v1045_v44 = vld [vmem:[#allocation9 + $0xff8] sm:$0xff]  ;;  %v852_v27 = vld [vmem:[#allocation9 + $0x9f0] sm:$0xff] }
 0x1dc   :  { %2488 = vmatprep.subr.mxu0 %v739_v22  ;;  %2559 = vmatprep.subr.mxu1 %v931_v25  ;;  %v1044_v45 = vld [vmem:[#allocation9 + $0xff0] sm:$0xff]  ;;  %v531_v22 = vld [vmem:[#allocation3 + $0x8] sm:$0xf]  ;;  %v847_v25 = vld [vmem:[#allocation9 + $0x9c8] sm:$0xff] }
 0x1dd   :  { %2489 = vmatpush1.msra.mxu0 %v738_v47  ;;  %2560 = vmatpush1.msra.mxu1 %v930_v49  ;;  %v1039_v47 = vld [vmem:[#allocation9 + $0xfc8] sm:$0xff]  ;;  %v2360_v49 = vcombine.high %v4621_v32, %v4621_v32 }
 0x1de   :  { %2490 = vmatprep.subr.mxu0 %v733_v51  ;;  %2561 = vmatprep.subr.mxu1 %v925_v52  ;;  %v4642_v51 = vpop.f32.mrf.mxu1  ;;  %v846_v52 = vld [vmem:[#allocation9 + $0x9c0] sm:$0xff]  ;;  %v1027_v32 = vld [vmem:[#allocation9 + $0xf68] sm:$0xff] }
 0x1df   :  { %2491 = vmatpush1.msra.mxu0 %v732_v34  ;;  %2562 = vmatpush1.msra.mxu1 %v924_v53  ;;  %v1038_v34 = vld [vmem:[#allocation9 + $0xfc0] sm:$0xff]  ;;  %v841_v53 = vld [vmem:[#allocation9 + $0x998] sm:$0xff] }
 0x1e0   :  { %2492 = vmatprep.subr.mxu0 %v727_v54  ;;  %2563 = vmatprep.subr.mxu1 %v919_v55  ;;  %v1033_v54 = vld [vmem:[#allocation9 + $0xf98] sm:$0xff]  ;;  %v533_v55 = vmul.f32 0.0625, %v531_v22  ;;  %v794_v22 = vld [vmem:[#allocation9 + $0x820] sm:$0xff] }
 0x1e1   :  { %2493 = vmatpush1.msra.mxu0 %v726_v56  ;;  %2564 = vmatpush1.msra.mxu1 %v918_v57  ;;  %v1998_v56 = vpop.f32.mrf.mxu1  ;;  %v840_v57 = vld [vmem:[#allocation9 + $0x990] sm:$0xff] }
 0x1e2   :  { %2494 = vmatprep.subr.mxu0 %v913_v18  ;;  %2565 = vmatprep.subr.mxu1 %v1105_v58  ;;  %v1032_v18 = vld [vmem:[#allocation9 + $0xf90] sm:$0xff]  ;;  %v835_v58 = vld [vmem:[#allocation9 + $0x968] sm:$0xff] }
 0x1e3   :  { %2495 = vmatpush2.msra.mxu0 %v912_v59  ;;  %2566 = vmatpush2.msra.mxu1 %v1104_v60  ;;  %v4645_v59 = vrot.slane %v2360_v49, %v4549_v50  ;;  %v4647_v60 = vpop.f32.mrf.mxu0  ;;  %v596_v49 = vld [vmem:[#allocation9 + $0x1f0] sm:$0xff] }
 0x1e4   :  { %2496 = vmatprep.subr.mxu0 %v907_v61  ;;  %2567 = vmatprep.subr.mxu1 %v1099_v9  ;;  %v834_v61 = vld [vmem:[#allocation9 + $0x960] sm:$0xff] }
 0x1e5   :  { %2497 = vmatpush2.msra.mxu0 %v906_v62  ;;  %2568 = vmatpush2.msra.mxu1 %v1098_v63  ;;  %v1026_v9 = vld [vmem:[#allocation9 + $0xf60] sm:$0xff]  ;;  %v829_v62 = vld [vmem:[#allocation9 + $0x938] sm:$0xff] }
 0x1e6   :  { %2498 = vmatprep.subr.mxu0 %v901_v1  ;;  %2569 = vmatprep.subr.mxu1 %v1093_v2  ;;  %v1021_v63 = vld [vmem:[#allocation9 + $0xf38] sm:$0xff]  ;;  %v4650_v1 = vrot.slane %v533_v55, %v4549_v50  ;;  %v2000_v2 = vpop.f32.mrf.mxu1  ;;  %v782_v55 = vld [vmem:[#allocation9 + $0x7c0] sm:$0xff] }
 0x1e7   :  { %2499 = vmatpush2.msra.mxu0 %v900_v3  ;;  %2570 = vmatpush2.msra.mxu1 %v1092_v4  ;;  %v828_v3 = vld [vmem:[#allocation9 + $0x930] sm:$0xff] }
 0x1e8   :  { %2500 = vmatprep.subr.mxu0 %v895_v5  ;;  %2571 = vmatprep.subr.mxu1 %v1087_v7  ;;  %v1020_v4 = vld [vmem:[#allocation9 + $0xf30] sm:$0xff]  ;;  %v823_v7 = vld [vmem:[#allocation9 + $0x908] sm:$0xff] }
 0x1e9   :  { %2501 = vmatpush2.msra.mxu0 %v894_v8  ;;  %2572 = vmatpush2.msra.mxu1 %v1086_v10  ;;  %v1015_v8 = vld [vmem:[#allocation9 + $0xf08] sm:$0xff]  ;;  %v4654_v10 = vcombine.high %v4645_v59, %v4645_v59 }
 0x1ea   :  { %2502 = vmatprep.subr.mxu0 %v889_v11  ;;  %2573 = vmatprep.subr.mxu1 %v1081_v12  ;;  %v822_v12 = vld [vmem:[#allocation9 + $0x900] sm:$0xff] }
 0x1eb   :  { %2503 = vmatpush2.msra.mxu0 %v888_v13  ;;  %2574 = vmatpush2.msra.mxu1 %v1080_v14  ;;  %v1014_v14 = vld [vmem:[#allocation9 + $0xf00] sm:$0xff] }
 0x1ec   :  { %2504 = vmatprep.subr.mxu0 %v883_v15  ;;  %2575 = vmatprep.subr.mxu1 %v1075_v16  ;;  %v4658_v15 = vcombine.high %v4650_v1, %v4650_v1 }
 0x1ed   :  { %2505 = vmatpush2.msra.mxu0 %v882_v17  ;;  %2576 = vmatpush2.msra.mxu1 %v1074_v19  ;;  %v627_v19 = vld [vmem:[#allocation9 + $0x2e8] sm:$0xff] }
 0x1ee   :  { %2506 = vmatprep.subr.mxu0 %v877_v20  ;;  %2577 = vmatprep.subr.mxu1 %v1069_v21  ;;  %v819_v21 = vld [vmem:[#allocation9 + $0x8e8] sm:$0xff] }
 0x1ef   :  { %2507 = vmatpush2.msra.mxu0 %v876_v23  ;;  %2578 = vmatpush2.msra.mxu1 %v1068_v26  ;;  %v626_v26 = vld [vmem:[#allocation9 + $0x2e0] sm:$0xff] }
 0x1f0   :  { %2508 = vmatprep.subr.mxu0 %v871_v28  ;;  %2579 = vmatprep.subr.mxu1 %v1063_v29  ;;  %v818_v28 = vld [vmem:[#allocation9 + $0x8e0] sm:$0xff]  ;;  %v621_v29 = vld [vmem:[#allocation9 + $0x2b8] sm:$0xff] }
 0x1f1   :  { %2509 = vmatpush2.msra.mxu0 %v870_v30  ;;  %2580 = vmatpush2.msra.mxu1 %v1062_v33  ;;  %v813_v30 = vld [vmem:[#allocation9 + $0x8b8] sm:$0xff]  ;;  %v620_v33 = vld [vmem:[#allocation9 + $0x2b0] sm:$0xff] }
 0x1f2   :  { %2510 = vmatprep.subr.mxu0 %v865_v35  ;;  %2581 = vmatprep.subr.mxu1 %v1057_v36  ;;  %v812_v35 = vld [vmem:[#allocation9 + $0x8b0] sm:$0xff]  ;;  %v615_v36 = vld [vmem:[#allocation9 + $0x288] sm:$0xff] }
 0x1f3   :  { %2511 = vmatpush2.msra.mxu0 %v864_v37  ;;  %2582 = vmatpush2.msra.mxu1 %v1056_v38  ;;  %v807_v37 = vld [vmem:[#allocation9 + $0x888] sm:$0xff]  ;;  %v614_v38 = vld [vmem:[#allocation9 + $0x280] sm:$0xff] }
 0x1f4   :  { %2512 = vmatprep.subr.mxu0 %v859_v39  ;;  %2583 = vmatprep.subr.mxu1 %v1051_v41  ;;  %v806_v39 = vld [vmem:[#allocation9 + $0x880] sm:$0xff]  ;;  %v609_v41 = vld [vmem:[#allocation9 + $0x258] sm:$0xff] }
 0x1f5   :  { %2513 = vmatpush2.msra.mxu0 %v858_v42  ;;  %2584 = vmatpush2.msra.mxu1 %v1050_v24  ;;  %v801_v42 = vld [vmem:[#allocation9 + $0x858] sm:$0xff]  ;;  %v608_v24 = vld [vmem:[#allocation9 + $0x250] sm:$0xff] }
 0x1f6   :  { %2514 = vmatprep.subr.mxu0 %v853_v43  ;;  %2585 = vmatprep.subr.mxu1 %v1045_v44  ;;  %v800_v43 = vld [vmem:[#allocation9 + $0x850] sm:$0xff]  ;;  %v603_v44 = vld [vmem:[#allocation9 + $0x228] sm:$0xff] }
 0x1f7   :  { %2515 = vmatpush2.msra.mxu0 %v852_v27  ;;  %2586 = vmatpush2.msra.mxu1 %v1044_v45  ;;  %v795_v27 = vld [vmem:[#allocation9 + $0x828] sm:$0xff]  ;;  %v602_v45 = vld [vmem:[#allocation9 + $0x220] sm:$0xff] }
 0x1f8   :  { %2516 = vmatprep.subr.mxu0 %v847_v25  ;;  %2587 = vmatprep.subr.mxu1 %v1039_v47  ;;  %v597_v25 = vld [vmem:[#allocation9 + $0x1f8] sm:$0xff] }
 0x1f9   :  { %2517 = vmatpush2.msra.mxu0 %v846_v52  ;;  %2588 = vmatpush2.msra.mxu1 %v1038_v34  ;;  %v789_v47 = vld [vmem:[#allocation9 + $0x7f8] sm:$0xff]  ;;  %v788_v52 = vld [vmem:[#allocation9 + $0x7f0] sm:$0xff]  ;;  %v591_v34 = vld [vmem:[#allocation9 + $0x1c8] sm:$0xff] }
 0x1fa   :  { %2518 = vmatprep.subr.mxu0 %v841_v53  ;;  %2589 = vmatprep.subr.mxu1 %v1033_v54  ;;  %v783_v53 = vld [vmem:[#allocation9 + $0x7c8] sm:$0xff]  ;;  %v590_v54 = vld [vmem:[#allocation9 + $0x1c0] sm:$0xff] }
 0x1fb   :  { %2519 = vmatpush2.msra.mxu0 %v840_v57  ;;  %2590 = vmatpush2.msra.mxu1 %v1032_v18  ;;  %v777_v57 = vld [vmem:[#allocation9 + $0x798] sm:$0xff]  ;;  %v584_v18 = vld [vmem:[#allocation9 + $0x190] sm:$0xff] }
 0x1fc   :  { %2520 = vmatprep.subr.mxu0 %v835_v58  ;;  %2591 = vmatprep.subr.mxu1 %v1027_v32  ;;  %v2069_v5 = vpop.f32.mrf.mxu0  ;;  %v776_v58 = vld [vmem:[#allocation9 + $0x790] sm:$0xff]  ;;  %v579_v32 = vld [vmem:[#allocation9 + $0x168] sm:$0xff] }
 0x1fd   :  { %2521 = vmatpush2.msra.mxu0 %v834_v61  ;;  %2592 = vmatpush2.msra.mxu1 %v1026_v9  ;;  %v2070_v11 = vadd.f32 %v2069_v5, %v1998_v56  ;;  %v585_v56 = vld [vmem:[#allocation9 + $0x198] sm:$0xff]  ;;  %v771_v61 = vld [vmem:[#allocation9 + $0x768] sm:$0xff]  ;;  %v578_v9 = vld [vmem:[#allocation9 + $0x160] sm:$0xff] }
 0x1fe   :  { %2522 = vmatprep.subr.mxu0 %v829_v62  ;;  %2593 = vmatprep.subr.mxu1 %v1021_v63  ;;  %v2140_v50 = vpop.f32.mrf.mxu1  ;;  %v2071_v13 = vpop.f32.mrf.mxu0  ;;  %v770_v62 = vld [vmem:[#allocation9 + $0x760] sm:$0xff]  ;;  %v573_v63 = vld [vmem:[#allocation9 + $0x138] sm:$0xff]  ;;  %v567_v5 = vld [vmem:[#allocation9 + $0x108] sm:$0xff] }
 0x1ff   :  { %2523 = vmatpush2.msra.mxu0 %v828_v3  ;;  %2594 = vmatpush2.msra.mxu1 %v1020_v4  ;;  %v4660_v16 = vadd.f32 %v2140_v50, %v2070_v11  ;;  %v2072_v17 = vadd.f32 %v2071_v13, %v2000_v2  ;;  %v765_v2 = vld [vmem:[#allocation9 + $0x738] sm:$0xff]  ;;  %v572_v3 = vld [vmem:[#allocation9 + $0x130] sm:$0xff]  ;;  %v758_v11 = vld [vmem:[#allocation9 + $0x700] sm:$0xff] }
 0x200   :  { %2524 = vmatprep.subr.mxu0 %v823_v7  ;;  %2595 = vmatprep.subr.mxu1 %v1015_v8  ;;  %v2142_v20 = vpop.f32.mrf.mxu1  ;;  %v764_v4 = vld [vmem:[#allocation9 + $0x730] sm:$0xff]  ;;  %v759_v7 = vld [vmem:[#allocation9 + $0x708] sm:$0xff]  ;;  %v566_v8 = vld [vmem:[#allocation9 + $0x100] sm:$0xff] }
 0x201   :  { %2525 = vmatpush2.msra.mxu0 %v822_v12  ;;  %2526 = vmatprep.mubr.f32.mxu0 %v4654_v10  ;;  %v4663_v23 = vadd.f32 %v2142_v20, %v2072_v17  ;;  %v561_v12 = vld [vmem:[#allocation9 + $0xd8] sm:$0xff]  ;;  %v560_v13 = vld [vmem:[#allocation9 + $0xd0] sm:$0xff]  ;;  %v555_v17 = vld [vmem:[#allocation9 + $0xa8] sm:$0xff] }
 0x202   :  { %2596 = vmatpush2.msra.mxu1 %v1014_v14  ;;  %2527 = vmatmul.mubr.f32.vlgmr.msra.gmra.mxu0 %v4645_v59  ;;  %v753_v50 = vld [vmem:[#allocation9 + $0x6d8] sm:$0xff]  ;;  %v752_v14 = vld [vmem:[#allocation9 + $0x6d0] sm:$0xff]  ;;  %v554_v20 = vld [vmem:[#allocation9 + $0xa0] sm:$0xff] }
 0x203   :  { %2597 = vmatprep.mubr.f32.mxu1 %v4658_v15  ;;  %2604 = vmatprep.subr.mxu0 %v627_v19  ;;  %v747_v19 = vld [vmem:[#allocation9 + $0x6a8] sm:$0xff] }
 0x204   :  { %2675 = vmatprep.subr.mxu1 %v819_v21  ;;  %2598 = vmatmul.mubr.f32.vlgmr.msra.gmra.mxu1 %v4650_v1  ;;  %v746_v21 = vld [vmem:[#allocation9 + $0x6a0] sm:$0xff] }
 0x205   :  { %2605 = vmatpush1.msra.mxu0 %v626_v26  ;;  %2676 = vmatpush1.msra.mxu1 %v818_v28  ;;  %v549_v26 = vld [vmem:[#allocation9 + $0x78] sm:$0xff] }
 0x206   :  { %2606 = vmatprep.subr.mxu0 %v621_v29  ;;  %2677 = vmatprep.subr.mxu1 %v813_v30  ;;  %v741_v28 = vld [vmem:[#allocation9 + $0x678] sm:$0xff]  ;;  %v548_v29 = vld [vmem:[#allocation9 + $0x70] sm:$0xff] }
 0x207   :  { %2607 = vmatpush1.msra.mxu0 %v620_v33  ;;  %2678 = vmatpush1.msra.mxu1 %v812_v35  ;;  %v740_v30 = vld [vmem:[#allocation9 + $0x670] sm:$0xff]  ;;  %v543_v33 = vld [vmem:[#allocation9 + $0x48] sm:$0xff] }
 0x208   :  { %2608 = vmatprep.subr.mxu0 %v615_v36  ;;  %2679 = vmatprep.subr.mxu1 %v807_v37  ;;  %v735_v35 = vld [vmem:[#allocation9 + $0x648] sm:$0xff]  ;;  %v542_v36 = vld [vmem:[#allocation9 + $0x40] sm:$0xff] }
 0x209   :  { %2609 = vmatpush1.msra.mxu0 %v614_v38  ;;  %2680 = vmatpush1.msra.mxu1 %v806_v39  ;;  %v734_v37 = vld [vmem:[#allocation9 + $0x640] sm:$0xff]  ;;  %v537_v38 = vld [vmem:[#allocation9 + $0x18] sm:$0xff] }
 0x20a   :  { %2610 = vmatprep.subr.mxu0 %v609_v41  ;;  %2681 = vmatprep.subr.mxu1 %v801_v42  ;;  %v729_v39 = vld [vmem:[#allocation9 + $0x618] sm:$0xff]  ;;  %v536_v41 = vld [vmem:[#allocation9 + $0x10] sm:$0xff] }
 0x20b   :  { %2611 = vmatpush1.msra.mxu0 %v608_v24  ;;  %2682 = vmatpush1.msra.mxu1 %v800_v43  ;;  %v728_v42 = vld [vmem:[#allocation9 + $0x610] sm:$0xff]  ;;  %v723_v24 = vld [vmem:[#allocation9 + $0x5e8] sm:$0xff] }
 0x20c   :  { %2612 = vmatprep.subr.mxu0 %v603_v44  ;;  %2683 = vmatprep.subr.mxu1 %v795_v27  ;;  %v915_v43 = vld [vmem:[#allocation9 + $0xbe8] sm:$0xff]  ;;  %v722_v44 = vld [vmem:[#allocation9 + $0x5e0] sm:$0xff] }
 0x20d   :  { %2613 = vmatpush1.msra.mxu0 %v602_v45  ;;  %2684 = vmatpush1.msra.mxu1 %v794_v22  ;;  %v914_v27 = vld [vmem:[#allocation9 + $0xbe0] sm:$0xff]  ;;  %v717_v45 = vld [vmem:[#allocation9 + $0x5b8] sm:$0xff] }
 0x20e   :  { %2614 = vmatprep.subr.mxu0 %v597_v25  ;;  %2685 = vmatprep.subr.mxu1 %v789_v47  ;;  %v909_v22 = vld [vmem:[#allocation9 + $0xbb8] sm:$0xff]  ;;  %v716_v25 = vld [vmem:[#allocation9 + $0x5b0] sm:$0xff] }
 0x20f   :  { %2615 = vmatpush1.msra.mxu0 %v596_v49  ;;  %2686 = vmatpush1.msra.mxu1 %v788_v52  ;;  %v908_v47 = vld [vmem:[#allocation9 + $0xbb0] sm:$0xff]  ;;  %v711_v49 = vld [vmem:[#allocation9 + $0x588] sm:$0xff] }
 0x210   :  { %2616 = vmatprep.subr.mxu0 %v591_v34  ;;  %2687 = vmatprep.subr.mxu1 %v783_v53  ;;  %v903_v52 = vld [vmem:[#allocation9 + $0xb88] sm:$0xff]  ;;  %v710_v34 = vld [vmem:[#allocation9 + $0x580] sm:$0xff] }
 0x211   :  { %2617 = vmatpush1.msra.mxu0 %v590_v54  ;;  %2688 = vmatpush1.msra.mxu1 %v782_v55  ;;  %v902_v53 = vld [vmem:[#allocation9 + $0xb80] sm:$0xff]  ;;  %v705_v54 = vld [vmem:[#allocation9 + $0x558] sm:$0xff] }
 0x212   :  { %2618 = vmatprep.subr.mxu0 %v585_v56  ;;  %2689 = vmatprep.subr.mxu1 %v777_v57  ;;  %v897_v55 = vld [vmem:[#allocation9 + $0xb58] sm:$0xff]  ;;  %v704_v56 = vld [vmem:[#allocation9 + $0x550] sm:$0xff] }
 0x213   :  { %2619 = vmatpush1.msra.mxu0 %v584_v18  ;;  %2690 = vmatpush1.msra.mxu1 %v776_v58  ;;  %v896_v57 = vld [vmem:[#allocation9 + $0xb50] sm:$0xff]  ;;  %v699_v18 = vld [vmem:[#allocation9 + $0x528] sm:$0xff] }
 0x214   :  { %2620 = vmatprep.subr.mxu0 %v579_v32  ;;  %2691 = vmatprep.subr.mxu1 %v771_v61  ;;  %v891_v58 = vld [vmem:[#allocation9 + $0xb28] sm:$0xff]  ;;  %v698_v32 = vld [vmem:[#allocation9 + $0x520] sm:$0xff] }
 0x215   :  { %2621 = vmatpush1.msra.mxu0 %v578_v9  ;;  %2692 = vmatpush1.msra.mxu1 %v770_v62  ;;  %v890_v61 = vld [vmem:[#allocation9 + $0xb20] sm:$0xff]  ;;  %v693_v9 = vld [vmem:[#allocation9 + $0x4f8] sm:$0xff] }
 0x216   :  { %2622 = vmatprep.subr.mxu0 %v573_v63  ;;  %2693 = vmatprep.subr.mxu1 %v765_v2  ;;  %v885_v62 = vld [vmem:[#allocation9 + $0xaf8] sm:$0xff]  ;;  %v692_v63 = vld [vmem:[#allocation9 + $0x4f0] sm:$0xff] }
 0x217   :  { %2623 = vmatpush1.msra.mxu0 %v572_v3  ;;  %2694 = vmatpush1.msra.mxu1 %v764_v4  ;;  %v884_v2 = vld [vmem:[#allocation9 + $0xaf0] sm:$0xff]  ;;  %v687_v3 = vld [vmem:[#allocation9 + $0x4c8] sm:$0xff] }
 0x218   :  { %2624 = vmatprep.subr.mxu0 %v567_v5  ;;  %2695 = vmatprep.subr.mxu1 %v759_v7  ;;  %v879_v4 = vld [vmem:[#allocation9 + $0xac8] sm:$0xff]  ;;  %v686_v5 = vld [vmem:[#allocation9 + $0x4c0] sm:$0xff] }
 0x219   :  { %2625 = vmatpush1.msra.mxu0 %v566_v8  ;;  %2696 = vmatpush1.msra.mxu1 %v758_v11  ;;  %v878_v7 = vld [vmem:[#allocation9 + $0xac0] sm:$0xff]  ;;  %v681_v8 = vld [vmem:[#allocation9 + $0x498] sm:$0xff] }
 0x21a   :  { %2626 = vmatprep.subr.mxu0 %v561_v12  ;;  %2697 = vmatprep.subr.mxu1 %v753_v50  ;;  %v873_v11 = vld [vmem:[#allocation9 + $0xa98] sm:$0xff]  ;;  %v680_v12 = vld [vmem:[#allocation9 + $0x490] sm:$0xff] }
 0x21b   :  { %2627 = vmatpush1.msra.mxu0 %v560_v13  ;;  %2698 = vmatpush1.msra.mxu1 %v752_v14  ;;  %v872_v50 = vld [vmem:[#allocation9 + $0xa90] sm:$0xff]  ;;  %v675_v13 = vld [vmem:[#allocation9 + $0x468] sm:$0xff] }
 0x21c   :  { %2628 = vmatprep.subr.mxu0 %v555_v17  ;;  %2699 = vmatprep.subr.mxu1 %v747_v19  ;;  %v867_v14 = vld [vmem:[#allocation9 + $0xa68] sm:$0xff]  ;;  %v674_v17 = vld [vmem:[#allocation9 + $0x460] sm:$0xff] }
 0x21d   :  { %2629 = vmatpush1.msra.mxu0 %v554_v20  ;;  %2700 = vmatpush1.msra.mxu1 %v746_v21  ;;  %v866_v19 = vld [vmem:[#allocation9 + $0xa60] sm:$0xff]  ;;  %v669_v20 = vld [vmem:[#allocation9 + $0x438] sm:$0xff] }
 0x21e   :  { %2630 = vmatprep.subr.mxu0 %v549_v26  ;;  %2701 = vmatprep.subr.mxu1 %v741_v28  ;;  %v861_v21 = vld [vmem:[#allocation9 + $0xa38] sm:$0xff]  ;;  %v668_v26 = vld [vmem:[#allocation9 + $0x430] sm:$0xff] }
 0x21f   :  { %2631 = vmatpush1.msra.mxu0 %v548_v29  ;;  %2702 = vmatpush1.msra.mxu1 %v740_v30  ;;  %v860_v28 = vld [vmem:[#allocation9 + $0xa30] sm:$0xff]  ;;  %v663_v29 = vld [vmem:[#allocation9 + $0x408] sm:$0xff] }
 0x220   :  { %2632 = vmatprep.subr.mxu0 %v543_v33  ;;  %2703 = vmatprep.subr.mxu1 %v735_v35  ;;  %v855_v30 = vld [vmem:[#allocation9 + $0xa08] sm:$0xff]  ;;  %v662_v33 = vld [vmem:[#allocation9 + $0x400] sm:$0xff] }
 0x221   :  { %2633 = vmatpush1.msra.mxu0 %v542_v36  ;;  %2704 = vmatpush1.msra.mxu1 %v734_v37  ;;  %v854_v35 = vld [vmem:[#allocation9 + $0xa00] sm:$0xff]  ;;  %v657_v36 = vld [vmem:[#allocation9 + $0x3d8] sm:$0xff] }
 0x222   :  { %2634 = vmatprep.subr.mxu0 %v537_v38  ;;  %2705 = vmatprep.subr.mxu1 %v729_v39  ;;  %v849_v37 = vld [vmem:[#allocation9 + $0x9d8] sm:$0xff]  ;;  %v656_v38 = vld [vmem:[#allocation9 + $0x3d0] sm:$0xff] }
 0x223   :  { %2635 = vmatpush1.msra.mxu0 %v536_v41  ;;  %2706 = vmatpush1.msra.mxu1 %v728_v42  ;;  %v848_v39 = vld [vmem:[#allocation9 + $0x9d0] sm:$0xff]  ;;  %v651_v41 = vld [vmem:[#allocation9 + $0x3a8] sm:$0xff] }
 0x224   :  { %2636 = vmatprep.subr.mxu0 %v723_v24  ;;  %2707 = vmatprep.subr.mxu1 %v915_v43  ;;  %v843_v42 = vld [vmem:[#allocation9 + $0x9a8] sm:$0xff]  ;;  %v650_v24 = vld [vmem:[#allocation9 + $0x3a0] sm:$0xff] }
 0x225   :  { %2637 = vmatpush2.msra.mxu0 %v722_v44  ;;  %2708 = vmatpush2.msra.mxu1 %v914_v27  ;;  %v842_v43 = vld [vmem:[#allocation9 + $0x9a0] sm:$0xff]  ;;  %v645_v44 = vld [vmem:[#allocation9 + $0x378] sm:$0xff] }
 0x226   :  { %2638 = vmatprep.subr.mxu0 %v717_v45  ;;  %2709 = vmatprep.subr.mxu1 %v909_v22  ;;  %v837_v27 = vld [vmem:[#allocation9 + $0x978] sm:$0xff]  ;;  %v644_v45 = vld [vmem:[#allocation9 + $0x370] sm:$0xff] }
 0x227   :  { %2639 = vmatpush2.msra.mxu0 %v716_v25  ;;  %2710 = vmatpush2.msra.mxu1 %v908_v47  ;;  %v836_v22 = vld [vmem:[#allocation9 + $0x970] sm:$0xff]  ;;  %v639_v25 = vld [vmem:[#allocation9 + $0x348] sm:$0xff] }
 0x228   :  { %2640 = vmatprep.subr.mxu0 %v711_v49  ;;  %2711 = vmatprep.subr.mxu1 %v903_v52  ;;  %v831_v47 = vld [vmem:[#allocation9 + $0x948] sm:$0xff]  ;;  %v638_v49 = vld [vmem:[#allocation9 + $0x340] sm:$0xff] }
 0x229   :  { %2641 = vmatpush2.msra.mxu0 %v710_v34  ;;  %2712 = vmatpush2.msra.mxu1 %v902_v53  ;;  %v830_v52 = vld [vmem:[#allocation9 + $0x940] sm:$0xff]  ;;  %v633_v34 = vld [vmem:[#allocation9 + $0x318] sm:$0xff] }
 0x22a   :  { %2642 = vmatprep.subr.mxu0 %v705_v54  ;;  %2713 = vmatprep.subr.mxu1 %v897_v55  ;;  %v825_v53 = vld [vmem:[#allocation9 + $0x918] sm:$0xff] }
 0x22b   :  { %2643 = vmatpush2.msra.mxu0 %v704_v56  ;;  %2714 = vmatpush2.msra.mxu1 %v896_v57  ;;  %v632_v56 = vld [vmem:[#allocation9 + $0x310] sm:$0xff] }
 0x22c   :  { %2644 = vmatprep.subr.mxu0 %v699_v18  ;;  %2715 = vmatprep.subr.mxu1 %v891_v58  ;;  %v824_v18 = vld [vmem:[#allocation9 + $0x910] sm:$0xff] }
 0x22d   :  { %2645 = vmatpush2.msra.mxu0 %v698_v32  ;;  %2716 = vmatpush2.msra.mxu1 %v890_v61  ;;  %v1011_v61 = vld [vmem:[#allocation9 + $0xee8] sm:$0xff] }
 0x22e   :  { %2646 = vmatprep.subr.mxu0 %v693_v9  ;;  %2717 = vmatprep.subr.mxu1 %v885_v62  ;;  %v629_v62 = vld [vmem:[#allocation9 + $0x2f8] sm:$0xff] }
 0x22f   :  { %2647 = vmatpush2.msra.mxu0 %v692_v63  ;;  %2718 = vmatpush2.msra.mxu1 %v884_v2  ;;  %v1010_v63 = vld [vmem:[#allocation9 + $0xee0] sm:$0xff]  ;;  %v628_v2 = vld [vmem:[#allocation9 + $0x2f0] sm:$0xff] }
 0x230   :  { %2648 = vmatprep.subr.mxu0 %v687_v3  ;;  %2719 = vmatprep.subr.mxu1 %v879_v4  ;;  %v1005_v3 = vld [vmem:[#allocation9 + $0xeb8] sm:$0xff]  ;;  %v623_v4 = vld [vmem:[#allocation9 + $0x2c8] sm:$0xff] }
 0x231   :  { %2649 = vmatpush2.msra.mxu0 %v686_v5  ;;  %2720 = vmatpush2.msra.mxu1 %v878_v7  ;;  %v1004_v5 = vld [vmem:[#allocation9 + $0xeb0] sm:$0xff]  ;;  %v622_v7 = vld [vmem:[#allocation9 + $0x2c0] sm:$0xff] }
 0x232   :  { %2650 = vmatprep.subr.mxu0 %v681_v8  ;;  %2721 = vmatprep.subr.mxu1 %v873_v11  ;;  %v999_v8 = vld [vmem:[#allocation9 + $0xe88] sm:$0xff]  ;;  %v617_v11 = vld [vmem:[#allocation9 + $0x298] sm:$0xff] }
 0x233   :  { %2651 = vmatpush2.msra.mxu0 %v680_v12  ;;  %2722 = vmatpush2.msra.mxu1 %v872_v50  ;;  %v998_v12 = vld [vmem:[#allocation9 + $0xe80] sm:$0xff]  ;;  %v616_v50 = vld [vmem:[#allocation9 + $0x290] sm:$0xff] }
 0x234   :  { %2652 = vmatprep.subr.mxu0 %v675_v13  ;;  %2723 = vmatprep.subr.mxu1 %v867_v14  ;;  %v993_v13 = vld [vmem:[#allocation9 + $0xe58] sm:$0xff]  ;;  %v611_v14 = vld [vmem:[#allocation9 + $0x268] sm:$0xff] }
 0x235   :  { %2653 = vmatpush2.msra.mxu0 %v674_v17  ;;  %2724 = vmatpush2.msra.mxu1 %v866_v19  ;;  %v992_v17 = vld [vmem:[#allocation9 + $0xe50] sm:$0xff]  ;;  %v610_v19 = vld [vmem:[#allocation9 + $0x260] sm:$0xff] }
 0x236   :  { %2654 = vmatprep.subr.mxu0 %v669_v20  ;;  %2725 = vmatprep.subr.mxu1 %v861_v21  ;;  %v987_v20 = vld [vmem:[#allocation9 + $0xe28] sm:$0xff]  ;;  %v605_v21 = vld [vmem:[#allocation9 + $0x238] sm:$0xff] }
 0x237   :  { %2655 = vmatpush2.msra.mxu0 %v668_v26  ;;  %2726 = vmatpush2.msra.mxu1 %v860_v28  ;;  %v986_v26 = vld [vmem:[#allocation9 + $0xe20] sm:$0xff]  ;;  %v604_v28 = vld [vmem:[#allocation9 + $0x230] sm:$0xff] }
 0x238   :  { %2656 = vmatprep.subr.mxu0 %v663_v29  ;;  %2727 = vmatprep.subr.mxu1 %v855_v30  ;;  %v981_v29 = vld [vmem:[#allocation9 + $0xdf8] sm:$0xff]  ;;  %v599_v30 = vld [vmem:[#allocation9 + $0x208] sm:$0xff] }
 0x239   :  { %2657 = vmatpush2.msra.mxu0 %v662_v33  ;;  %2728 = vmatpush2.msra.mxu1 %v854_v35  ;;  %v980_v33 = vld [vmem:[#allocation9 + $0xdf0] sm:$0xff]  ;;  %v598_v35 = vld [vmem:[#allocation9 + $0x200] sm:$0xff] }
 0x23a   :  { %2658 = vmatprep.subr.mxu0 %v657_v36  ;;  %2729 = vmatprep.subr.mxu1 %v849_v37  ;;  %v975_v36 = vld [vmem:[#allocation9 + $0xdc8] sm:$0xff]  ;;  %v593_v37 = vld [vmem:[#allocation9 + $0x1d8] sm:$0xff] }
 0x23b   :  { %2659 = vmatpush2.msra.mxu0 %v656_v38  ;;  %2730 = vmatpush2.msra.mxu1 %v848_v39  ;;  %v974_v38 = vld [vmem:[#allocation9 + $0xdc0] sm:$0xff]  ;;  %v592_v39 = vld [vmem:[#allocation9 + $0x1d0] sm:$0xff] }
 0x23c   :  { %2660 = vmatprep.subr.mxu0 %v651_v41  ;;  %2731 = vmatprep.subr.mxu1 %v843_v42  ;;  %v969_v41 = vld [vmem:[#allocation9 + $0xd98] sm:$0xff]  ;;  %v587_v42 = vld [vmem:[#allocation9 + $0x1a8] sm:$0xff] }
 0x23d   :  { %2661 = vmatpush2.msra.mxu0 %v650_v24  ;;  %2732 = vmatpush2.msra.mxu1 %v842_v43  ;;  %v968_v24 = vld [vmem:[#allocation9 + $0xd90] sm:$0xff]  ;;  %v586_v43 = vld [vmem:[#allocation9 + $0x1a0] sm:$0xff] }
 0x23e   :  { %2662 = vmatprep.subr.mxu0 %v645_v44  ;;  %2733 = vmatprep.subr.mxu1 %v837_v27  ;;  %v963_v44 = vld [vmem:[#allocation9 + $0xd68] sm:$0xff]  ;;  %v581_v27 = vld [vmem:[#allocation9 + $0x178] sm:$0xff] }
 0x23f   :  { %2663 = vmatpush2.msra.mxu0 %v644_v45  ;;  %2734 = vmatpush2.msra.mxu1 %v836_v22  ;;  %v2211_v54 = vpop.f32.mrf.mxu0  ;;  %v2282_v55 = vpop.f32.mrf.mxu1  ;;  %v962_v45 = vld [vmem:[#allocation9 + $0xd60] sm:$0xff]  ;;  %v580_v22 = vld [vmem:[#allocation9 + $0x170] sm:$0xff] }
 0x240   :  { %2664 = vmatprep.subr.mxu0 %v639_v25  ;;  %2735 = vmatprep.subr.mxu1 %v831_v47  ;;  %v4668_v57 = vadd.f32 %v2282_v55, %v2211_v54  ;;  %v957_v25 = vld [vmem:[#allocation9 + $0xd38] sm:$0xff]  ;;  %v575_v47 = vld [vmem:[#allocation9 + $0x148] sm:$0xff]  ;;  %v950_v54 = vld [vmem:[#allocation9 + $0xd00] sm:$0xff] }
 0x241   :  { %2665 = vmatpush2.msra.mxu0 %v638_v49  ;;  %2736 = vmatpush2.msra.mxu1 %v830_v52  ;;  %v2213_v58 = vpop.f32.mrf.mxu0  ;;  %v2284_v32 = vpop.f32.mrf.mxu1  ;;  %v956_v49 = vld [vmem:[#allocation9 + $0xd30] sm:$0xff]  ;;  %v574_v52 = vld [vmem:[#allocation9 + $0x140] sm:$0xff] }
 0x242   :  { %2666 = vmatprep.subr.mxu0 %v633_v34  ;;  %2737 = vmatprep.subr.mxu1 %v825_v53  ;;  %v4670_v9 = vadd.f32 %v2284_v32, %v2213_v58  ;;  %v951_v34 = vld [vmem:[#allocation9 + $0xd08] sm:$0xff]  ;;  %v569_v53 = vld [vmem:[#allocation9 + $0x118] sm:$0xff]  ;;  %v568_v55 = vld [vmem:[#allocation9 + $0x110] sm:$0xff] }
 0x243   :  { %2667 = vmatpush2.msra.mxu0 %v632_v56  ;;  %2668 = vmatprep.mubr.f32.mxu0 %v4634_v48  ;;  %v945_v56 = vld [vmem:[#allocation9 + $0xcd8] sm:$0xff]  ;;  %v944_v58 = vld [vmem:[#allocation9 + $0xcd0] sm:$0xff]  ;;  %v562_v32 = vld [vmem:[#allocation9 + $0xe0] sm:$0xff] }
 0x244   :  { %2738 = vmatpush2.msra.mxu1 %v824_v18  ;;  %2669 = vmatmul.mubr.f32.vlgmr.msra.gmra.mxu0 %v4627_v6  ;;  %v563_v18 = vld [vmem:[#allocation9 + $0xe8] sm:$0xff] }
 0x245   :  { %2739 = vmatprep.mubr.f32.mxu1 %v4654_v10  ;;  %2746 = vmatprep.subr.mxu0 %v1011_v61  ;;  %v939_v61 = vld [vmem:[#allocation9 + $0xca8] sm:$0xff] }
 0x246   :  { %2817 = vmatprep.subr.mxu1 %v629_v62  ;;  %2740 = vmatmul.mubr.f32.vlgmr.msra.gmra.mxu1 %v4645_v59  ;;  %v557_v62 = vld [vmem:[#allocation9 + $0xb8] sm:$0xff] }
 0x247   :  { %2747 = vmatpush1.msra.mxu0 %v1010_v63  ;;  %2818 = vmatpush1.msra.mxu1 %v628_v2  ;;  %v938_v63 = vld [vmem:[#allocation9 + $0xca0] sm:$0xff]  ;;  %v556_v2 = vld [vmem:[#allocation9 + $0xb0] sm:$0xff] }
 0x248   :  { %2748 = vmatprep.subr.mxu0 %v1005_v3  ;;  %2819 = vmatprep.subr.mxu1 %v623_v4  ;;  %v933_v3 = vld [vmem:[#allocation9 + $0xc78] sm:$0xff]  ;;  %v551_v4 = vld [vmem:[#allocation9 + $0x88] sm:$0xff] }
 0x249   :  { %2749 = vmatpush1.msra.mxu0 %v1004_v5  ;;  %2820 = vmatpush1.msra.mxu1 %v622_v7  ;;  %v932_v5 = vld [vmem:[#allocation9 + $0xc70] sm:$0xff]  ;;  %v550_v7 = vld [vmem:[#allocation9 + $0x80] sm:$0xff] }
 0x24a   :  { %2750 = vmatprep.subr.mxu0 %v999_v8  ;;  %2821 = vmatprep.subr.mxu1 %v617_v11  ;;  %v927_v8 = vld [vmem:[#allocation9 + $0xc48] sm:$0xff]  ;;  %v545_v11 = vld [vmem:[#allocation9 + $0x58] sm:$0xff] }
 0x24b   :  { %2751 = vmatpush1.msra.mxu0 %v998_v12  ;;  %2822 = vmatpush1.msra.mxu1 %v616_v50  ;;  %v926_v12 = vld [vmem:[#allocation9 + $0xc40] sm:$0xff]  ;;  %v544_v50 = vld [vmem:[#allocation9 + $0x50] sm:$0xff] }
 0x24c   :  { %2752 = vmatprep.subr.mxu0 %v993_v13  ;;  %2823 = vmatprep.subr.mxu1 %v611_v14  ;;  %v921_v13 = vld [vmem:[#allocation9 + $0xc18] sm:$0xff]  ;;  %v539_v14 = vld [vmem:[#allocation9 + $0x28] sm:$0xff] }
 0x24d   :  { %2753 = vmatpush1.msra.mxu0 %v992_v17  ;;  %2824 = vmatpush1.msra.mxu1 %v610_v19  ;;  %v920_v17 = vld [vmem:[#allocation9 + $0xc10] sm:$0xff]  ;;  %v538_v19 = vld [vmem:[#allocation9 + $0x20] sm:$0xff] }
 0x24e   :  { %2754 = vmatprep.subr.mxu0 %v987_v20  ;;  %2825 = vmatprep.subr.mxu1 %v605_v21  ;;  %v1107_v20 = vld [vmem:[#allocation9 + $0x11e8] sm:$0xff]  ;;  %v725_v21 = vld [vmem:[#allocation9 + $0x5f8] sm:$0xff] }
 0x24f   :  { %2755 = vmatpush1.msra.mxu0 %v986_v26  ;;  %2826 = vmatpush1.msra.mxu1 %v604_v28  ;;  %v1106_v26 = vld [vmem:[#allocation9 + $0x11e0] sm:$0xff]  ;;  %v724_v28 = vld [vmem:[#allocation9 + $0x5f0] sm:$0xff] }
 0x250   :  { %2756 = vmatprep.subr.mxu0 %v981_v29  ;;  %2827 = vmatprep.subr.mxu1 %v599_v30  ;;  %v1101_v29 = vld [vmem:[#allocation9 + $0x11b8] sm:$0xff]  ;;  %v719_v30 = vld [vmem:[#allocation9 + $0x5c8] sm:$0xff] }
 0x251   :  { %2757 = vmatpush1.msra.mxu0 %v980_v33  ;;  %2828 = vmatpush1.msra.mxu1 %v598_v35  ;;  %v1100_v33 = vld [vmem:[#allocation9 + $0x11b0] sm:$0xff]  ;;  %v718_v35 = vld [vmem:[#allocation9 + $0x5c0] sm:$0xff] }
 0x252   :  { %2758 = vmatprep.subr.mxu0 %v975_v36  ;;  %2829 = vmatprep.subr.mxu1 %v593_v37  ;;  %v1095_v36 = vld [vmem:[#allocation9 + $0x1188] sm:$0xff]  ;;  %v713_v37 = vld [vmem:[#allocation9 + $0x598] sm:$0xff] }
 0x253   :  { %2759 = vmatpush1.msra.mxu0 %v974_v38  ;;  %2830 = vmatpush1.msra.mxu1 %v592_v39  ;;  %v1094_v38 = vld [vmem:[#allocation9 + $0x1180] sm:$0xff]  ;;  %v712_v39 = vld [vmem:[#allocation9 + $0x590] sm:$0xff] }
 0x254   :  { %2760 = vmatprep.subr.mxu0 %v969_v41  ;;  %2831 = vmatprep.subr.mxu1 %v587_v42  ;;  %v1089_v41 = vld [vmem:[#allocation9 + $0x1158] sm:$0xff]  ;;  %v707_v42 = vld [vmem:[#allocation9 + $0x568] sm:$0xff] }
 0x255   :  { %2761 = vmatpush1.msra.mxu0 %v968_v24  ;;  %2832 = vmatpush1.msra.mxu1 %v586_v43  ;;  %v1088_v24 = vld [vmem:[#allocation9 + $0x1150] sm:$0xff]  ;;  %v706_v43 = vld [vmem:[#allocation9 + $0x560] sm:$0xff] }
 0x256   :  { %2762 = vmatprep.subr.mxu0 %v963_v44  ;;  %2833 = vmatprep.subr.mxu1 %v581_v27  ;;  %v1083_v44 = vld [vmem:[#allocation9 + $0x1128] sm:$0xff]  ;;  %v701_v27 = vld [vmem:[#allocation9 + $0x538] sm:$0xff] }
 0x257   :  { %2763 = vmatpush1.msra.mxu0 %v962_v45  ;;  %2834 = vmatpush1.msra.mxu1 %v580_v22  ;;  %v1082_v45 = vld [vmem:[#allocation9 + $0x1120] sm:$0xff]  ;;  %v700_v22 = vld [vmem:[#allocation9 + $0x530] sm:$0xff] }
 0x258   :  { %2764 = vmatprep.subr.mxu0 %v957_v25  ;;  %2835 = vmatprep.subr.mxu1 %v575_v47  ;;  %v1077_v25 = vld [vmem:[#allocation9 + $0x10f8] sm:$0xff]  ;;  %v695_v47 = vld [vmem:[#allocation9 + $0x508] sm:$0xff] }
 0x259   :  { %2765 = vmatpush1.msra.mxu0 %v956_v49  ;;  %2836 = vmatpush1.msra.mxu1 %v574_v52  ;;  %v1076_v49 = vld [vmem:[#allocation9 + $0x10f0] sm:$0xff]  ;;  %v694_v52 = vld [vmem:[#allocation9 + $0x500] sm:$0xff] }
 0x25a   :  { %2766 = vmatprep.subr.mxu0 %v951_v34  ;;  %2837 = vmatprep.subr.mxu1 %v569_v53  ;;  %v1071_v34 = vld [vmem:[#allocation9 + $0x10c8] sm:$0xff]  ;;  %v689_v53 = vld [vmem:[#allocation9 + $0x4d8] sm:$0xff] }
 0x25b   :  { %2767 = vmatpush1.msra.mxu0 %v950_v54  ;;  %2838 = vmatpush1.msra.mxu1 %v568_v55  ;;  %v1070_v54 = vld [vmem:[#allocation9 + $0x10c0] sm:$0xff]  ;;  %v688_v55 = vld [vmem:[#allocation9 + $0x4d0] sm:$0xff] }
 0x25c   :  { %2768 = vmatprep.subr.mxu0 %v945_v56  ;;  %2839 = vmatprep.subr.mxu1 %v563_v18  ;;  %v1065_v56 = vld [vmem:[#allocation9 + $0x1098] sm:$0xff]  ;;  %v683_v18 = vld [vmem:[#allocation9 + $0x4a8] sm:$0xff] }
 0x25d   :  { %2769 = vmatpush1.msra.mxu0 %v944_v58  ;;  %2840 = vmatpush1.msra.mxu1 %v562_v32  ;;  %v1064_v58 = vld [vmem:[#allocation9 + $0x1090] sm:$0xff]  ;;  %v682_v32 = vld [vmem:[#allocation9 + $0x4a0] sm:$0xff] }
 0x25e   :  { %2770 = vmatprep.subr.mxu0 %v939_v61  ;;  %2841 = vmatprep.subr.mxu1 %v557_v62  ;;  %v1059_v61 = vld [vmem:[#allocation9 + $0x1068] sm:$0xff]  ;;  %v677_v62 = vld [vmem:[#allocation9 + $0x478] sm:$0xff] }
 0x25f   :  { %2771 = vmatpush1.msra.mxu0 %v938_v63  ;;  %2842 = vmatpush1.msra.mxu1 %v556_v2  ;;  %v1058_v63 = vld [vmem:[#allocation9 + $0x1060] sm:$0xff]  ;;  %v676_v2 = vld [vmem:[#allocation9 + $0x470] sm:$0xff] }
 0x260   :  { %2772 = vmatprep.subr.mxu0 %v933_v3  ;;  %2843 = vmatprep.subr.mxu1 %v551_v4  ;;  %v1053_v3 = vld [vmem:[#allocation9 + $0x1038] sm:$0xff]  ;;  %v671_v4 = vld [vmem:[#allocation9 + $0x448] sm:$0xff] }
 0x261   :  { %2773 = vmatpush1.msra.mxu0 %v932_v5  ;;  %2844 = vmatpush1.msra.mxu1 %v550_v7  ;;  %v1052_v5 = vld [vmem:[#allocation9 + $0x1030] sm:$0xff]  ;;  %v670_v7 = vld [vmem:[#allocation9 + $0x440] sm:$0xff] }
 0x262   :  { %2774 = vmatprep.subr.mxu0 %v927_v8  ;;  %2845 = vmatprep.subr.mxu1 %v545_v11  ;;  %v1047_v8 = vld [vmem:[#allocation9 + $0x1008] sm:$0xff]  ;;  %v665_v11 = vld [vmem:[#allocation9 + $0x418] sm:$0xff] }
 0x263   :  { %2775 = vmatpush1.msra.mxu0 %v926_v12  ;;  %2846 = vmatpush1.msra.mxu1 %v544_v50  ;;  %v1046_v12 = vld [vmem:[#allocation9 + $0x1000] sm:$0xff]  ;;  %v664_v50 = vld [vmem:[#allocation9 + $0x410] sm:$0xff] }
 0x264   :  { %2776 = vmatprep.subr.mxu0 %v921_v13  ;;  %2847 = vmatprep.subr.mxu1 %v539_v14  ;;  %v1041_v13 = vld [vmem:[#allocation9 + $0xfd8] sm:$0xff]  ;;  %v659_v14 = vld [vmem:[#allocation9 + $0x3e8] sm:$0xff] }
 0x265   :  { %2777 = vmatpush1.msra.mxu0 %v920_v17  ;;  %2848 = vmatpush1.msra.mxu1 %v538_v19  ;;  %v1040_v17 = vld [vmem:[#allocation9 + $0xfd0] sm:$0xff]  ;;  %v658_v19 = vld [vmem:[#allocation9 + $0x3e0] sm:$0xff] }
 0x266   :  { %2778 = vmatprep.subr.mxu0 %v1107_v20  ;;  %2849 = vmatprep.subr.mxu1 %v725_v21  ;;  %v1035_v20 = vld [vmem:[#allocation9 + $0xfa8] sm:$0xff]  ;;  %v653_v21 = vld [vmem:[#allocation9 + $0x3b8] sm:$0xff] }
 0x267   :  { %2779 = vmatpush2.msra.mxu0 %v1106_v26  ;;  %2850 = vmatpush2.msra.mxu1 %v724_v28  ;;  %v1034_v26 = vld [vmem:[#allocation9 + $0xfa0] sm:$0xff]  ;;  %v652_v28 = vld [vmem:[#allocation9 + $0x3b0] sm:$0xff] }
 0x268   :  { %2780 = vmatprep.subr.mxu0 %v1101_v29  ;;  %2851 = vmatprep.subr.mxu1 %v719_v30  ;;  %v1029_v29 = vld [vmem:[#allocation9 + $0xf78] sm:$0xff]  ;;  %v647_v30 = vld [vmem:[#allocation9 + $0x388] sm:$0xff] }
 0x269   :  { %2781 = vmatpush2.msra.mxu0 %v1100_v33  ;;  %2852 = vmatpush2.msra.mxu1 %v718_v35  ;;  %v1028_v33 = vld [vmem:[#allocation9 + $0xf70] sm:$0xff]  ;;  %v646_v35 = vld [vmem:[#allocation9 + $0x380] sm:$0xff] }
 0x26a   :  { %2782 = vmatprep.subr.mxu0 %v1095_v36  ;;  %2853 = vmatprep.subr.mxu1 %v713_v37  ;;  %v1023_v36 = vld [vmem:[#allocation9 + $0xf48] sm:$0xff]  ;;  %v641_v37 = vld [vmem:[#allocation9 + $0x358] sm:$0xff] }
 0x26b   :  { %2783 = vmatpush2.msra.mxu0 %v1094_v38  ;;  %2854 = vmatpush2.msra.mxu1 %v712_v39  ;;  %v1022_v38 = vld [vmem:[#allocation9 + $0xf40] sm:$0xff]  ;;  %v640_v39 = vld [vmem:[#allocation9 + $0x350] sm:$0xff] }
 0x26c   :  { %2784 = vmatprep.subr.mxu0 %v1089_v41  ;;  %2855 = vmatprep.subr.mxu1 %v707_v42  ;;  %v1017_v41 = vld [vmem:[#allocation9 + $0xf18] sm:$0xff]  ;;  %v635_v42 = vld [vmem:[#allocation9 + $0x328] sm:$0xff] }
 0x26d   :  { %2785 = vmatpush2.msra.mxu0 %v1088_v24  ;;  %2856 = vmatpush2.msra.mxu1 %v706_v43 }
 0x26e   :  { %2786 = vmatprep.subr.mxu0 %v1083_v44  ;;  %2857 = vmatprep.subr.mxu1 %v701_v27  ;;  %v1016_v44 = vld [vmem:[#allocation9 + $0xf10] sm:$0xff] }
 0x26f   :  { %2787 = vmatpush2.msra.mxu0 %v1082_v45  ;;  %2858 = vmatpush2.msra.mxu1 %v700_v22  ;;  %v634_v22 = vld [vmem:[#allocation9 + $0x320] sm:$0xff] }
 0x270   :  { %2788 = vmatprep.subr.mxu0 %v1077_v25  ;;  %2859 = vmatprep.subr.mxu1 %v695_v47 }
 0x271   :  { %2789 = vmatpush2.msra.mxu0 %v1076_v49  ;;  %2860 = vmatpush2.msra.mxu1 %v694_v52  ;;  %v821_v49 = vld [vmem:[#allocation9 + $0x8f8] sm:$0xff] }
 0x272   :  { %2790 = vmatprep.subr.mxu0 %v1071_v34  ;;  %2861 = vmatprep.subr.mxu1 %v689_v53  ;;  %v1013_v52 = vld [vmem:[#allocation9 + $0xef8] sm:$0xff]  ;;  %v815_v34 = vld [vmem:[#allocation9 + $0x8c8] sm:$0xff] }
 0x273   :  { %2791 = vmatpush2.msra.mxu0 %v1070_v54  ;;  %2862 = vmatpush2.msra.mxu1 %v688_v55  ;;  %v1007_v53 = vld [vmem:[#allocation9 + $0xec8] sm:$0xff]  ;;  %v1006_v54 = vld [vmem:[#allocation9 + $0xec0] sm:$0xff]  ;;  %v809_v55 = vld [vmem:[#allocation9 + $0x898] sm:$0xff] }
 0x274   :  { %2792 = vmatprep.subr.mxu0 %v1065_v56  ;;  %2863 = vmatprep.subr.mxu1 %v683_v18  ;;  %v1001_v56 = vld [vmem:[#allocation9 + $0xe98] sm:$0xff]  ;;  %v808_v18 = vld [vmem:[#allocation9 + $0x890] sm:$0xff] }
 0x275   :  { %2793 = vmatpush2.msra.mxu0 %v1064_v58  ;;  %2864 = vmatpush2.msra.mxu1 %v682_v32  ;;  %v803_v58 = vld [vmem:[#allocation9 + $0x868] sm:$0xff] }
 0x276   :  { %2794 = vmatprep.subr.mxu0 %v1059_v61  ;;  %2865 = vmatprep.subr.mxu1 %v677_v62  ;;  %v995_v32 = vld [vmem:[#allocation9 + $0xe68] sm:$0xff]  ;;  %v994_v61 = vld [vmem:[#allocation9 + $0xe60] sm:$0xff]  ;;  %v797_v62 = vld [vmem:[#allocation9 + $0x838] sm:$0xff] }
 0x277   :  { %2795 = vmatpush2.msra.mxu0 %v1058_v63  ;;  %2866 = vmatpush2.msra.mxu1 %v676_v2  ;;  %v989_v63 = vld [vmem:[#allocation9 + $0xe38] sm:$0xff]  ;;  %v796_v2 = vld [vmem:[#allocation9 + $0x830] sm:$0xff] }
 0x278   :  { %2796 = vmatprep.subr.mxu0 %v1053_v3  ;;  %2867 = vmatprep.subr.mxu1 %v671_v4  ;;  %v988_v3 = vld [vmem:[#allocation9 + $0xe30] sm:$0xff]  ;;  %v791_v4 = vld [vmem:[#allocation9 + $0x808] sm:$0xff] }
 0x279   :  { %2797 = vmatpush2.msra.mxu0 %v1052_v5  ;;  %2868 = vmatpush2.msra.mxu1 %v670_v7  ;;  %v983_v5 = vld [vmem:[#allocation9 + $0xe08] sm:$0xff]  ;;  %v790_v7 = vld [vmem:[#allocation9 + $0x800] sm:$0xff] }
 0x27a   :  { %2798 = vmatprep.subr.mxu0 %v1047_v8  ;;  %2869 = vmatprep.subr.mxu1 %v665_v11  ;;  %v982_v8 = vld [vmem:[#allocation9 + $0xe00] sm:$0xff]  ;;  %v785_v11 = vld [vmem:[#allocation9 + $0x7d8] sm:$0xff] }
 0x27b   :  { %2799 = vmatpush2.msra.mxu0 %v1046_v12  ;;  %2870 = vmatpush2.msra.mxu1 %v664_v50  ;;  %v977_v12 = vld [vmem:[#allocation9 + $0xdd8] sm:$0xff]  ;;  %v784_v50 = vld [vmem:[#allocation9 + $0x7d0] sm:$0xff] }
 0x27c   :  { %2800 = vmatprep.subr.mxu0 %v1041_v13  ;;  %2871 = vmatprep.subr.mxu1 %v659_v14  ;;  %v976_v13 = vld [vmem:[#allocation9 + $0xdd0] sm:$0xff]  ;;  %v779_v14 = vld [vmem:[#allocation9 + $0x7a8] sm:$0xff] }
 0x27d   :  { %2801 = vmatpush2.msra.mxu0 %v1040_v17  ;;  %2872 = vmatpush2.msra.mxu1 %v658_v19  ;;  %v971_v17 = vld [vmem:[#allocation9 + $0xda8] sm:$0xff]  ;;  %v778_v19 = vld [vmem:[#allocation9 + $0x7a0] sm:$0xff] }
 0x27e   :  { %2802 = vmatprep.subr.mxu0 %v1035_v20  ;;  %2873 = vmatprep.subr.mxu1 %v653_v21  ;;  %v970_v20 = vld [vmem:[#allocation9 + $0xda0] sm:$0xff]  ;;  %v773_v21 = vld [vmem:[#allocation9 + $0x778] sm:$0xff] }
 0x27f   :  { %2803 = vmatpush2.msra.mxu0 %v1034_v26  ;;  %2874 = vmatpush2.msra.mxu1 %v652_v28  ;;  %v965_v26 = vld [vmem:[#allocation9 + $0xd78] sm:$0xff]  ;;  %v772_v28 = vld [vmem:[#allocation9 + $0x770] sm:$0xff] }
 0x280   :  { %2804 = vmatprep.subr.mxu0 %v1029_v29  ;;  %2875 = vmatprep.subr.mxu1 %v647_v30  ;;  %v964_v29 = vld [vmem:[#allocation9 + $0xd70] sm:$0xff]  ;;  %v767_v30 = vld [vmem:[#allocation9 + $0x748] sm:$0xff] }
 0x281   :  { %2805 = vmatpush2.msra.mxu0 %v1028_v33  ;;  %2876 = vmatpush2.msra.mxu1 %v646_v35  ;;  %v2353_v24 = vpop.f32.mrf.mxu0  ;;  %v2457_v43 = vpop.f32.mrf.mxu1  ;;  %v959_v33 = vld [vmem:[#allocation9 + $0xd48] sm:$0xff]  ;;  %v766_v35 = vld [vmem:[#allocation9 + $0x740] sm:$0xff] }
 0x282   :  { %2806 = vmatprep.subr.mxu0 %v1023_v36  ;;  %2877 = vmatprep.subr.mxu1 %v641_v37  ;;  %v4677_v27 = vadd.f32 %v2353_v24, %v4668_v57  ;;  %v4680_v45 = vadd.f32 %v2457_v43, %v4630_v46  ;;  %v820_v57 = vld [vmem:[#allocation9 + $0x8f0] sm:$0xff]  ;;  %v958_v36 = vld [vmem:[#allocation9 + $0xd40] sm:$0xff]  ;;  %v761_v37 = vld [vmem:[#allocation9 + $0x718] sm:$0xff] }
 0x283   :  { %2807 = vmatpush2.msra.mxu0 %v1022_v38  ;;  %2878 = vmatpush2.msra.mxu1 %v640_v39  ;;  %v2355_v25 = vpop.f32.mrf.mxu0  ;;  %v1012_v46 = vld [vmem:[#allocation9 + $0xef0] sm:$0xff]  ;;  %v953_v38 = vld [vmem:[#allocation9 + $0xd18] sm:$0xff]  ;;  %v947_v24 = vld [vmem:[#allocation9 + $0xce8] sm:$0xff] }
 0x284   :  { %2808 = vmatprep.subr.mxu0 %v1017_v41  ;;  %2879 = vmatprep.subr.mxu1 %v635_v42  ;;  %v4683_v47 = vadd.f32 %v2355_v25, %v4670_v9  ;;  %v814_v9 = vld [vmem:[#allocation9 + $0x8c0] sm:$0xff]  ;;  %v760_v39 = vld [vmem:[#allocation9 + $0x710] sm:$0xff]  ;;  %v755_v42 = vld [vmem:[#allocation9 + $0x6e8] sm:$0xff] }
 0x285   :  { %2809 = vmatpush2.msra.mxu0 %v1016_v44  ;;  %2810 = vmatprep.mubr.f32.mxu0 %v4658_v15  ;;  %v952_v41 = vld [vmem:[#allocation9 + $0xd10] sm:$0xff]  ;;  %v754_v43 = vld [vmem:[#allocation9 + $0x6e0] sm:$0xff]  ;;  %v941_v25 = vld [vmem:[#allocation9 + $0xcb8] sm:$0xff] }
 0x286   :  { %2880 = vmatpush2.msra.mxu1 %v634_v22  ;;  %2881 = vmatprep.mubr.f32.mxu1 %v4634_v48  ;;  %v1000_v48 = vld [vmem:[#allocation9 + $0xe90] sm:$0xff]  ;;  %v946_v44 = vld [vmem:[#allocation9 + $0xce0] sm:$0xff]  ;;  %v749_v22 = vld [vmem:[#allocation9 + $0x6b8] sm:$0xff] }
 0x287   :  { %2811 = vmatmul.mubr.f32.vlgmr.msra.gmra.mxu0 %v4650_v1  ;;  %2882 = vmatmul.mubr.f32.vlgmr.msra.gmra.mxu1 %v4627_v6  ;;  %v802_v6 = vld [vmem:[#allocation9 + $0x860] sm:$0xff] }
 0x288   :  { %2888 = vmatprep.subr.mxu0 %v821_v49  ;;  %2959 = vmatprep.subr.mxu1 %v1013_v52  ;;  %v748_v49 = vld [vmem:[#allocation9 + $0x6b0] sm:$0xff] }
 0x289   :  { %2889 = vmatpush1.msra.mxu0 %v820_v57  ;;  %2960 = vmatpush1.msra.mxu1 %v1012_v46  ;;  %v940_v52 = vld [vmem:[#allocation9 + $0xcb0] sm:$0xff]  ;;  %v743_v57 = vld [vmem:[#allocation9 + $0x688] sm:$0xff] }
 0x28a   :  { %2890 = vmatprep.subr.mxu0 %v815_v34  ;;  %2961 = vmatprep.subr.mxu1 %v1007_v53  ;;  %v935_v46 = vld [vmem:[#allocation9 + $0xc88] sm:$0xff]  ;;  %v742_v34 = vld [vmem:[#allocation9 + $0x680] sm:$0xff] }
 0x28b   :  { %2891 = vmatpush1.msra.mxu0 %v814_v9  ;;  %2962 = vmatpush1.msra.mxu1 %v1006_v54  ;;  %v934_v53 = vld [vmem:[#allocation9 + $0xc80] sm:$0xff]  ;;  %v737_v9 = vld [vmem:[#allocation9 + $0x658] sm:$0xff] }
 0x28c   :  { %2892 = vmatprep.subr.mxu0 %v809_v55  ;;  %2963 = vmatprep.subr.mxu1 %v1001_v56  ;;  %v929_v54 = vld [vmem:[#allocation9 + $0xc58] sm:$0xff]  ;;  %v736_v55 = vld [vmem:[#allocation9 + $0x650] sm:$0xff] }
 0x28d   :  { %2893 = vmatpush1.msra.mxu0 %v808_v18  ;;  %2964 = vmatpush1.msra.mxu1 %v1000_v48  ;;  %v928_v56 = vld [vmem:[#allocation9 + $0xc50] sm:$0xff]  ;;  %v731_v18 = vld [vmem:[#allocation9 + $0x628] sm:$0xff] }
 0x28e   :  { %2894 = vmatprep.subr.mxu0 %v803_v58  ;;  %2965 = vmatprep.subr.mxu1 %v995_v32  ;;  %v923_v48 = vld [vmem:[#allocation9 + $0xc28] sm:$0xff]  ;;  %v730_v58 = vld [vmem:[#allocation9 + $0x620] sm:$0xff] }
 0x28f   :  { %2895 = vmatpush1.msra.mxu0 %v802_v6  ;;  %2966 = vmatpush1.msra.mxu1 %v994_v61  ;;  %v922_v32 = vld [vmem:[#allocation9 + $0xc20] sm:$0xff]  ;;  %v917_v6 = vld [vmem:[#allocation9 + $0xbf8] sm:$0xff] }
 0x290   :  { %2896 = vmatprep.subr.mxu0 %v797_v62  ;;  %2967 = vmatprep.subr.mxu1 %v989_v63  ;;  %v1109_v61 = vld [vmem:[#allocation9 + $0x11f8] sm:$0xff]  ;;  %v916_v62 = vld [vmem:[#allocation9 + $0xbf0] sm:$0xff] }
 0x291   :  { %2897 = vmatpush1.msra.mxu0 %v796_v2  ;;  %2968 = vmatpush1.msra.mxu1 %v988_v3  ;;  %v1108_v63 = vld [vmem:[#allocation9 + $0x11f0] sm:$0xff]  ;;  %v911_v2 = vld [vmem:[#allocation9 + $0xbc8] sm:$0xff] }
 0x292   :  { %2898 = vmatprep.subr.mxu0 %v791_v4  ;;  %2969 = vmatprep.subr.mxu1 %v983_v5  ;;  %v1103_v3 = vld [vmem:[#allocation9 + $0x11c8] sm:$0xff]  ;;  %v910_v4 = vld [vmem:[#allocation9 + $0xbc0] sm:$0xff] }
 0x293   :  { %2899 = vmatpush1.msra.mxu0 %v790_v7  ;;  %2970 = vmatpush1.msra.mxu1 %v982_v8  ;;  %v1102_v5 = vld [vmem:[#allocation9 + $0x11c0] sm:$0xff]  ;;  %v905_v7 = vld [vmem:[#allocation9 + $0xb98] sm:$0xff] }
 0x294   :  { %2900 = vmatprep.subr.mxu0 %v785_v11  ;;  %2971 = vmatprep.subr.mxu1 %v977_v12  ;;  %v1097_v8 = vld [vmem:[#allocation9 + $0x1198] sm:$0xff]  ;;  %v904_v11 = vld [vmem:[#allocation9 + $0xb90] sm:$0xff] }
 0x295   :  { %2901 = vmatpush1.msra.mxu0 %v784_v50  ;;  %2972 = vmatpush1.msra.mxu1 %v976_v13  ;;  %v1096_v12 = vld [vmem:[#allocation9 + $0x1190] sm:$0xff]  ;;  %v899_v50 = vld [vmem:[#allocation9 + $0xb68] sm:$0xff] }
 0x296   :  { %2902 = vmatprep.subr.mxu0 %v779_v14  ;;  %2973 = vmatprep.subr.mxu1 %v971_v17  ;;  %v1091_v13 = vld [vmem:[#allocation9 + $0x1168] sm:$0xff]  ;;  %v898_v14 = vld [vmem:[#allocation9 + $0xb60] sm:$0xff] }
 0x297   :  { %2903 = vmatpush1.msra.mxu0 %v778_v19  ;;  %2974 = vmatpush1.msra.mxu1 %v970_v20  ;;  %v1090_v17 = vld [vmem:[#allocation9 + $0x1160] sm:$0xff]  ;;  %v893_v19 = vld [vmem:[#allocation9 + $0xb38] sm:$0xff] }
 0x298   :  { %2904 = vmatprep.subr.mxu0 %v773_v21  ;;  %2975 = vmatprep.subr.mxu1 %v965_v26  ;;  %v1085_v20 = vld [vmem:[#allocation9 + $0x1138] sm:$0xff]  ;;  %v892_v21 = vld [vmem:[#allocation9 + $0xb30] sm:$0xff] }
 0x299   :  { %2905 = vmatpush1.msra.mxu0 %v772_v28  ;;  %2976 = vmatpush1.msra.mxu1 %v964_v29  ;;  %v1084_v26 = vld [vmem:[#allocation9 + $0x1130] sm:$0xff]  ;;  %v887_v28 = vld [vmem:[#allocation9 + $0xb08] sm:$0xff] }
 0x29a   :  { %2906 = vmatprep.subr.mxu0 %v767_v30  ;;  %2977 = vmatprep.subr.mxu1 %v959_v33  ;;  %v1079_v29 = vld [vmem:[#allocation9 + $0x1108] sm:$0xff]  ;;  %v886_v30 = vld [vmem:[#allocation9 + $0xb00] sm:$0xff] }
 0x29b   :  { %2907 = vmatpush1.msra.mxu0 %v766_v35  ;;  %2978 = vmatpush1.msra.mxu1 %v958_v36  ;;  %v1078_v33 = vld [vmem:[#allocation9 + $0x1100] sm:$0xff]  ;;  %v881_v35 = vld [vmem:[#allocation9 + $0xad8] sm:$0xff] }
 0x29c   :  { %2908 = vmatprep.subr.mxu0 %v761_v37  ;;  %2979 = vmatprep.subr.mxu1 %v953_v38  ;;  %v1073_v36 = vld [vmem:[#allocation9 + $0x10d8] sm:$0xff]  ;;  %v880_v37 = vld [vmem:[#allocation9 + $0xad0] sm:$0xff] }
 0x29d   :  { %2909 = vmatpush1.msra.mxu0 %v760_v39  ;;  %2980 = vmatpush1.msra.mxu1 %v952_v41  ;;  %v1072_v38 = vld [vmem:[#allocation9 + $0x10d0] sm:$0xff]  ;;  %v875_v39 = vld [vmem:[#allocation9 + $0xaa8] sm:$0xff] }
 0x29e   :  { %2910 = vmatprep.subr.mxu0 %v755_v42  ;;  %2981 = vmatprep.subr.mxu1 %v947_v24  ;;  %v1067_v41 = vld [vmem:[#allocation9 + $0x10a8] sm:$0xff]  ;;  %v874_v42 = vld [vmem:[#allocation9 + $0xaa0] sm:$0xff] }
 0x29f   :  { %2911 = vmatpush1.msra.mxu0 %v754_v43  ;;  %2982 = vmatpush1.msra.mxu1 %v946_v44  ;;  %v1066_v24 = vld [vmem:[#allocation9 + $0x10a0] sm:$0xff]  ;;  %v869_v43 = vld [vmem:[#allocation9 + $0xa78] sm:$0xff] }
 0x2a0   :  { %2912 = vmatprep.subr.mxu0 %v749_v22  ;;  %2983 = vmatprep.subr.mxu1 %v941_v25  ;;  %v1061_v44 = vld [vmem:[#allocation9 + $0x1078] sm:$0xff]  ;;  %v868_v22 = vld [vmem:[#allocation9 + $0xa70] sm:$0xff] }
 0x2a1   :  { %2913 = vmatpush1.msra.mxu0 %v748_v49  ;;  %2984 = vmatpush1.msra.mxu1 %v940_v52  ;;  %v1060_v25 = vld [vmem:[#allocation9 + $0x1070] sm:$0xff]  ;;  %v863_v49 = vld [vmem:[#allocation9 + $0xa48] sm:$0xff] }
 0x2a2   :  { %2914 = vmatprep.subr.mxu0 %v743_v57  ;;  %2985 = vmatprep.subr.mxu1 %v935_v46  ;;  %v1055_v52 = vld [vmem:[#allocation9 + $0x1048] sm:$0xff]  ;;  %v862_v57 = vld [vmem:[#allocation9 + $0xa40] sm:$0xff] }
 0x2a3   :  { %2915 = vmatpush1.msra.mxu0 %v742_v34  ;;  %2986 = vmatpush1.msra.mxu1 %v934_v53  ;;  %v1054_v46 = vld [vmem:[#allocation9 + $0x1040] sm:$0xff]  ;;  %v857_v34 = vld [vmem:[#allocation9 + $0xa18] sm:$0xff] }
 0x2a4   :  { %2916 = vmatprep.subr.mxu0 %v737_v9  ;;  %2987 = vmatprep.subr.mxu1 %v929_v54  ;;  %v1049_v53 = vld [vmem:[#allocation9 + $0x1018] sm:$0xff]  ;;  %v856_v9 = vld [vmem:[#allocation9 + $0xa10] sm:$0xff] }
 0x2a5   :  { %2917 = vmatpush1.msra.mxu0 %v736_v55  ;;  %2988 = vmatpush1.msra.mxu1 %v928_v56  ;;  %v1048_v54 = vld [vmem:[#allocation9 + $0x1010] sm:$0xff]  ;;  %v851_v55 = vld [vmem:[#allocation9 + $0x9e8] sm:$0xff] }
 0x2a6   :  { %2918 = vmatprep.subr.mxu0 %v731_v18  ;;  %2989 = vmatprep.subr.mxu1 %v923_v48  ;;  %v1043_v56 = vld [vmem:[#allocation9 + $0xfe8] sm:$0xff]  ;;  %v850_v18 = vld [vmem:[#allocation9 + $0x9e0] sm:$0xff] }
 0x2a7   :  { %2919 = vmatpush1.msra.mxu0 %v730_v58  ;;  %2990 = vmatpush1.msra.mxu1 %v922_v32  ;;  %v1042_v48 = vld [vmem:[#allocation9 + $0xfe0] sm:$0xff]  ;;  %v845_v58 = vld [vmem:[#allocation9 + $0x9b8] sm:$0xff] }
 0x2a8   :  { %2920 = vmatprep.subr.mxu0 %v917_v6  ;;  %2991 = vmatprep.subr.mxu1 %v1109_v61  ;;  %v1037_v32 = vld [vmem:[#allocation9 + $0xfb8] sm:$0xff]  ;;  %v844_v6 = vld [vmem:[#allocation9 + $0x9b0] sm:$0xff] }
 0x2a9   :  { %2921 = vmatpush2.msra.mxu0 %v916_v62  ;;  %2992 = vmatpush2.msra.mxu1 %v1108_v63  ;;  %v1036_v61 = vld [vmem:[#allocation9 + $0xfb0] sm:$0xff]  ;;  %v1859_v62 = vadd.f32 %v4642_v51, %v4623_v40  ;;  %v839_v63 = vld [vmem:[#allocation9 + $0x988] sm:$0xff] }
 0x2aa   :  { %2922 = vmatprep.subr.mxu0 %v911_v2  ;;  %2993 = vmatprep.subr.mxu1 %v1103_v3  ;;  %v1031_v2 = vld [vmem:[#allocation9 + $0xf88] sm:$0xff]  ;;  %v2459_v3 = vpop.f32.mrf.mxu1  ;;  %v832_v40 = vld [vmem:[#allocation9 + $0x950] sm:$0xff] }
 0x2ab   :  { %2923 = vmatpush2.msra.mxu0 %v910_v4  ;;  %2994 = vmatpush2.msra.mxu1 %v1102_v5  ;;  %v838_v4 = vld [vmem:[#allocation9 + $0x980] sm:$0xff]  ;;  %v1024_v51 = vld [vmem:[#allocation9 + $0xf50] sm:$0xff] }
 0x2ac   :  { %2924 = vmatprep.subr.mxu0 %v905_v7  ;;  %2995 = vmatprep.subr.mxu1 %v1097_v8  ;;  %v1030_v5 = vld [vmem:[#allocation9 + $0xf80] sm:$0xff]  ;;  %v1930_v7 = vadd.f32 %v4647_v60, %v1859_v62  ;;  %v833_v8 = vld [vmem:[#allocation9 + $0x958] sm:$0xff]  ;;  %v3189_v62 = vld [vmem:[#allocation13 + $0x3c8] sm:$0xff] }
 0x2ad   :  { %2925 = vmatpush2.msra.mxu0 %v904_v11  ;;  %2996 = vmatpush2.msra.mxu1 %v1096_v12  ;;  %v1025_v11 = vld [vmem:[#allocation9 + $0xf58] sm:$0xff]  ;;  %v3038_v12 = vsub.s32 1, %v4546_v31  ;;  %v826_v60 = vld [vmem:[#allocation9 + $0x920] sm:$0xff] }
 0x2ae   :  { %2926 = vmatprep.subr.mxu0 %v899_v50  ;;  %2997 = vmatprep.subr.mxu1 %v1091_v13  ;;  %v2460_v13 = vadd.f32 %v2459_v3, %v1930_v7  ;;  %v3089_v3 = vld [vmem:[#allocation13 + $0xa8] sm:$0xff] }
 0x2af   :  { %2927 = vmatpush2.msra.mxu0 %v898_v14  ;;  %2998 = vmatpush2.msra.mxu1 %v1090_v17  ;;  %v827_v14 = vld [vmem:[#allocation9 + $0x928] sm:$0xff] }
 0x2b0   :  { %2928 = vmatprep.subr.mxu0 %v893_v19  ;;  %2999 = vmatprep.subr.mxu1 %v1085_v20  ;;  %v1019_v17 = vld [vmem:[#allocation9 + $0xf28] sm:$0xff] }
 0x2b1   :  { %2929 = vmatpush2.msra.mxu0 %v892_v21  ;;  %3000 = vmatpush2.msra.mxu1 %v1084_v26  ;;  %v4694_v21 = vld [vmem:[#allocation12] sm:$0x3f]  ;;  %v3185_v7 = vld [vmem:[#allocation13 + $0x3a8] sm:$0xff] }
 0x2b2   :  { %2930 = vmatprep.subr.mxu0 %v887_v28  ;;  %3001 = vmatprep.subr.mxu1 %v1079_v29  ;;  %v1018_v28 = vld [vmem:[#allocation9 + $0xf20] sm:$0xff] }
 0x2b3   :  { %2931 = vmatpush2.msra.mxu0 %v886_v30  ;;  %3002 = vmatpush2.msra.mxu1 %v1078_v33  ;;  %v3039_v33 = vrot.slane %v4694_v21, %v3038_v12 }
 0x2b4   :  { %2932 = vmatprep.subr.mxu0 %v881_v35  ;;  %3003 = vmatprep.subr.mxu1 %v1073_v36  ;;  %v3114_v35 = vld [vmem:[#allocation13 + $0x170] sm:$0xff] }
 0x2b5   :  { %2933 = vmatpush2.msra.mxu0 %v880_v37  ;;  %3004 = vmatpush2.msra.mxu1 %v1072_v38  ;;  %v3210_v37 = vld [vmem:[#allocation13 + $0x470] sm:$0xff]  ;;  %v3113_v38 = vld [vmem:[#allocation13 + $0x168] sm:$0xff] }
 0x2b6   :  { %2934 = vmatprep.subr.mxu0 %v875_v39  ;;  %3005 = vmatprep.subr.mxu1 %v1067_v41  ;;  %v3111_v39 = vld [vmem:[#allocation13 + $0x158] sm:$0xff] }
 0x2b7   :  { %2935 = vmatpush2.msra.mxu0 %v874_v42  ;;  %3006 = vmatpush2.msra.mxu1 %v1066_v24  ;;  %v3209_v42 = vld [vmem:[#allocation13 + $0x468] sm:$0xff]  ;;  %v3110_v24 = vld [vmem:[#allocation13 + $0x150] sm:$0xff] }
 0x2b8   :  { %2936 = vmatprep.subr.mxu0 %v869_v43  ;;  %3007 = vmatprep.subr.mxu1 %v1061_v44  ;;  %v3207_v43 = vld [vmem:[#allocation13 + $0x458] sm:$0xff]  ;;  %v3206_v44 = vld [vmem:[#allocation13 + $0x450] sm:$0xff] }
 0x2b9   :  { %2937 = vmatpush2.msra.mxu0 %v868_v22  ;;  %3008 = vmatpush2.msra.mxu1 %v1060_v25  ;;  %v3204_v22 = vld [vmem:[#allocation13 + $0x440] sm:$0xff] }
 0x2ba   :  { %2938 = vmatprep.subr.mxu0 %v863_v49  ;;  %3009 = vmatprep.subr.mxu1 %v1055_v52  ;;  %v3104_v25 = vld [vmem:[#allocation13 + $0x120] sm:$0xff]  ;;  %v3201_v49 = vld [vmem:[#allocation13 + $0x428] sm:$0xff]  ;;  %v3102_v52 = vld [vmem:[#allocation13 + $0x110] sm:$0xff] }
 0x2bb   :  { %2939 = vmatpush2.msra.mxu0 %v862_v57  ;;  %3010 = vmatpush2.msra.mxu1 %v1054_v46  ;;  %v3200_v57 = vld [vmem:[#allocation13 + $0x420] sm:$0xff]  ;;  %v3101_v46 = vld [vmem:[#allocation13 + $0x108] sm:$0xff] }
 0x2bc   :  { %2940 = vmatprep.subr.mxu0 %v857_v34  ;;  %3011 = vmatprep.subr.mxu1 %v1049_v53  ;;  %v3198_v34 = vld [vmem:[#allocation13 + $0x410] sm:$0xff]  ;;  %v3099_v53 = vld [vmem:[#allocation13 + $0xf8] sm:$0xff] }
 0x2bd   :  { %2941 = vmatpush2.msra.mxu0 %v856_v9  ;;  %3012 = vmatpush2.msra.mxu1 %v1048_v54  ;;  %v3197_v9 = vld [vmem:[#allocation13 + $0x408] sm:$0xff]  ;;  %v3098_v54 = vld [vmem:[#allocation13 + $0xf0] sm:$0xff] }
 0x2be   :  { %2942 = vmatprep.subr.mxu0 %v851_v55  ;;  %3013 = vmatprep.subr.mxu1 %v1043_v56  ;;  %v3195_v55 = vld [vmem:[#allocation13 + $0x3f8] sm:$0xff]  ;;  %v3096_v56 = vld [vmem:[#allocation13 + $0xe0] sm:$0xff] }
 0x2bf   :  { %2943 = vmatpush2.msra.mxu0 %v850_v18  ;;  %3014 = vmatpush2.msra.mxu1 %v1042_v48  ;;  %v3194_v18 = vld [vmem:[#allocation13 + $0x3f0] sm:$0xff]  ;;  %v3095_v48 = vld [vmem:[#allocation13 + $0xd8] sm:$0xff] }
 0x2c0   :  { %2944 = vmatprep.subr.mxu0 %v845_v58  ;;  %3015 = vmatprep.subr.mxu1 %v1037_v32  ;;  %v3192_v58 = vld [vmem:[#allocation13 + $0x3e0] sm:$0xff]  ;;  %v3093_v32 = vld [vmem:[#allocation13 + $0xc8] sm:$0xff] }
 0x2c1   :  { %2945 = vmatpush2.msra.mxu0 %v844_v6  ;;  %3016 = vmatpush2.msra.mxu1 %v1036_v61  ;;  %v3191_v6 = vld [vmem:[#allocation13 + $0x3d8] sm:$0xff]  ;;  %v3092_v61 = vld [vmem:[#allocation13 + $0xc0] sm:$0xff] }
 0x2c2   :  { %2946 = vmatprep.subr.mxu0 %v839_v63  ;;  %3017 = vmatprep.subr.mxu1 %v1031_v2  ;;  %v2528_v50 = vpop.f32.mrf.mxu0  ;;  %v3090_v63 = vld [vmem:[#allocation13 + $0xb0] sm:$0xff]  ;;  %v3188_v2 = vld [vmem:[#allocation13 + $0x3c0] sm:$0xff] }
 0x2c3   :  { %2947 = vmatpush2.msra.mxu0 %v838_v4  ;;  %3018 = vmatpush2.msra.mxu1 %v1030_v5  ;;  %v2529_v19 = vadd.f32 %v2528_v50, %v4680_v45  ;;  %v3186_v4 = vld [vmem:[#allocation13 + $0x3b0] sm:$0xff]  ;;  %v3087_v5 = vld [vmem:[#allocation13 + $0x98] sm:$0xff] }
 0x2c4   :  { %2948 = vmatprep.subr.mxu0 %v833_v8  ;;  %3019 = vmatprep.subr.mxu1 %v1025_v11  ;;  %v2599_v20 = vpop.f32.mrf.mxu1  ;;  %v2530_v26 = vpop.f32.mrf.mxu0  ;;  %v3086_v8 = vld [vmem:[#allocation13 + $0x90] sm:$0xff]  ;;  %v3183_v11 = vld [vmem:[#allocation13 + $0x398] sm:$0xff] }
 0x2c5   :  { %2949 = vmatpush2.msra.mxu0 %v832_v40  ;;  %3020 = vmatpush2.msra.mxu1 %v1024_v51  ;;  %v4696_v29 = vadd.f32 %v2599_v20, %v2529_v19  ;;  %v2531_v30 = vadd.f32 %v2530_v26, %v2460_v13  ;;  %v3084_v40 = vld [vmem:[#allocation13 + $0x80] sm:$0xff]  ;;  %v3182_v51 = vld [vmem:[#allocation13 + $0x390] sm:$0xff]  ;;  %v3083_v50 = vld [vmem:[#allocation13 + $0x78] sm:$0xff] }
 0x2c6   :  { %2950 = vmatprep.subr.mxu0 %v827_v14  ;;  %3021 = vmatprep.subr.mxu1 %v1019_v17  ;;  %v2601_v45 = vpop.f32.mrf.mxu1  ;;  %v3180_v13 = vld [vmem:[#allocation13 + $0x380] sm:$0xff]  ;;  %v3081_v14 = vld [vmem:[#allocation13 + $0x68] sm:$0xff]  ;;  %v3179_v17 = vld [vmem:[#allocation13 + $0x378] sm:$0xff] }
 0x2c7   :  { %2951 = vmatpush2.msra.mxu0 %v826_v60  ;;  %2952 = vmatprep.mubr.f32.mxu0 %v4654_v10  ;;  %v2602_v36 = vadd.f32 %v2601_v45, %v2531_v30  ;;  %v3108_v10 = vld [vmem:[#allocation13 + $0x140] sm:$0xff]  ;;  %v3177_v60 = vld [vmem:[#allocation13 + $0x368] sm:$0xff]  ;;  %v3078_v20 = vld [vmem:[#allocation13 + $0x50] sm:$0xff] }
 0x2c8   :  { %3022 = vmatpush2.msra.mxu1 %v1018_v28  ;;  %3023 = vmatprep.mubr.f32.mxu1 %v4658_v15  ;;  %v3107_v15 = vld [vmem:[#allocation13 + $0x138] sm:$0xff]  ;;  %v3080_v19 = vld [vmem:[#allocation13 + $0x60] sm:$0xff]  ;;  %v3077_v28 = vld [vmem:[#allocation13 + $0x48] sm:$0xff] }
 0x2c9   :  { %2953 = vmatmul.mubr.f32.vlgmr.msra.gmra.mxu0 %v4645_v59  ;;  %3024 = vmatmul.mubr.f32.vlgmr.msra.gmra.mxu1 %v4650_v1  ;;  %v4705_v41 = vadd.f32 %v3039_v33, %v2602_v36  ;;  %v3105_v59 = vld [vmem:[#allocation13 + $0x128] sm:$0xff]  ;;  %v3203_v1 = vld [vmem:[#allocation13 + $0x438] sm:$0xff]  ;;  %v3176_v26 = vld [vmem:[#allocation13 + $0x360] sm:$0xff] }
 0x2ca   :  { %3373 = vmatprep.subr.mxu0 %v3114_v35  ;;  %3444 = vmatprep.subr.mxu1 %v3210_v37  ;;  %v3174_v30 = vld [vmem:[#allocation13 + $0x350] sm:$0xff]  ;;  %v3075_v33 = vld [vmem:[#allocation13 + $0x38] sm:$0xff]  ;;  %v3173_v45 = vld [vmem:[#allocation13 + $0x348] sm:$0xff] }
 0x2cb   :  { %3374 = vmatpush1.msra.mxu0 %v3113_v38  ;;  %3437 = vmatprep.mubr.f32.mxu0 %v4705_v41  ;;  %v3074_v35 = vld [vmem:[#allocation13 + $0x30] sm:$0xff]  ;;  %v3171_v36 = vld [vmem:[#allocation13 + $0x338] sm:$0xff]  ;;  %v3072_v37 = vld [vmem:[#allocation13 + $0x20] sm:$0xff] }
 0x2cc   :  { %3375 = vmatprep.subr.mxu0 %v3111_v39  ;;  %3445 = vmatpush1.msra.mxu1 %v3209_v42  ;;  %v3170_v38 = vld [vmem:[#allocation13 + $0x330] sm:$0xff]  ;;  %v3071_v39 = vld [vmem:[#allocation13 + $0x18] sm:$0xff]  ;;  %v3168_v42 = vld [vmem:[#allocation13 + $0x320] sm:$0xff] }
 0x2cd   :  { %3376 = vmatpush1.msra.mxu0 %v3110_v24  ;;  %3446 = vmatprep.subr.mxu1 %v3207_v43  ;;  %v3069_v24 = vld [vmem:[#allocation13 + $0x8] sm:$0xff]  ;;  %v3167_v43 = vld [vmem:[#allocation13 + $0x318] sm:$0xff] }
 0x2ce   :  { %3377 = vmatprep.subr.mxu0 %v3108_v10  ;;  %3447 = vmatpush1.msra.mxu1 %v3206_v44  ;;  %v3068_v10 = vld [vmem:[#allocation13] sm:$0xff]  ;;  %v3165_v44 = vld [vmem:[#allocation13 + $0x308] sm:$0xff] }
 0x2cf   :  { %3378 = vmatpush1.msra.mxu0 %v3107_v15  ;;  %3448 = vmatprep.subr.mxu1 %v3204_v22  ;;  %v3162_v15 = vld [vmem:[#allocation13 + $0x2f0] sm:$0xff]  ;;  %v3164_v22 = vld [vmem:[#allocation13 + $0x300] sm:$0xff] }
 0x2d0   :  { %3379 = vmatprep.subr.mxu0 %v3105_v59  ;;  %3449 = vmatpush1.msra.mxu1 %v3203_v1  ;;  %v3161_v59 = vld [vmem:[#allocation13 + $0x2e8] sm:$0xff]  ;;  %v3258_v1 = vld [vmem:[#allocation13 + $0x5f0] sm:$0xff] }
 0x2d1   :  { %3380 = vmatpush1.msra.mxu0 %v3104_v25  ;;  %3450 = vmatprep.subr.mxu1 %v3201_v49  ;;  %v3159_v25 = vld [vmem:[#allocation13 + $0x2d8] sm:$0xff]  ;;  %v3257_v49 = vld [vmem:[#allocation13 + $0x5e8] sm:$0xff] }
 0x2d2   :  { %3381 = vmatprep.subr.mxu0 %v3102_v52  ;;  %3451 = vmatpush1.msra.mxu1 %v3200_v57  ;;  %v3158_v52 = vld [vmem:[#allocation13 + $0x2d0] sm:$0xff]  ;;  %v3255_v57 = vld [vmem:[#allocation13 + $0x5d8] sm:$0xff] }
 0x2d3   :  { %3382 = vmatpush1.msra.mxu0 %v3101_v46  ;;  %3452 = vmatprep.subr.mxu1 %v3198_v34  ;;  %v3156_v46 = vld [vmem:[#allocation13 + $0x2c0] sm:$0xff]  ;;  %v3254_v34 = vld [vmem:[#allocation13 + $0x5d0] sm:$0xff] }
 0x2d4   :  { %3383 = vmatprep.subr.mxu0 %v3099_v53  ;;  %3453 = vmatpush1.msra.mxu1 %v3197_v9  ;;  %v3155_v53 = vld [vmem:[#allocation13 + $0x2b8] sm:$0xff]  ;;  %v3252_v9 = vld [vmem:[#allocation13 + $0x5c0] sm:$0xff] }
 0x2d5   :  { %3384 = vmatpush1.msra.mxu0 %v3098_v54  ;;  %3454 = vmatprep.subr.mxu1 %v3195_v55  ;;  %v3153_v54 = vld [vmem:[#allocation13 + $0x2a8] sm:$0xff]  ;;  %v3251_v55 = vld [vmem:[#allocation13 + $0x5b8] sm:$0xff] }
 0x2d6   :  { %3385 = vmatprep.subr.mxu0 %v3096_v56  ;;  %3455 = vmatpush1.msra.mxu1 %v3194_v18  ;;  %v3152_v56 = vld [vmem:[#allocation13 + $0x2a0] sm:$0xff]  ;;  %v3249_v18 = vld [vmem:[#allocation13 + $0x5a8] sm:$0xff] }
 0x2d7   :  { %3386 = vmatpush1.msra.mxu0 %v3095_v48  ;;  %3456 = vmatprep.subr.mxu1 %v3192_v58  ;;  %v3150_v48 = vld [vmem:[#allocation13 + $0x290] sm:$0xff]  ;;  %v3248_v58 = vld [vmem:[#allocation13 + $0x5a0] sm:$0xff] }
 0x2d8   :  { %3387 = vmatprep.subr.mxu0 %v3093_v32  ;;  %3457 = vmatpush1.msra.mxu1 %v3191_v6  ;;  %v3149_v32 = vld [vmem:[#allocation13 + $0x288] sm:$0xff]  ;;  %v3246_v6 = vld [vmem:[#allocation13 + $0x590] sm:$0xff] }
 0x2d9   :  { %3388 = vmatpush1.msra.mxu0 %v3092_v61  ;;  %3458 = vmatprep.subr.mxu1 %v3189_v62  ;;  %v3147_v61 = vld [vmem:[#allocation13 + $0x278] sm:$0xff]  ;;  %v3245_v62 = vld [vmem:[#allocation13 + $0x588] sm:$0xff] }
 0x2da   :  { %3389 = vmatprep.subr.mxu0 %v3090_v63  ;;  %3459 = vmatpush1.msra.mxu1 %v3188_v2  ;;  %v3146_v63 = vld [vmem:[#allocation13 + $0x270] sm:$0xff]  ;;  %v3243_v2 = vld [vmem:[#allocation13 + $0x578] sm:$0xff] }
 0x2db   :  { %3390 = vmatpush1.msra.mxu0 %v3089_v3  ;;  %3460 = vmatprep.subr.mxu1 %v3186_v4  ;;  %v3144_v3 = vld [vmem:[#allocation13 + $0x260] sm:$0xff]  ;;  %v3242_v4 = vld [vmem:[#allocation13 + $0x570] sm:$0xff] }
 0x2dc   :  { %3391 = vmatprep.subr.mxu0 %v3087_v5  ;;  %3461 = vmatpush1.msra.mxu1 %v3185_v7  ;;  %v3143_v5 = vld [vmem:[#allocation13 + $0x258] sm:$0xff]  ;;  %v3240_v7 = vld [vmem:[#allocation13 + $0x560] sm:$0xff] }
 0x2dd   :  { %3392 = vmatpush1.msra.mxu0 %v3086_v8  ;;  %3462 = vmatprep.subr.mxu1 %v3183_v11  ;;  %v3141_v8 = vld [vmem:[#allocation13 + $0x248] sm:$0xff]  ;;  %v3239_v11 = vld [vmem:[#allocation13 + $0x558] sm:$0xff] }
 0x2de   :  { %3393 = vmatprep.subr.mxu0 %v3084_v40  ;;  %3463 = vmatpush1.msra.mxu1 %v3182_v51  ;;  %v3140_v40 = vld [vmem:[#allocation13 + $0x240] sm:$0xff]  ;;  %v3237_v51 = vld [vmem:[#allocation13 + $0x548] sm:$0xff] }
 0x2df   :  { %3394 = vmatpush1.msra.mxu0 %v3083_v50  ;;  %3464 = vmatprep.subr.mxu1 %v3180_v13  ;;  %v3138_v50 = vld [vmem:[#allocation13 + $0x230] sm:$0xff]  ;;  %v3236_v13 = vld [vmem:[#allocation13 + $0x540] sm:$0xff] }
 0x2e0   :  { %3395 = vmatprep.subr.mxu0 %v3081_v14  ;;  %3465 = vmatpush1.msra.mxu1 %v3179_v17  ;;  %v3137_v14 = vld [vmem:[#allocation13 + $0x228] sm:$0xff]  ;;  %v3234_v17 = vld [vmem:[#allocation13 + $0x530] sm:$0xff] }
 0x2e1   :  { %3396 = vmatpush1.msra.mxu0 %v3080_v19  ;;  %3466 = vmatprep.subr.mxu1 %v3177_v60  ;;  %v3135_v19 = vld [vmem:[#allocation13 + $0x218] sm:$0xff]  ;;  %v3233_v60 = vld [vmem:[#allocation13 + $0x528] sm:$0xff] }
 0x2e2   :  { %3397 = vmatprep.subr.mxu0 %v3078_v20  ;;  %3467 = vmatpush1.msra.mxu1 %v3176_v26  ;;  %v3134_v20 = vld [vmem:[#allocation13 + $0x210] sm:$0xff]  ;;  %v3231_v26 = vld [vmem:[#allocation13 + $0x518] sm:$0xff] }
 0x2e3   :  { %3398 = vmatpush1.msra.mxu0 %v3077_v28  ;;  %3468 = vmatprep.subr.mxu1 %v3174_v30  ;;  %v3132_v28 = vld [vmem:[#allocation13 + $0x200] sm:$0xff]  ;;  %v3230_v30 = vld [vmem:[#allocation13 + $0x510] sm:$0xff] }
 0x2e4   :  { %3399 = vmatprep.subr.mxu0 %v3075_v33  ;;  %3469 = vmatpush1.msra.mxu1 %v3173_v45  ;;  %v3131_v33 = vld [vmem:[#allocation13 + $0x1f8] sm:$0xff]  ;;  %v3228_v45 = vld [vmem:[#allocation13 + $0x500] sm:$0xff] }
 0x2e5   :  { %3400 = vmatpush1.msra.mxu0 %v3074_v35  ;;  %3470 = vmatprep.subr.mxu1 %v3171_v36  ;;  %v3129_v35 = vld [vmem:[#allocation13 + $0x1e8] sm:$0xff]  ;;  %v3227_v36 = vld [vmem:[#allocation13 + $0x4f8] sm:$0xff] }
 0x2e6   :  { %3401 = vmatprep.subr.mxu0 %v3072_v37  ;;  %3471 = vmatpush1.msra.mxu1 %v3170_v38  ;;  %v3128_v37 = vld [vmem:[#allocation13 + $0x1e0] sm:$0xff]  ;;  %v3225_v38 = vld [vmem:[#allocation13 + $0x4e8] sm:$0xff] }
 0x2e7   :  { %3402 = vmatpush1.msra.mxu0 %v3071_v39  ;;  %3472 = vmatprep.subr.mxu1 %v3168_v42  ;;  %v3126_v39 = vld [vmem:[#allocation13 + $0x1d0] sm:$0xff]  ;;  %v3224_v42 = vld [vmem:[#allocation13 + $0x4e0] sm:$0xff] }
 0x2e8   :  { %3403 = vmatprep.subr.mxu0 %v3069_v24  ;;  %3473 = vmatpush1.msra.mxu1 %v3167_v43  ;;  %v3034_v24 = vsub.s32 0, %v4546_v31  ;;  %v3125_v43 = vld [vmem:[#allocation13 + $0x1c8] sm:$0xff] }
 0x2e9   :  { %3404 = vmatpush1.msra.mxu0 %v3068_v10  ;;  %3474 = vmatprep.subr.mxu1 %v3165_v44  ;;  %v3222_v10 = vld [vmem:[#allocation13 + $0x4d0] sm:$0xff]  ;;  %v3123_v44 = vld [vmem:[#allocation13 + $0x1b8] sm:$0xff] }
 0x2ea   :  { %3405 = vmatprep.subr.mxu0 %v3162_v15  ;;  %3475 = vmatpush1.msra.mxu1 %v3164_v22  ;;  %v3221_v15 = vld [vmem:[#allocation13 + $0x4c8] sm:$0xff]  ;;  %v3122_v22 = vld [vmem:[#allocation13 + $0x1b0] sm:$0xff] }
 0x2eb   :  { %3406 = vmatpush2.msra.mxu0 %v3161_v59  ;;  %3476 = vmatprep.subr.mxu1 %v3258_v1  ;;  %v3219_v59 = vld [vmem:[#allocation13 + $0x4b8] sm:$0xff]  ;;  %v3120_v1 = vld [vmem:[#allocation13 + $0x1a0] sm:$0xff] }
 0x2ec   :  { %3407 = vmatprep.subr.mxu0 %v3159_v25  ;;  %3477 = vmatpush2.msra.mxu1 %v3257_v49  ;;  %v3218_v25 = vld [vmem:[#allocation13 + $0x4b0] sm:$0xff]  ;;  %v3035_v49 = vrot.slane %v4694_v21, %v3034_v24 }
 0x2ed   :  { %3408 = vmatpush2.msra.mxu0 %v3158_v52  ;;  %3478 = vmatprep.subr.mxu1 %v3255_v57  ;;  %v3119_v52 = vld [vmem:[#allocation13 + $0x198] sm:$0xff]  ;;  %v3216_v57 = vld [vmem:[#allocation13 + $0x4a0] sm:$0xff] }
 0x2ee   :  { %3409 = vmatprep.subr.mxu0 %v3156_v46  ;;  %3479 = vmatpush2.msra.mxu1 %v3254_v34  ;;  %v3117_v46 = vld [vmem:[#allocation13 + $0x188] sm:$0xff]  ;;  %v3215_v34 = vld [vmem:[#allocation13 + $0x498] sm:$0xff] }
 0x2ef   :  { %3410 = vmatpush2.msra.mxu0 %v3155_v53  ;;  %3480 = vmatprep.subr.mxu1 %v3252_v9  ;;  %v3116_v53 = vld [vmem:[#allocation13 + $0x180] sm:$0xff]  ;;  %v3213_v9 = vld [vmem:[#allocation13 + $0x488] sm:$0xff] }
 0x2f0   :  { %3411 = vmatprep.subr.mxu0 %v3153_v54  ;;  %3481 = vmatpush2.msra.mxu1 %v3251_v55  ;;  %v3212_v54 = vld [vmem:[#allocation13 + $0x480] sm:$0xff]  ;;  %v4713_v55 = vadd.f32 %v3035_v49, %v4696_v29  ;;  %v3297_v29 = vld [vmem:[#allocation13 + $0x728] sm:$0xff] }
 0x2f1   :  { %3412 = vmatpush2.msra.mxu0 %v3152_v56  ;;  %3482 = vmatprep.subr.mxu1 %v3249_v18  ;;  %v3163_v56 = vld [vmem:[#allocation13 + $0x2f8] sm:$0xff]  ;;  %v3306_v18 = vld [vmem:[#allocation13 + $0x770] sm:$0xff]  ;;  %v3336_v49 = vld [vmem:[#allocation13 + $0x860] sm:$0xff] }
 0x2f2   :  { %3413 = vmatprep.subr.mxu0 %v3150_v48  ;;  %3483 = vmatpush2.msra.mxu1 %v3248_v58  ;;  %v3305_v48 = vld [vmem:[#allocation13 + $0x768] sm:$0xff]  ;;  %v3303_v58 = vld [vmem:[#allocation13 + $0x758] sm:$0xff] }
 0x2f3   :  { %3414 = vmatpush2.msra.mxu0 %v3149_v32  ;;  %3484 = vmatprep.subr.mxu1 %v3246_v6  ;;  %v3302_v32 = vld [vmem:[#allocation13 + $0x750] sm:$0xff]  ;;  %v3300_v6 = vld [vmem:[#allocation13 + $0x740] sm:$0xff] }
 0x2f4   :  { %3415 = vmatprep.subr.mxu0 %v3147_v61  ;;  %3485 = vmatpush2.msra.mxu1 %v3245_v62  ;;  %v3299_v61 = vld [vmem:[#allocation13 + $0x738] sm:$0xff]  ;;  %v3296_v62 = vld [vmem:[#allocation13 + $0x720] sm:$0xff] }
 0x2f5   :  { %3416 = vmatpush2.msra.mxu0 %v3146_v63  ;;  %3486 = vmatprep.subr.mxu1 %v3243_v2  ;;  %v3294_v63 = vld [vmem:[#allocation13 + $0x710] sm:$0xff]  ;;  %v3293_v2 = vld [vmem:[#allocation13 + $0x708] sm:$0xff] }
 0x2f6   :  { %3417 = vmatprep.subr.mxu0 %v3144_v3  ;;  %3487 = vmatpush2.msra.mxu1 %v3242_v4  ;;  %v3291_v3 = vld [vmem:[#allocation13 + $0x6f8] sm:$0xff]  ;;  %v3290_v4 = vld [vmem:[#allocation13 + $0x6f0] sm:$0xff] }
 0x2f7   :  { %3418 = vmatpush2.msra.mxu0 %v3143_v5  ;;  %3488 = vmatprep.subr.mxu1 %v3240_v7  ;;  %v3288_v5 = vld [vmem:[#allocation13 + $0x6e0] sm:$0xff]  ;;  %v3287_v7 = vld [vmem:[#allocation13 + $0x6d8] sm:$0xff] }
 0x2f8   :  { %3419 = vmatprep.subr.mxu0 %v3141_v8  ;;  %3489 = vmatpush2.msra.mxu1 %v3239_v11  ;;  %v3285_v8 = vld [vmem:[#allocation13 + $0x6c8] sm:$0xff]  ;;  %v3284_v11 = vld [vmem:[#allocation13 + $0x6c0] sm:$0xff] }
 0x2f9   :  { %3420 = vmatpush2.msra.mxu0 %v3140_v40  ;;  %3490 = vmatprep.subr.mxu1 %v3237_v51  ;;  %v3282_v40 = vld [vmem:[#allocation13 + $0x6b0] sm:$0xff]  ;;  %v3281_v51 = vld [vmem:[#allocation13 + $0x6a8] sm:$0xff] }
 0x2fa   :  { %3421 = vmatprep.subr.mxu0 %v3138_v50  ;;  %3491 = vmatpush2.msra.mxu1 %v3236_v13  ;;  %v3279_v50 = vld [vmem:[#allocation13 + $0x698] sm:$0xff]  ;;  %v3278_v13 = vld [vmem:[#allocation13 + $0x690] sm:$0xff] }
 0x2fb   :  { %3422 = vmatpush2.msra.mxu0 %v3137_v14  ;;  %3492 = vmatprep.subr.mxu1 %v3234_v17  ;;  %v3276_v14 = vld [vmem:[#allocation13 + $0x680] sm:$0xff]  ;;  %v3275_v17 = vld [vmem:[#allocation13 + $0x678] sm:$0xff] }
 0x2fc   :  { %3423 = vmatprep.subr.mxu0 %v3135_v19  ;;  %3493 = vmatpush2.msra.mxu1 %v3233_v60  ;;  %v3273_v19 = vld [vmem:[#allocation13 + $0x668] sm:$0xff]  ;;  %v3272_v60 = vld [vmem:[#allocation13 + $0x660] sm:$0xff] }
 0x2fd   :  { %3424 = vmatpush2.msra.mxu0 %v3134_v20  ;;  %3494 = vmatprep.subr.mxu1 %v3231_v26  ;;  %v3270_v20 = vld [vmem:[#allocation13 + $0x650] sm:$0xff]  ;;  %v3269_v26 = vld [vmem:[#allocation13 + $0x648] sm:$0xff] }
 0x2fe   :  { %3425 = vmatprep.subr.mxu0 %v3132_v28  ;;  %3495 = vmatpush2.msra.mxu1 %v3230_v30  ;;  %v3267_v28 = vld [vmem:[#allocation13 + $0x638] sm:$0xff]  ;;  %v3266_v30 = vld [vmem:[#allocation13 + $0x630] sm:$0xff] }
 0x2ff   :  { %3426 = vmatpush2.msra.mxu0 %v3131_v33  ;;  %3496 = vmatprep.subr.mxu1 %v3228_v45  ;;  %v3264_v33 = vld [vmem:[#allocation13 + $0x620] sm:$0xff]  ;;  %v3263_v45 = vld [vmem:[#allocation13 + $0x618] sm:$0xff] }
 0x300   :  { %3427 = vmatprep.subr.mxu0 %v3129_v35  ;;  %3497 = vmatpush2.msra.mxu1 %v3227_v36  ;;  %v3261_v35 = vld [vmem:[#allocation13 + $0x608] sm:$0xff]  ;;  %v3260_v36 = vld [vmem:[#allocation13 + $0x600] sm:$0xff] }
 0x301   :  { %3428 = vmatpush2.msra.mxu0 %v3128_v37  ;;  %3498 = vmatprep.subr.mxu1 %v3225_v38  ;;  %v3354_v37 = vld [vmem:[#allocation13 + $0x8f0] sm:$0xff]  ;;  %v3353_v38 = vld [vmem:[#allocation13 + $0x8e8] sm:$0xff] }
 0x302   :  { %3429 = vmatprep.subr.mxu0 %v3126_v39  ;;  %3499 = vmatpush2.msra.mxu1 %v3224_v42  ;;  %v3351_v39 = vld [vmem:[#allocation13 + $0x8d8] sm:$0xff]  ;;  %v3350_v42 = vld [vmem:[#allocation13 + $0x8d0] sm:$0xff] }
 0x303   :  { %3430 = vmatpush2.msra.mxu0 %v3125_v43  ;;  %3500 = vmatprep.subr.mxu1 %v3222_v10  ;;  %v3348_v43 = vld [vmem:[#allocation13 + $0x8c0] sm:$0xff]  ;;  %v3347_v10 = vld [vmem:[#allocation13 + $0x8b8] sm:$0xff] }
 0x304   :  { %3431 = vmatprep.subr.mxu0 %v3123_v44  ;;  %3501 = vmatpush2.msra.mxu1 %v3221_v15  ;;  %v3345_v44 = vld [vmem:[#allocation13 + $0x8a8] sm:$0xff]  ;;  %v3344_v15 = vld [vmem:[#allocation13 + $0x8a0] sm:$0xff] }
 0x305   :  { %3432 = vmatpush2.msra.mxu0 %v3122_v22  ;;  %3502 = vmatprep.subr.mxu1 %v3219_v59  ;;  %v3342_v22 = vld [vmem:[#allocation13 + $0x890] sm:$0xff]  ;;  %v3341_v59 = vld [vmem:[#allocation13 + $0x888] sm:$0xff] }
 0x306   :  { %3433 = vmatprep.subr.mxu0 %v3120_v1  ;;  %3503 = vmatpush2.msra.mxu1 %v3218_v25  ;;  %v3339_v1 = vld [vmem:[#allocation13 + $0x878] sm:$0xff]  ;;  %v3338_v25 = vld [vmem:[#allocation13 + $0x870] sm:$0xff] }
 0x307   :  { %3434 = vmatpush2.msra.mxu0 %v3119_v52  ;;  %3504 = vmatprep.subr.mxu1 %v3216_v57  ;;  %v3335_v52 = vld [vmem:[#allocation13 + $0x858] sm:$0xff]  ;;  %v3333_v57 = vld [vmem:[#allocation13 + $0x848] sm:$0xff] }
 0x308   :  { %3435 = vmatprep.subr.mxu0 %v3117_v46  ;;  %3505 = vmatpush2.msra.mxu1 %v3215_v34  ;;  %v3332_v46 = vld [vmem:[#allocation13 + $0x840] sm:$0xff]  ;;  %v3330_v34 = vld [vmem:[#allocation13 + $0x830] sm:$0xff] }
 0x309   :  { %3436 = vmatpush2.msra.mxu0 %v3116_v53  ;;  %3506 = vmatprep.subr.mxu1 %v3213_v9  ;;  %v3329_v53 = vld [vmem:[#allocation13 + $0x828] sm:$0xff]  ;;  %v3327_v9 = vld [vmem:[#allocation13 + $0x818] sm:$0xff] }
 0x30a   :  { %3438 = vmatmul.mubr.f32.vlgmr.msra.gmra.mxu0 %v4713_v55  ;;  %3507 = vmatpush2.msra.mxu1 %v3212_v54  ;;  %v3326_v54 = vld [vmem:[#allocation13 + $0x810] sm:$0xff] }
 0x30b   :  { %4012 = vmatprep.subr.mxu1 %v3163_v56  ;;  %3515 = vmatprep.subr.mxu0 %v3306_v18  ;;  %v3324_v56 = vld [vmem:[#allocation13 + $0x800] sm:$0xff]  ;;  %v2670_v18 = vpop.f32.mrf.mxu0 }
 0x30c   :  { %3516 = vmatpush1.msra.mxu0 %v3305_v48  ;;  %v3323_v48 = vld [vmem:[#allocation13 + $0x7f8] sm:$0xff] }
 0x30d   :  { %3517 = vmatprep.subr.mxu0 %v3303_v58  ;;  %v3321_v58 = vld [vmem:[#allocation13 + $0x7e8] sm:$0xff] }
 0x30e   :  { %3518 = vmatpush1.msra.mxu0 %v3302_v32  ;;  %v3320_v32 = vld [vmem:[#allocation13 + $0x7e0] sm:$0xff] }
 0x30f   :  { %3519 = vmatprep.subr.mxu0 %v3300_v6  ;;  %v3318_v6 = vld [vmem:[#allocation13 + $0x7d0] sm:$0xff] }
 0x310   :  { %3520 = vmatpush1.msra.mxu0 %v3299_v61  ;;  %v2741_v61 = vpop.f32.mrf.mxu1 }
 0x311   :  { %3521 = vmatprep.subr.mxu0 %v3297_v29  ;;  %v2672_v29 = vpop.f32.mrf.mxu0 }
 0x312   :  { %3522 = vmatpush1.msra.mxu0 %v3296_v62  ;;  %v3317_v62 = vld [vmem:[#allocation13 + $0x7c8] sm:$0xff] }
 0x313   :  { %3523 = vmatprep.subr.mxu0 %v3294_v63  ;;  %v3315_v63 = vld [vmem:[#allocation13 + $0x7b8] sm:$0xff] }
 0x314   :  { %3524 = vmatpush1.msra.mxu0 %v3293_v2  ;;  %v2671_v2 = vadd.f32 %v2670_v18, %v4660_v16  ;;  %v3121_v18 = vld [vmem:[#allocation13 + $0x1a8] sm:$0xff] }
 0x315   :  { %3525 = vmatprep.subr.mxu0 %v3291_v3  ;;  %v3314_v3 = vld [vmem:[#allocation13 + $0x7b0] sm:$0xff] }
 0x316   :  { %3526 = vmatpush1.msra.mxu0 %v3290_v4  ;;  %v2673_v4 = vadd.f32 %v2672_v29, %v4663_v23  ;;  %v3355_v23 = vld [vmem:[#allocation13 + $0x8f8] sm:$0xff]  ;;  %v3256_v29 = vld [vmem:[#allocation13 + $0x5e0] sm:$0xff] }
 0x317   :  { %3527 = vmatprep.subr.mxu0 %v3288_v5  ;;  %v3046_v5 = vsub.s32 3, %v4546_v31 }
 0x318   :  { %3528 = vmatpush1.msra.mxu0 %v3287_v7  ;;  %v3312_v7 = vld [vmem:[#allocation13 + $0x7a0] sm:$0xff] }
 0x319   :  { %3529 = vmatprep.subr.mxu0 %v3285_v8  ;;  %v2743_v8 = vpop.f32.mrf.mxu1 }
 0x31a   :  { %3530 = vmatpush1.msra.mxu0 %v3284_v11  ;;  %v3042_v11 = vsub.s32 2, %v4546_v31  ;;  %v2744_v16 = vadd.f32 %v2743_v8, %v2673_v4  ;;  %v3202_v4 = vld [vmem:[#allocation13 + $0x430] sm:$0xff]  ;;  %v3244_v8 = vld [vmem:[#allocation13 + $0x580] sm:$0xff] }
 0x31b   :  { %3531 = vmatprep.subr.mxu0 %v3282_v40  ;;  %v3311_v40 = vld [vmem:[#allocation13 + $0x798] sm:$0xff] }
 0x31c   :  { %3532 = vmatpush1.msra.mxu0 %v3281_v51  ;;  %v3309_v51 = vld [vmem:[#allocation13 + $0x788] sm:$0xff] }
 0x31d   :  { %3533 = vmatprep.subr.mxu0 %v3279_v50  ;;  %v2742_v50 = vadd.f32 %v2741_v61, %v2671_v2  ;;  %v3211_v61 = vld [vmem:[#allocation13 + $0x478] sm:$0xff]  ;;  %v3205_v2 = vld [vmem:[#allocation13 + $0x448] sm:$0xff] }
 0x31e   :  { %3534 = vmatpush1.msra.mxu0 %v3278_v13 }
 0x31f   :  { %3535 = vmatprep.subr.mxu0 %v3276_v14  ;;  %v3308_v14 = vld [vmem:[#allocation13 + $0x780] sm:$0xff] }
 0x320   :  { %3536 = vmatpush1.msra.mxu0 %v3275_v17  ;;  %v3047_v17 = vrot.slane %v4694_v21, %v3046_v5  ;;  %v3247_v5 = vld [vmem:[#allocation13 + $0x598] sm:$0xff] }
 0x321   :  { %3537 = vmatprep.subr.mxu0 %v3273_v19 }
 0x322   :  { %3538 = vmatpush1.msra.mxu0 %v3272_v60  ;;  %v3043_v60 = vrot.slane %v4694_v21, %v3042_v11  ;;  %v3157_v21 = vld [vmem:[#allocation13 + $0x2c8] sm:$0xff] }
 0x323   :  { %3539 = vmatprep.subr.mxu0 %v3270_v20 }
 0x324   :  { %3540 = vmatpush1.msra.mxu0 %v3269_v26 }
 0x325   :  { %3541 = vmatprep.subr.mxu0 %v3267_v28 }
 0x326   :  { %3542 = vmatpush1.msra.mxu0 %v3266_v30 }
 0x327   :  { %3543 = vmatprep.subr.mxu0 %v3264_v33  ;;  %v3115_v33 = vld [vmem:[#allocation13 + $0x178] sm:$0xff] }
 0x328   :  { %3544 = vmatpush1.msra.mxu0 %v3263_v45  ;;  %v3160_v45 = vld [vmem:[#allocation13 + $0x2e0] sm:$0xff] }
 0x329   :  { %3545 = vmatprep.subr.mxu0 %v3261_v35  ;;  %v3112_v35 = vld [vmem:[#allocation13 + $0x160] sm:$0xff] }
 0x32a   :  { %3546 = vmatpush1.msra.mxu0 %v3260_v36  ;;  %v3109_v36 = vld [vmem:[#allocation13 + $0x148] sm:$0xff] }
 0x32b   :  { %3547 = vmatprep.subr.mxu0 %v3354_v37  ;;  %v3154_v37 = vld [vmem:[#allocation13 + $0x2b0] sm:$0xff] }
 0x32c   :  { %3548 = vmatpush2.msra.mxu0 %v3353_v38  ;;  %v3106_v38 = vld [vmem:[#allocation13 + $0x130] sm:$0xff] }
 0x32d   :  { %3549 = vmatprep.subr.mxu0 %v3351_v39  ;;  %v3151_v39 = vld [vmem:[#allocation13 + $0x298] sm:$0xff] }
 0x32e   :  { %3550 = vmatpush2.msra.mxu0 %v3350_v42  ;;  %v3103_v42 = vld [vmem:[#allocation13 + $0x118] sm:$0xff] }
 0x32f   :  { %3551 = vmatprep.subr.mxu0 %v3348_v43  ;;  %v3148_v43 = vld [vmem:[#allocation13 + $0x280] sm:$0xff] }
 0x330   :  { %3552 = vmatpush2.msra.mxu0 %v3347_v10  ;;  %v3100_v10 = vld [vmem:[#allocation13 + $0x100] sm:$0xff] }
 0x331   :  { %3553 = vmatprep.subr.mxu0 %v3345_v44  ;;  %v3145_v44 = vld [vmem:[#allocation13 + $0x268] sm:$0xff] }
 0x332   :  { %3554 = vmatpush2.msra.mxu0 %v3344_v15  ;;  %v3097_v15 = vld [vmem:[#allocation13 + $0xe8] sm:$0xff] }
 0x333   :  { %3555 = vmatprep.subr.mxu0 %v3342_v22  ;;  %v3094_v22 = vld [vmem:[#allocation13 + $0xd0] sm:$0xff] }
 0x334   :  { %3556 = vmatpush2.msra.mxu0 %v3341_v59  ;;  %v3139_v59 = vld [vmem:[#allocation13 + $0x238] sm:$0xff] }
 0x335   :  { %3557 = vmatprep.subr.mxu0 %v3339_v1  ;;  %v3091_v1 = vld [vmem:[#allocation13 + $0xb8] sm:$0xff] }
 0x336   :  { %3558 = vmatpush2.msra.mxu0 %v3338_v25  ;;  %v3136_v25 = vld [vmem:[#allocation13 + $0x220] sm:$0xff] }
 0x337   :  { %3559 = vmatprep.subr.mxu0 %v3336_v49  ;;  %v3088_v49 = vld [vmem:[#allocation13 + $0xa0] sm:$0xff] }
 0x338   :  { %3560 = vmatpush2.msra.mxu0 %v3335_v52  ;;  %v3133_v52 = vld [vmem:[#allocation13 + $0x208] sm:$0xff] }
 0x339   :  { %3561 = vmatprep.subr.mxu0 %v3333_v57  ;;  %v3085_v57 = vld [vmem:[#allocation13 + $0x88] sm:$0xff] }
 0x33a   :  { %3562 = vmatpush2.msra.mxu0 %v3332_v46  ;;  %v3130_v46 = vld [vmem:[#allocation13 + $0x1f0] sm:$0xff] }
 0x33b   :  { %3563 = vmatprep.subr.mxu0 %v3330_v34  ;;  %v3082_v34 = vld [vmem:[#allocation13 + $0x70] sm:$0xff] }
 0x33c   :  { %3564 = vmatpush2.msra.mxu0 %v3329_v53  ;;  %v3127_v53 = vld [vmem:[#allocation13 + $0x1d8] sm:$0xff] }
 0x33d   :  { %3565 = vmatprep.subr.mxu0 %v3327_v9  ;;  %v3079_v9 = vld [vmem:[#allocation13 + $0x58] sm:$0xff] }
 0x33e   :  { %3566 = vmatpush2.msra.mxu0 %v3326_v54  ;;  %v3124_v54 = vld [vmem:[#allocation13 + $0x1c0] sm:$0xff] }
 0x33f   :  { %3567 = vmatprep.subr.mxu0 %v3324_v56  ;;  %v3076_v56 = vld [vmem:[#allocation13 + $0x40] sm:$0xff] }
 0x340   :  { %3568 = vmatpush2.msra.mxu0 %v3323_v48  ;;  %v3073_v48 = vld [vmem:[#allocation13 + $0x28] sm:$0xff] }
 0x341   :  { %3569 = vmatprep.subr.mxu0 %v3321_v58  ;;  %v3118_v58 = vld [vmem:[#allocation13 + $0x190] sm:$0xff] }
 0x342   :  { %3570 = vmatpush2.msra.mxu0 %v3320_v32  ;;  %v3070_v32 = vld [vmem:[#allocation13 + $0x10] sm:$0xff] }
 0x343   :  { %3571 = vmatprep.subr.mxu0 %v3318_v6  ;;  %v3259_v6 = vld [vmem:[#allocation13 + $0x5f8] sm:$0xff] }
 0x344   :  { %3572 = vmatpush2.msra.mxu0 %v3317_v62  ;;  %v3208_v62 = vld [vmem:[#allocation13 + $0x460] sm:$0xff] }
 0x345   :  { %3573 = vmatprep.subr.mxu0 %v3315_v63  ;;  %v3253_v63 = vld [vmem:[#allocation13 + $0x5c8] sm:$0xff] }
 0x346   :  { %3574 = vmatpush2.msra.mxu0 %v3314_v3  ;;  %v3250_v3 = vld [vmem:[#allocation13 + $0x5b0] sm:$0xff] }
 0x347   :  { %v2812_v13 = vpop.f32.mrf.mxu0  ;;  %3575 = vmatprep.subr.mxu0 %v3312_v7  ;;  %v3199_v7 = vld [vmem:[#allocation13 + $0x418] sm:$0xff] }
 0x348   :  { %3576 = vmatpush2.msra.mxu0 %v3311_v40  ;;  %v2813_v19 = vadd.f32 %v2812_v13, %v2742_v50  ;;  %v3241_v40 = vld [vmem:[#allocation13 + $0x568] sm:$0xff]  ;;  %v3238_v50 = vld [vmem:[#allocation13 + $0x550] sm:$0xff] }
 0x349   :  { %v2814_v20 = vpop.f32.mrf.mxu0  ;;  %3577 = vmatprep.subr.mxu0 %v3309_v51  ;;  %v3193_v51 = vld [vmem:[#allocation13 + $0x3e8] sm:$0xff]  ;;  %v3190_v13 = vld [vmem:[#allocation13 + $0x3d0] sm:$0xff] }
 0x34a   :  { %v2815_v26 = vadd.f32 %v2814_v20, %v2744_v16  ;;  %3578 = vmatpush2.msra.mxu0 %v3308_v14  ;;  %v4726_v30 = vadd.f32 %v3043_v60, %v2813_v19  ;;  %v3235_v14 = vld [vmem:[#allocation13 + $0x538] sm:$0xff]  ;;  %v3229_v19 = vld [vmem:[#allocation13 + $0x508] sm:$0xff]  ;;  %v3226_v20 = vld [vmem:[#allocation13 + $0x4f0] sm:$0xff] }
 0x34b   :  { %4082 = vmatprep.subr.mxu0 %v3355_v23  ;;  %v3187_v16 = vld [vmem:[#allocation13 + $0x3b8] sm:$0xff]  ;;  %v3184_v23 = vld [vmem:[#allocation13 + $0x3a0] sm:$0xff]  ;;  %v3181_v60 = vld [vmem:[#allocation13 + $0x388] sm:$0xff] }
 0x34c   :  { %v4724_v28 = vadd.f32 %v3047_v17, %v2815_v26  ;;  %v3232_v17 = vld [vmem:[#allocation13 + $0x520] sm:$0xff]  ;;  %v2883_v26 = vpop.f32.mrf.mxu1 }
 0x34e   :  { %3508 = vmatprep.mubr.f32.mxu1 %v4724_v28 }
 0x34f   :  { %3509 = vmatmul.mubr.f32.vlgmr.msra.gmra.mxu1 %v4726_v30 }
 0x350   :  { %4013 = vmatpush3.msra.mxu1 %v3115_v33  ;;  %3650 = vmatprep.mubr.f32.mxu1 %v4705_v41  ;;  %v3142_v41 = vld [vmem:[#allocation13 + $0x250] sm:$0xff]  ;;  %v3223_v33 = vld [vmem:[#allocation13 + $0x4d8] sm:$0xff] }
 0x351   :  { %4014 = vmatprep.subr.mxu1 %v3160_v45  ;;  %v3175_v45 = vld [vmem:[#allocation13 + $0x358] sm:$0xff] }
 0x352   :  { %4015 = vmatpush3.msra.mxu1 %v3112_v35  ;;  %v3220_v35 = vld [vmem:[#allocation13 + $0x4c0] sm:$0xff] }
 0x353   :  { %4016 = vmatprep.subr.mxu1 %v3157_v21  ;;  %v2885_v21 = vpop.f32.mrf.mxu1 }
 0x354   :  { %4017 = vmatpush3.msra.mxu1 %v3109_v36  ;;  %v3172_v36 = vld [vmem:[#allocation13 + $0x340] sm:$0xff] }
 0x355   :  { %4018 = vmatprep.subr.mxu1 %v3154_v37  ;;  %v2884_v37 = vadd.f32 %v2883_v26, %v4677_v27  ;;  %v4223_v27 = vld [vmem:[#allocation12] sm:$0x3f] }
 0x356   :  { %4019 = vmatpush3.msra.mxu1 %v3106_v38  ;;  %v3054_v38 = vsub.s32 5, %v4546_v31  ;;  %v3827_v26 = vld [vmem:[#allocation16 + $0xf8] sm:$0xff] }
 0x357   :  { %4020 = vmatprep.subr.mxu1 %v3151_v39  ;;  %v3217_v39 = vld [vmem:[#allocation13 + $0x4a8] sm:$0xff] }
 0x358   :  { %4021 = vmatpush3.msra.mxu1 %v3103_v42 }
 0x359   :  { %4022 = vmatprep.subr.mxu1 %v3148_v43 }
 0x35a   :  { %4023 = vmatpush3.msra.mxu1 %v3100_v10  ;;  %v3050_v10 = vsub.s32 4, %v4546_v31 }
 0x35b   :  { %4024 = vmatprep.subr.mxu1 %v3145_v44  ;;  %v3169_v44 = vld [vmem:[#allocation13 + $0x328] sm:$0xff] }
 0x35c   :  { %4025 = vmatpush3.msra.mxu1 %v3097_v15  ;;  %v2886_v15 = vadd.f32 %v2885_v21, %v4683_v47  ;;  %v3809_v21 = vld [vmem:[#allocation16 + $0x68] sm:$0xff] }
 0x35d   :  { %4026 = vmatprep.subr.mxu1 %v3142_v41 }
 0x35e   :  { %4027 = vmatpush3.msra.mxu1 %v3094_v22  ;;  %v3214_v22 = vld [vmem:[#allocation13 + $0x490] sm:$0xff] }
 0x35f   :  { %4028 = vmatprep.subr.mxu1 %v3139_v59 }
 0x360   :  { %4029 = vmatpush3.msra.mxu1 %v3091_v1  ;;  %v3166_v1 = vld [vmem:[#allocation13 + $0x310] sm:$0xff] }
 0x361   :  { %4030 = vmatprep.subr.mxu1 %v3136_v25 }
 0x362   :  { %4031 = vmatpush3.msra.mxu1 %v3088_v49  ;;  %v3055_v49 = vrot.slane %v4223_v27, %v3054_v38  ;;  %v3823_v38 = vld [vmem:[#allocation16 + $0xd8] sm:$0xff] }
 0x363   :  { %4032 = vmatprep.subr.mxu1 %v3133_v52 }
 0x364   :  { %4033 = vmatpush3.msra.mxu1 %v3085_v57  ;;  %v3051_v57 = vrot.slane %v4223_v27, %v3050_v10  ;;  %v3821_v10 = vld [vmem:[#allocation16 + $0xc8] sm:$0xff] }
 0x365   :  { %4034 = vmatprep.subr.mxu1 %v3130_v46  ;;  %v3817_v27 = vld [vmem:[#allocation16 + $0xa8] sm:$0xff] }
 0x366   :  { %4035 = vmatpush3.msra.mxu1 %v3082_v34 }
 0x367   :  { %4036 = vmatprep.subr.mxu1 %v3127_v53 }
 0x368   :  { %4037 = vmatpush3.msra.mxu1 %v3079_v9  ;;  %v3307_v9 = vld [vmem:[#allocation13 + $0x778] sm:$0xff] }
 0x369   :  { %4038 = vmatprep.subr.mxu1 %v3124_v54  ;;  %v3352_v54 = vld [vmem:[#allocation13 + $0x8e0] sm:$0xff] }
 0x36a   :  { %4039 = vmatpush3.msra.mxu1 %v3076_v56  ;;  %v3304_v56 = vld [vmem:[#allocation13 + $0x760] sm:$0xff] }
 0x36b   :  { %4040 = vmatprep.subr.mxu1 %v3121_v18  ;;  %v3349_v18 = vld [vmem:[#allocation13 + $0x8c8] sm:$0xff] }
 0x36c   :  { %4041 = vmatpush3.msra.mxu1 %v3073_v48  ;;  %v3301_v48 = vld [vmem:[#allocation13 + $0x748] sm:$0xff] }
 0x36d   :  { %4042 = vmatprep.subr.mxu1 %v3118_v58  ;;  %v3346_v58 = vld [vmem:[#allocation13 + $0x8b0] sm:$0xff] }
 0x36e   :  { %4043 = vmatpush3.msra.mxu1 %v3070_v32  ;;  %v3298_v32 = vld [vmem:[#allocation13 + $0x730] sm:$0xff] }
 0x36f   :  { %3651 = vmatmul.mubr.f32.vlgmr.msra.gmra.mxu1 %v4713_v55  ;;  %4047 = vmatprep.subr.mxu1 %v3259_v6  ;;  %v3196_v55 = vld [vmem:[#allocation13 + $0x400] sm:$0xff]  ;;  %v3295_v6 = vld [vmem:[#allocation13 + $0x718] sm:$0xff] }
 0x370   :  { %4048 = vmatpush3.msra.mxu1 %v3211_v61  ;;  %3720 = vmatprep.mubr.f32.mxu1 %v4724_v28  ;;  %v3178_v28 = vld [vmem:[#allocation13 + $0x370] sm:$0xff]  ;;  %v3340_v61 = vld [vmem:[#allocation13 + $0x880] sm:$0xff] }
 0x371   :  { %4049 = vmatprep.subr.mxu1 %v3256_v29  ;;  %v3292_v29 = vld [vmem:[#allocation13 + $0x700] sm:$0xff] }
 0x372   :  { %4050 = vmatpush3.msra.mxu1 %v3208_v62  ;;  %v3337_v62 = vld [vmem:[#allocation13 + $0x868] sm:$0xff] }
 0x373   :  { %4051 = vmatprep.subr.mxu1 %v3253_v63  ;;  %v3289_v63 = vld [vmem:[#allocation13 + $0x6e8] sm:$0xff] }
 0x374   :  { %4052 = vmatpush3.msra.mxu1 %v3205_v2  ;;  %v3334_v2 = vld [vmem:[#allocation13 + $0x850] sm:$0xff] }
 0x375   :  { %4053 = vmatprep.subr.mxu1 %v3250_v3  ;;  %v3286_v3 = vld [vmem:[#allocation13 + $0x6d0] sm:$0xff] }
 0x376   :  { %4054 = vmatpush3.msra.mxu1 %v3202_v4  ;;  %v3331_v4 = vld [vmem:[#allocation13 + $0x838] sm:$0xff] }
 0x377   :  { %4055 = vmatprep.subr.mxu1 %v3247_v5  ;;  %v3283_v5 = vld [vmem:[#allocation13 + $0x6b8] sm:$0xff] }
 0x378   :  { %4056 = vmatpush3.msra.mxu1 %v3199_v7  ;;  %v3328_v7 = vld [vmem:[#allocation13 + $0x820] sm:$0xff] }
 0x379   :  { %4057 = vmatprep.subr.mxu1 %v3244_v8  ;;  %v3280_v8 = vld [vmem:[#allocation13 + $0x6a0] sm:$0xff] }
 0x37a   :  { %4058 = vmatpush3.msra.mxu1 %v3196_v55  ;;  %v3325_v55 = vld [vmem:[#allocation13 + $0x808] sm:$0xff] }
 0x37b   :  { %4059 = vmatprep.subr.mxu1 %v3241_v40  ;;  %v3277_v40 = vld [vmem:[#allocation13 + $0x688] sm:$0xff] }
 0x37c   :  { %4060 = vmatpush3.msra.mxu1 %v3193_v51  ;;  %v3322_v51 = vld [vmem:[#allocation13 + $0x7f0] sm:$0xff] }
 0x37d   :  { %4061 = vmatprep.subr.mxu1 %v3238_v50  ;;  %v3274_v50 = vld [vmem:[#allocation13 + $0x670] sm:$0xff] }
 0x37e   :  { %4062 = vmatpush3.msra.mxu1 %v3190_v13  ;;  %v3319_v13 = vld [vmem:[#allocation13 + $0x7d8] sm:$0xff] }
 0x37f   :  { %4063 = vmatprep.subr.mxu1 %v3235_v14  ;;  %v3271_v14 = vld [vmem:[#allocation13 + $0x658] sm:$0xff] }
 0x380   :  { %4064 = vmatpush3.msra.mxu1 %v3187_v16  ;;  %v3316_v16 = vld [vmem:[#allocation13 + $0x7c0] sm:$0xff] }
 0x381   :  { %4065 = vmatprep.subr.mxu1 %v3232_v17  ;;  %v3268_v17 = vld [vmem:[#allocation13 + $0x640] sm:$0xff] }
 0x382   :  { %4066 = vmatpush3.msra.mxu1 %v3184_v23  ;;  %v3313_v23 = vld [vmem:[#allocation13 + $0x7a8] sm:$0xff] }
 0x383   :  { %4067 = vmatprep.subr.mxu1 %v3229_v19  ;;  %v3265_v19 = vld [vmem:[#allocation13 + $0x628] sm:$0xff] }
 0x384   :  { %4068 = vmatpush3.msra.mxu1 %v3181_v60  ;;  %v3310_v60 = vld [vmem:[#allocation13 + $0x790] sm:$0xff] }
 0x385   :  { %4069 = vmatprep.subr.mxu1 %v3226_v20  ;;  %v3262_v20 = vld [vmem:[#allocation13 + $0x610] sm:$0xff] }
 0x386   :  { %4070 = vmatpush3.msra.mxu1 %v3178_v28  ;;  %v3811_v28 = vld [vmem:[#allocation16 + $0x78] sm:$0xff] }
 0x387   :  { %4071 = vmatprep.subr.mxu1 %v3223_v33  ;;  %v3826_v33 = vld [vmem:[#allocation16 + $0xf0] sm:$0xff] }
 0x388   :  { %4072 = vmatpush3.msra.mxu1 %v3175_v45  ;;  %v3810_v45 = vld [vmem:[#allocation16 + $0x70] sm:$0xff] }
 0x389   :  { %v2954_v42 = vpop.f32.mrf.mxu0  ;;  %v3025_v43 = vpop.f32.mrf.mxu1  ;;  %4073 = vmatprep.subr.mxu1 %v3220_v35  ;;  %v3825_v35 = vld [vmem:[#allocation16 + $0xe8] sm:$0xff] }
 0x38a   :  { %v2955_v41 = vadd.f32 %v2954_v42, %v2884_v37  ;;  %4074 = vmatpush3.msra.mxu1 %v3172_v36  ;;  %v3824_v36 = vld [vmem:[#allocation16 + $0xe0] sm:$0xff]  ;;  %v3822_v42 = vld [vmem:[#allocation16 + $0xd0] sm:$0xff] }
 0x38b   :  { %v2956_v59 = vpop.f32.mrf.mxu0  ;;  %4075 = vmatprep.subr.mxu1 %v3217_v39  ;;  %v3027_v46 = vpop.f32.mrf.mxu1  ;;  %v3808_v37 = vld [vmem:[#allocation16 + $0x60] sm:$0xff]  ;;  %v3807_v39 = vld [vmem:[#allocation16 + $0x58] sm:$0xff] }
 0x38c   :  { %v2957_v25 = vadd.f32 %v2956_v59, %v2886_v15  ;;  %4076 = vmatpush3.msra.mxu1 %v3169_v44  ;;  %v3026_v52 = vadd.f32 %v3025_v43, %v2955_v41  ;;  %v3806_v43 = vld [vmem:[#allocation16 + $0x50] sm:$0xff]  ;;  %v3805_v44 = vld [vmem:[#allocation16 + $0x48] sm:$0xff]  ;;  %v3820_v15 = vld [vmem:[#allocation16 + $0xc0] sm:$0xff] }
 0x38d   :  { %4077 = vmatprep.subr.mxu1 %v3214_v22  ;;  %v3804_v41 = vld [vmem:[#allocation16 + $0x40] sm:$0xff]  ;;  %v3819_v22 = vld [vmem:[#allocation16 + $0xb8] sm:$0xff] }
 0x38e   :  { %v3028_v34 = vadd.f32 %v3027_v46, %v2957_v25  ;;  %4078 = vmatpush3.msra.mxu1 %v3166_v1  ;;  %v4738_v47 = vadd.f32 %v3051_v57, %v3026_v52  ;;  %v3803_v59 = vld [vmem:[#allocation16 + $0x38] sm:$0xff]  ;;  %v3818_v1 = vld [vmem:[#allocation16 + $0xb0] sm:$0xff]  ;;  %v3816_v52 = vld [vmem:[#allocation16 + $0xa0] sm:$0xff] }
 0x38f   :  { %3721 = vmatmul.mubr.f32.vlgmr.msra.gmra.mxu1 %v4726_v30  ;;  %v3343_v30 = vld [vmem:[#allocation13 + $0x898] sm:$0xff]  ;;  %4117 = vmatprep.subr.mxu1 %v3827_v26  ;;  %v3800_v57 = vld [vmem:[#allocation16 + $0x20] sm:$0xff] }
 0x390   :  { %v3067_v53 = vadd.f32 %v3055_v49, %v3028_v34  ;;  %4118 = vmatpush3.msra.mxu1 %v3811_v28  ;;  %v3802_v25 = vld [vmem:[#allocation16 + $0x30] sm:$0xff]  ;;  %v3801_v49 = vld [vmem:[#allocation16 + $0x28] sm:$0xff]  ;;  %v3815_v46 = vld [vmem:[#allocation16 + $0x98] sm:$0xff] }
 0x391   :  { %4119 = vmatprep.subr.mxu1 %v3826_v33  ;;  %v3799_v34 = vld [vmem:[#allocation16 + $0x18] sm:$0xff] }
 0x392   :  { %3579 = vmatprep.mubr.f32.mxu0 %v3067_v53  ;;  %4120 = vmatpush3.msra.mxu1 %v3810_v45 }
 0x393   :  { %3580 = vmatmul.mubr.f32.vlgmr.msra.gmra.mxu0 %v4738_v47  ;;  %4121 = vmatprep.subr.mxu1 %v3825_v35 }
 0x394   :  { %4083 = vmatpush3.msra.mxu0 %v3307_v9  ;;  %3790 = vmatprep.mubr.f32.mxu0 %v3067_v53  ;;  %v3814_v53 = vld [vmem:[#allocation16 + $0x90] sm:$0xff]  ;;  %v3813_v9 = vld [vmem:[#allocation16 + $0x88] sm:$0xff] }
 0x395   :  { %4084 = vmatprep.subr.mxu0 %v3352_v54  ;;  %4122 = vmatpush3.msra.mxu1 %v3809_v21  ;;  %v3797_v54 = vld [vmem:[#allocation16 + $0x8] sm:$0xff] }
 0x396   :  { %4085 = vmatpush3.msra.mxu0 %v3304_v56  ;;  %4123 = vmatprep.subr.mxu1 %v3824_v36  ;;  %v3812_v56 = vld [vmem:[#allocation16 + $0x80] sm:$0xff] }
 0x397   :  { %4086 = vmatprep.subr.mxu0 %v3349_v18  ;;  %4124 = vmatpush3.msra.mxu1 %v3808_v37  ;;  %v3796_v18 = vld [vmem:[#allocation16] sm:$0xff] }
 0x398   :  { %4087 = vmatpush3.msra.mxu0 %v3301_v48  ;;  %4125 = vmatprep.subr.mxu1 %v3823_v38  ;;  %v3843_v48 = vld [vmem:[#allocation16 + $0x178] sm:$0xff] }
 0x399   :  { %4088 = vmatprep.subr.mxu0 %v3346_v58  ;;  %4126 = vmatpush3.msra.mxu1 %v3807_v39  ;;  %v3842_v58 = vld [vmem:[#allocation16 + $0x170] sm:$0xff] }
 0x39a   :  { %4089 = vmatpush3.msra.mxu0 %v3298_v32  ;;  %4127 = vmatprep.subr.mxu1 %v3822_v42  ;;  %v3841_v32 = vld [vmem:[#allocation16 + $0x168] sm:$0xff] }
 0x39b   :  { %4090 = vmatprep.subr.mxu0 %v3343_v30  ;;  %4128 = vmatpush3.msra.mxu1 %v3806_v43  ;;  %v3840_v30 = vld [vmem:[#allocation16 + $0x160] sm:$0xff] }
 0x39c   :  { %4091 = vmatpush3.msra.mxu0 %v3295_v6  ;;  %4129 = vmatprep.subr.mxu1 %v3821_v10  ;;  %v3839_v6 = vld [vmem:[#allocation16 + $0x158] sm:$0xff] }
 0x39d   :  { %4092 = vmatprep.subr.mxu0 %v3340_v61  ;;  %4130 = vmatpush3.msra.mxu1 %v3805_v44  ;;  %v3838_v61 = vld [vmem:[#allocation16 + $0x150] sm:$0xff] }
 0x39e   :  { %4093 = vmatpush3.msra.mxu0 %v3292_v29  ;;  %4131 = vmatprep.subr.mxu1 %v3820_v15  ;;  %v3837_v29 = vld [vmem:[#allocation16 + $0x148] sm:$0xff] }
 0x39f   :  { %4094 = vmatprep.subr.mxu0 %v3337_v62  ;;  %4132 = vmatpush3.msra.mxu1 %v3804_v41  ;;  %v3836_v62 = vld [vmem:[#allocation16 + $0x140] sm:$0xff] }
 0x3a0   :  { %4095 = vmatpush3.msra.mxu0 %v3289_v63  ;;  %4133 = vmatprep.subr.mxu1 %v3819_v22  ;;  %v3835_v63 = vld [vmem:[#allocation16 + $0x138] sm:$0xff] }
 0x3a1   :  { %4096 = vmatprep.subr.mxu0 %v3334_v2  ;;  %4134 = vmatpush3.msra.mxu1 %v3803_v59  ;;  %v3834_v2 = vld [vmem:[#allocation16 + $0x130] sm:$0xff]  ;;  %v4011_v59 = vld [vmem:[#allocation18] ss:$0 sm:$0xff] }
 0x3a2   :  { %4097 = vmatpush3.msra.mxu0 %v3286_v3  ;;  %4135 = vmatprep.subr.mxu1 %v3818_v1  ;;  %v3833_v3 = vld [vmem:[#allocation16 + $0x128] sm:$0xff] }
 0x3a3   :  { %4098 = vmatprep.subr.mxu0 %v3331_v4  ;;  %4136 = vmatpush3.msra.mxu1 %v3802_v25  ;;  %v3832_v4 = vld [vmem:[#allocation16 + $0x120] sm:$0xff] }
 0x3a4   :  { %4099 = vmatpush3.msra.mxu0 %v3283_v5  ;;  %4137 = vmatprep.subr.mxu1 %v3817_v27  ;;  %v3831_v5 = vld [vmem:[#allocation16 + $0x118] sm:$0xff] }
 0x3a5   :  { %4100 = vmatprep.subr.mxu0 %v3328_v7  ;;  %4138 = vmatpush3.msra.mxu1 %v3801_v49  ;;  %v3830_v7 = vld [vmem:[#allocation16 + $0x110] sm:$0xff] }
 0x3a6   :  { %4101 = vmatpush3.msra.mxu0 %v3280_v8  ;;  %4139 = vmatprep.subr.mxu1 %v3816_v52  ;;  %v3829_v8 = vld [vmem:[#allocation16 + $0x108] sm:$0xff] }
 0x3a7   :  { %4102 = vmatprep.subr.mxu0 %v3325_v55  ;;  %4140 = vmatpush3.msra.mxu1 %v3800_v57  ;;  %v3828_v55 = vld [vmem:[#allocation16 + $0x100] sm:$0xff] }
 0x3a8   :  { %4103 = vmatpush3.msra.mxu0 %v3277_v40  ;;  %4141 = vmatprep.subr.mxu1 %v3815_v46 }
 0x3a9   :  { %4104 = vmatprep.subr.mxu0 %v3322_v51  ;;  %4142 = vmatpush3.msra.mxu1 %v3799_v34  ;;  %v3356_v51 = vld [vmem:[#allocation15] sm:$0x7] }
 0x3aa   :  { %4105 = vmatpush3.msra.mxu0 %v3274_v50  ;;  %4143 = vmatprep.subr.mxu1 %v3814_v53 }
 0x3ab   :  { %4106 = vmatprep.subr.mxu0 %v3319_v13  ;;  %v3365_v13 = vrot.slane %v3356_v51, %v3038_v12  ;;  %v3369_v12 = vrot.slane %v3356_v51, %v3042_v11 }
 0x3ac   :  { %4107 = vmatpush3.msra.mxu0 %v3271_v14  ;;  %v3361_v14 = vrot.slane %v3356_v51, %v3034_v24 }
 0x3ad   :  { %4108 = vmatprep.subr.mxu0 %v3316_v16 }
 0x3ae   :  { %4109 = vmatpush3.msra.mxu0 %v3268_v17 }
 0x3af   :  { %4110 = vmatprep.subr.mxu0 %v3313_v23 }
 0x3b0   :  { %4111 = vmatpush3.msra.mxu0 %v3265_v19 }
 0x3b1   :  { %4112 = vmatprep.subr.mxu0 %v3310_v60 }
 0x3b2   :  { %4113 = vmatpush3.msra.mxu0 %v3262_v20 }
 0x3b3   :  { %3791 = vmatmul.mubr.f32.vlgmr.msra.gmra.mxu0 %v4738_v47  ;;  %4169 = vmatprep.subr.mxu0 %v4451_v0  ;;  %v3798_v47 = vld [vmem:[#allocation16 + $0x10] sm:$0xff] }
 0x3b4   :  { %4144 = vmatpush3.msra.mxu1 %v3798_v47  ;;  %4170 = vmatpush3.msra.mxu0 %v3843_v48 }
 0x3b5   :  { %4145 = vmatprep.subr.mxu1 %v3813_v9  ;;  %4171 = vmatprep.subr.mxu0 %v4451_v0 }
 0x3b6   :  { %4146 = vmatpush3.msra.mxu1 %v3797_v54  ;;  %4172 = vmatpush3.msra.mxu0 %v3842_v58 }
 0x3b7   :  { %4147 = vmatprep.subr.mxu1 %v3812_v56  ;;  %4173 = vmatprep.subr.mxu0 %v4451_v0 }
 0x3b8   :  { %4148 = vmatpush3.msra.mxu1 %v3796_v18  ;;  %4174 = vmatpush3.msra.mxu0 %v3841_v32 }
 0x3b9   :  { %4175 = vmatprep.subr.mxu0 %v4451_v0  ;;  %4201 = vmatprep.mubr.msk.f32.mxu0 %vm4453_vm4, %v4451_v0 }
 0x3ba   :  { %4176 = vmatpush3.msra.mxu0 %v3840_v30 }
 0x3bb   :  { %4177 = vmatprep.subr.mxu0 %v4451_v0 }
 0x3bc   :  { %4178 = vmatpush3.msra.mxu0 %v3839_v6 }
 0x3bd   :  { %4179 = vmatprep.subr.mxu0 %v4451_v0 }
 0x3be   :  { %4180 = vmatpush3.msra.mxu0 %v3838_v61 }
 0x3bf   :  { %4181 = vmatprep.subr.mxu0 %v4451_v0 }
 0x3c0   :  { %4182 = vmatpush3.msra.mxu0 %v3837_v29 }
 0x3c1   :  { %4183 = vmatprep.subr.mxu0 %v4451_v0 }
 0x3c2   :  { %4184 = vmatpush3.msra.mxu0 %v3836_v62 }
 0x3c3   :  { %4185 = vmatprep.subr.mxu0 %v4451_v0 }
 0x3c4   :  { %4186 = vmatpush3.msra.mxu0 %v3835_v63 }
 0x3c5   :  { %4187 = vmatprep.subr.mxu0 %v4451_v0 }
 0x3c6   :  { %4188 = vmatpush3.msra.mxu0 %v3834_v2 }
 0x3c7   :  { %4189 = vmatprep.subr.mxu0 %v4451_v0 }
 0x3c8   :  { %4190 = vmatpush3.msra.mxu0 %v3833_v3 }
 0x3c9   :  { %4191 = vmatprep.subr.mxu0 %v4451_v0 }
 0x3ca   :  { %4192 = vmatpush3.msra.mxu0 %v3832_v4  ;;  %v3439_v40 = vpop.f32.mrf.mxu0 }
 0x3cb   :  { %4193 = vmatprep.subr.mxu0 %v4451_v0  ;;  %v3440_v19 = vadd.f32 %v3439_v40, %v3361_v14 }
 0x3cc   :  { %4194 = vmatpush3.msra.mxu0 %v3831_v5  ;;  %v3441_v16 = vpop.f32.mrf.mxu0 }
 0x3cd   :  { %4195 = vmatprep.subr.mxu0 %v4451_v0  ;;  %v3442_v23 = vadd.f32 %v3441_v16, %v3365_v13 }
 0x3ce   :  { %4196 = vmatpush3.msra.mxu0 %v3830_v7 }
 0x3cf   :  { %4197 = vmatprep.subr.mxu0 %v4451_v0 }
 0x3d0   :  { %4198 = vmatpush3.msra.mxu0 %v3829_v8 }
 0x3d1   :  { %4199 = vmatprep.subr.mxu0 %v4451_v0 }
 0x3d2   :  { %4200 = vmatpush3.msra.mxu0 %v3828_v55 }
 0x40f   :  { %v3510_v50 = vpop.f32.mrf.mxu1 }
 0x410   :  { %v3511_v26 = vadd.f32 %v3510_v50, %v3440_v19 }
 0x411   :  { %v3512_v17 = vpop.f32.mrf.mxu1 }
 0x412   :  { %v3513_v20 = vadd.f32 %v3512_v17, %v3442_v23 }
 0x42f   :  { %v4044_v0 = vpop.f32.mrf.mxu1 }
 0x431   :  { %v4045_v35 = vpop.f32.mrf.mxu1 }
 0x432   :  { %v4046_v24 = vadd.f32 %v4045_v35, %v4044_v0 }
 0x434   :  { %v3653_v39 = vadd.f32 %v4046_v24, %v3369_v12 }
 0x44f   :  { %v4079_v21 = vpop.f32.mrf.mxu1 }
 0x451   :  { %v4080_v36 = vpop.f32.mrf.mxu1 }
 0x452   :  { %v4081_v37 = vadd.f32 %v4080_v36, %v4079_v21 }
 0x453   :  { %v3581_v60 = vpop.f32.mrf.mxu0 }
 0x454   :  { %v3582_v45 = vadd.f32 %v3581_v60, %v3511_v26  ;;  %v3723_v43 = vadd.f32 %v4081_v37, %v3653_v39 }
 0x455   :  { %v3583_v28 = vpop.f32.mrf.mxu0 }
 0x456   :  { %v3584_v33 = vadd.f32 %v3583_v28, %v3513_v20 }
 0x458   :  { %3915 = vmatprep.mubr.f32.mxu1 %v3584_v33 }
 0x459   :  { %3916 = vmatmul.mubr.f32.vlgmr.msra.gmra.mxu1 %v3582_v45 }
 0x473   :  { %v4114_v38 = vpop.f32.mrf.mxu0 }
 0x475   :  { %v4115_v42 = vpop.f32.mrf.mxu0 }
 0x476   :  { %v4116_v10 = vadd.f32 %v4115_v42, %v4114_v38 }
 0x478   :  { %v3793_v44 = vadd.f32 %v4116_v10, %v3723_v43 }
 0x47a   :  { %4202 = vmatmul.mubr.f32.vlgmr.msra.gmra.mxu0 %v3793_v44 }
 0x519   :  { %v4149_v15 = vpop.f32.mrf.mxu1 }
 0x51b   :  { %v4150_v41 = vpop.f32.mrf.mxu1 }
 0x51c   :  { %v4151_v22 = vadd.f32 %v4150_v41, %v4149_v15 }
 0x51e   :  { %v3918_v1 = vadd.f32 %v4151_v22, %v4011_v59 }
 0x53a   :  { %v3987_v25 = vpop.f32.mrf.mxu0 }
 0x53b   :  { %v3988_v27 = vadd.f32 %v3987_v25, %v3918_v1 }
 0x53c   :  { %v4203_v31 = vpop.f32.mrf.mxu0 }
 0x53d   :  { %3991 = vst [vmem:[#allocation19] sm:$0x3] %v3988_v27 }
 0x53e   :  { %4415 = shalt.err (!%p4412_p7)
}
 0x53f   :  { %4001 = dma.vmem_to_hbm [thread:$0]  %s3999_s8, 32, %s4777_s9, [#allocation6]  }
 0x540   :  { %4434 = dma.done.wait [#allocation6], 32  }
 0x541   :  { %4435 = vsyncadd [#allocation6], 4294967264 }
 0x542   :  { %4005 = vsyncpa [#allocation5], 1 }
 0x543   :  { %4006 = vsyncpa [#allocation8], 1 }
 0x544   :  { %4007 = vsyncpa [#allocation11], 1 }
 0x545   :  { %4008 = vsyncpa [#allocation14], 1 }
 0x546   :  { %4009 = vsyncpa [#allocation17], 1 }
 0x547   :  { %4010 = vsyncpa [#allocation6], 1 }

</bundles_post_ra>
